<compile_context>
chip_gen: v7x
topology: tpu7x:2x2x1
jax: 0.10.0
libtpu: 0.0.40
codegen_flags: <defaults>
</compile_context>

<pallas_src>
import functools

import jax
import jax.numpy as jnp
from jax.experimental import pallas as pl
from jax.experimental.pallas import tpu as pltpu

LANE = 128  # pad output channels to a full vreg lane width

# ----------------------------------------------------------------------------
# Network configuration (mirrors NetPTQ.__init__)
#   SubMConvBNReLU(1, 32, 3)        28x28 -> 28x28
#   SubMConvBNReLU(32, 64, 3)       28x28 -> 28x28
#   SparseConvBNReLU(64, 64, 2, 2)  28x28 -> 14x14
#   SparseConvBNReLU(64, 64, 2, 2)  14x14 ->  7x7
#   SparseConvBNReLU(64, 64, 3, 2)  7x7   ->  4x4   (padding=1)
#   SparseConv2d(64, 10, 4, 4)      4x4   ->  1x1   (bias=True, no BN/ReLU)
#   ToDense() -> flatten -> log_softmax
# ----------------------------------------------------------------------------
LAYERS = (
    dict(cin=1,  cout=32, k=3, s=1, p=1, subm=True,  bn=True,  relu=True,  bias=False),
    dict(cin=32, cout=64, k=3, s=1, p=1, subm=True,  bn=True,  relu=True,  bias=False),
    dict(cin=64, cout=64, k=2, s=2, p=0, subm=False, bn=True,  relu=True,  bias=False),
    dict(cin=64, cout=64, k=2, s=2, p=0, subm=False, bn=True,  relu=True,  bias=False),
    dict(cin=64, cout=64, k=3, s=2, p=1, subm=False, bn=True,  relu=True,  bias=False),
    dict(cin=64, cout=10, k=4, s=4, p=0, subm=False, bn=False, relu=False, bias=True),
)


def _round_up(x, m):
    return (x + m - 1) // m * m


# ----------------------------------------------------------------------------
# Pallas kernel: im2col-matmul conv (bf16 MXU, f32 acc) + bias + ReLU +
# active-site mask, optionally fused log_softmax over the valid channels.
# ----------------------------------------------------------------------------
def _conv_kernel(p_ref, w_ref, b_ref, m_ref, o_ref, *,
                 apply_relu, apply_logsoftmax, n_valid):
    acc = jnp.dot(p_ref[...], w_ref[...], preferred_element_type=jnp.float32)
    y = acc + b_ref[...]                      # folded-BN / conv bias (f32)
    if apply_relu:
        y = jnp.maximum(y, 0.0)
    active = m_ref[...] > 0.5                 # (TM, 1) active-site mask
    y = jnp.where(active, y, 0.0)             # inactive sites stay exactly 0
    if apply_logsoftmax:
        col = jax.lax.broadcasted_iota(jnp.int32, y.shape, dimension=1)
        valid = col < n_valid                 # ignore lane-padded channels
        ym = jnp.where(valid, y, -jnp.inf)
        mx = jnp.max(ym, axis=-1, keepdims=True)
        s = ym - mx
        lse = jnp.log(jnp.sum(jnp.exp(s), axis=-1, keepdims=True))
        y = jnp.where(valid, s - lse, 0.0)
    o_ref[...] = y.astype(o_ref.dtype)


def conv_bn_relu_pallas(patches, w_mat, bias, mask, *, apply_relu,
                        apply_logsoftmax=False, n_valid=0,
                        out_dtype=jnp.bfloat16, tm_max=512):
    """patches: (M, Kd) bf16, w_mat: (Kd, 128) bf16, bias: (1, 128) f32,
    mask: (M, 1) f32.  Returns (M, 128) in out_dtype."""
    M, Kd = patches.shape
    Cop = w_mat.shape[1]
    tm = min(tm_max, _round_up(M, 16))        # bf16-friendly row tile
    Mp = _round_up(M, tm)
    if Mp != M:
        patches = jnp.pad(patches, ((0, Mp - M), (0, 0)))
        mask = jnp.pad(mask, ((0, Mp - M), (0, 0)))

    kern = functools.partial(_conv_kernel, apply_relu=apply_relu,
                             apply_logsoftmax=apply_logsoftmax,
                             n_valid=n_valid)
    out = pl.pallas_call(
        kern,
        grid=(Mp // tm,),
        in_specs=[
            pl.BlockSpec((tm, Kd), lambda i: (i, 0)),    # patches: streamed M tiles
            pl.BlockSpec((Kd, Cop), lambda i: (0, 0)),   # weights: VMEM-resident
            pl.BlockSpec((1, Cop), lambda i: (0, 0)),    # bias:    VMEM-resident
            pl.BlockSpec((tm, 1), lambda i: (i, 0)),     # per-row active mask
        ],
        out_specs=pl.BlockSpec((tm, Cop), lambda i: (i, 0)),
        out_shape=jax.ShapeDtypeStruct((Mp, Cop), out_dtype),
        compiler_params=pltpu.CompilerParams(
            dimension_semantics=("parallel",),           # megacore (v7x) sharding
            vmem_limit_bytes=32 * 1024 * 1024,           # safe on v7x's 64 MiB VMEM
        ),
    )(patches, w_mat, bias, mask)
    return out[:M]


# ----------------------------------------------------------------------------
# Plain-JAX glue: im2col, parameter init / BN folding, forward driver
# ----------------------------------------------------------------------------
def im2col(x, k, stride, pad):
    """x: (B, H, W, C) -> patches (B*Ho*Wo, k*k*C), Ho, Wo.  Tap order (ki, kj, c)."""
    B, H, W, C = x.shape
    xp = jnp.pad(x, ((0, 0), (pad, pad), (pad, pad), (0, 0)))
    Ho = (H + 2 * pad - k) // stride + 1
    Wo = (W + 2 * pad - k) // stride + 1
    cols = []
    for ki in range(k):
        for kj in range(k):
            cols.append(xp[:, ki:ki + stride * Ho:stride, kj:kj + stride * Wo:stride, :])
    patches = jnp.concatenate(cols, axis=-1)
    return patches.reshape(B * Ho * Wo, k * k * C), Ho, Wo


def init_params(key):
    params = []
    for cfg in LAYERS:
        key, kw, kg, kb, km, kv, kbias = jax.random.split(key, 7)
        cin, cout, k = cfg["cin"], cfg["cout"], cfg["k"]
        # PyTorch conv weight layout (Cout, Cin, Kh, Kw) -> (k*k*Cin, Cout), tap
        # order (ki, kj, c) matching im2col.
        w = jax.random.normal(kw, (cout, cin, k, k), jnp.float32) * 0.05
        w_mat = jnp.transpose(w, (2, 3, 1, 0)).reshape(k * k * cin, cout)
        if cfg["bn"]:
            gamma = jax.random.uniform(kg, (cout,), jnp.float32, 0.5, 1.5)
            beta = jax.random.normal(kb, (cout,), jnp.float32) * 0.1
            mean = jax.random.normal(km, (cout,), jnp.float32) * 0.1
            var = jax.random.uniform(kv, (cout,), jnp.float32, 0.5, 1.5)
            scale = gamma / jnp.sqrt(var + 1e-5)          # eval-mode BN fold
            bias = beta - mean * scale
        else:
            scale = jnp.ones((cout,), jnp.float32)
            if cfg["bias"]:
                bias = jax.random.normal(kbias, (cout,), jnp.float32) * 0.1
            else:
                bias = jnp.zeros((cout,), jnp.float32)
        # Fold BN scale into the weights; pad K to a multiple of 16 and Cout to
        # 128 lanes (zero rows/cols) for clean bf16 tiling + lane-dense stores.
        kd = k * k * cin
        kdp = _round_up(kd, 16)
        w_fold = w_mat * scale[None, :]
        w_fold = jnp.pad(w_fold, ((0, kdp - kd), (0, LANE - cout))).astype(jnp.bfloat16)
        bias_p = jnp.pad(bias, (0, LANE - cout)).reshape(1, LANE).astype(jnp.float32)
        params.append(dict(w_mat=w_fold, bias=bias_p))
    return params


def net_ptq_forward(features, indices, batch_size, params):
    """features: (N, 1) f32, indices: (N, 3) i32 = [batch, y, x], spatial 28x28."""
    H = W = 28
    # QuantStub: identity in the fp model (pre torch.ao.quantization convert).
    x = jnp.zeros((batch_size, H, W, 1), jnp.bfloat16)
    x = x.at[indices[:, 0], indices[:, 1], indices[:, 2], 0].set(
        features[:, 0].astype(jnp.bfloat16))
    mask = jnp.zeros((batch_size, H, W), jnp.float32)
    mask = mask.at[indices[:, 0], indices[:, 1], indices[:, 2]].set(1.0)

    n_layers = len(LAYERS)
    for li, (cfg, p) in enumerate(zip(LAYERS, params)):
        k, s, pad = cfg["k"], cfg["s"], cfg["p"]
        B = x.shape[0]
        patches, Ho, Wo = im2col(x, k, s, pad)
        kdp = p["w_mat"].shape[0]
        if patches.shape[1] != kdp:              # K padding (layer 1: 9 -> 16)
            patches = jnp.pad(patches, ((0, 0), (0, kdp - patches.shape[1])))
        if cfg["subm"]:
            out_mask = mask                      # submanifold: active set unchanged
        else:
            mpatch, _, _ = im2col(mask[..., None], k, s, pad)
            out_mask = (jnp.max(mpatch, axis=-1) > 0).astype(jnp.float32).reshape(B, Ho, Wo)

        last = li == n_layers - 1
        y = conv_bn_relu_pallas(
            patches.astype(jnp.bfloat16), p["w_mat"], p["bias"],
            out_mask.reshape(-1, 1),
            apply_relu=cfg["relu"],
            apply_logsoftmax=last, n_valid=cfg["cout"],
            out_dtype=jnp.float32 if last else jnp.bfloat16,
        )
        if last:
            # ToDense -> (B, 10, 1, 1); flatten -> (B, 10).  DeQuantStub identity.
            # log_softmax already applied in the kernel epilogue.
            return y[:, :cfg["cout"]].reshape(batch_size, cfg["cout"])
        x = y[:, :cfg["cout"]].reshape(B, Ho, Wo, cfg["cout"])
        mask = out_mask


# ----------------------------------------------------------------------------
if __name__ == "__main__":
    key = jax.random.PRNGKey(0)
    kp, kf, ki0, ki1 = jax.random.split(key, 4)
    params = init_params(kp)

    batch_size = 2
    n_active_per_image = 100  # small synthetic sparse MNIST-like input
    idx_list = []
    for b, kk in zip(range(batch_size), [ki0, ki1]):
        flat = jax.random.permutation(kk, 28 * 28)[:n_active_per_image]
        ys = (flat // 28).astype(jnp.int32)
        xs = (flat % 28).astype(jnp.int32)
        bs = jnp.full((n_active_per_image,), b, jnp.int32)
        idx_list.append(jnp.stack([bs, ys, xs], axis=1))
    indices = jnp.concatenate(idx_list, axis=0)
    features = jax.random.normal(kf, (indices.shape[0], 1), jnp.float32)

    fwd = jax.jit(functools.partial(net_ptq_forward,
                                    batch_size=batch_size, params=params))
    out = jax.block_until_ready(fwd(features, indices))
    assert out.shape == (batch_size, 10)
    assert bool(jnp.all(jnp.isfinite(out)))
    # log-softmax rows must exponentiate-sum to 1
    assert bool(jnp.allclose(jnp.sum(jnp.exp(out), axis=1), 1.0, atol=1e-3))
    print("KERNEL_OK")
</pallas_src>

<mosaic_0001>
module attributes {stable_mosaic.version = 11 : i64} {
  func.func @_conv_kernel(%arg0: i32, %arg1: memref<512x16xbf16, #tpu.memory_space<vmem>>, %arg2: memref<16x128xbf16, #tpu.memory_space<vmem>>, %arg3: memref<1x128xf32, #tpu.memory_space<vmem>>, %arg4: memref<512x1xf32, #tpu.memory_space<vmem>>, %arg5: memref<512x128xbf16, #tpu.memory_space<vmem>>) attributes {dimension_semantics = [#tpu.dimension_semantics<parallel>], iteration_bounds = array<i64: 4>, scalar_prefetch = 0 : i64, scratch_operands = 0 : i64, tpu.core_type = #tpu.core_type<tc>, window_params = [{transform_indices = @transform_0, window_bounds = array<i64: 512, 16>}, {pipeline_mode = #tpu.pipeline_mode<synchronous>, transform_indices = @transform_1, window_bounds = array<i64: 16, 128>}, {pipeline_mode = #tpu.pipeline_mode<synchronous>, transform_indices = @transform_2, window_bounds = array<i64: 1, 128>}, {transform_indices = @transform_3, window_bounds = array<i64: 512, 1>}, {transform_indices = @transform_4, window_bounds = array<i64: 512, 128>}]} {
    %c0 = arith.constant 0 : index
    %c0_0 = arith.constant 0 : index
    %0 = vector.load %arg1[%c0, %c0_0] : memref<512x16xbf16, #tpu.memory_space<vmem>>, vector<512x16xbf16>
    %c0_1 = arith.constant 0 : index
    %c0_2 = arith.constant 0 : index
    %1 = vector.load %arg2[%c0_1, %c0_2] : memref<16x128xbf16, #tpu.memory_space<vmem>>, vector<16x128xbf16>
    %cst = arith.constant dense<0.000000e+00> : vector<512x128xf32>
    %2 = tpu.matmul %0, %1, %cst {dimension_numbers = #tpu.dot_dimension_numbers<[1], [0], [0], [1], [0, 0, 1, 1], [], []>} : vector<512x16xbf16>, vector<16x128xbf16>, vector<512x128xf32> -> vector<512x128xf32>
    %c0_3 = arith.constant 0 : index
    %c0_4 = arith.constant 0 : index
    %3 = vector.load %arg3[%c0_3, %c0_4] : memref<1x128xf32, #tpu.memory_space<vmem>>, vector<1x128xf32>
    %4 = vector.broadcast %3 : vector<1x128xf32> to vector<512x128xf32>
    %5 = arith.addf %2, %4 : vector<512x128xf32>
    %cst_5 = arith.constant 0.000000e+00 : f32
    %6 = vector.broadcast %cst_5 : f32 to vector<512x128xf32>
    %7 = arith.maximumf %5, %6 : vector<512x128xf32>
    %c0_6 = arith.constant 0 : index
    %c0_7 = arith.constant 0 : index
    %8 = vector.load %arg4[%c0_6, %c0_7] : memref<512x1xf32, #tpu.memory_space<vmem>>, vector<512x1xf32>
    %cst_8 = arith.constant 5.000000e-01 : f32
    %9 = vector.broadcast %cst_8 : f32 to vector<512x1xf32>
    %10 = arith.cmpf ogt, %8, %9 : vector<512x1xf32>
    %cst_9 = arith.constant 0.000000e+00 : f32
    %11 = vector.shape_cast %10 : vector<512x1xi1> to vector<512x1xi1>
    %12 = vector.broadcast %11 : vector<512x1xi1> to vector<512x128xi1>
    %13 = vector.broadcast %cst_9 : f32 to vector<512x128xf32>
    %14 = arith.select %12, %7, %13 : vector<512x128xi1>, vector<512x128xf32>
    %15 = arith.truncf %14 : vector<512x128xf32> to vector<512x128xbf16>
    %c0_10 = arith.constant 0 : index
    %c0_11 = arith.constant 0 : index
    %16 = vector.load %arg5[%c0_10, %c0_11] : memref<512x128xbf16, #tpu.memory_space<vmem>>, vector<512x128xbf16>
    tpu.vector_store %arg5[%c0_10, %c0_11], %15 {strides = array<i32>} : memref<512x128xbf16, #tpu.memory_space<vmem>>, vector<512x128xbf16>,
    return
  }
  func.func @transform_0(%arg0: i32) -> (i32, i32) {
    %c0_i32 = arith.constant 0 : i32
    %c0_i32_0 = arith.constant 0 : i32
    return %arg0, %c0_i32 : i32, i32
  }
  func.func @transform_1(%arg0: i32) -> (i32, i32) {
    %c0_i32 = arith.constant 0 : i32
    %c0_i32_0 = arith.constant 0 : i32
    %c0_i32_1 = arith.constant 0 : i32
    return %c0_i32, %c0_i32_0 : i32, i32
  }
  func.func @transform_2(%arg0: i32) -> (i32, i32) {
    %c0_i32 = arith.constant 0 : i32
    %c0_i32_0 = arith.constant 0 : i32
    %c0_i32_1 = arith.constant 0 : i32
    return %c0_i32, %c0_i32_0 : i32, i32
  }
  func.func @transform_3(%arg0: i32) -> (i32, i32) {
    %c0_i32 = arith.constant 0 : i32
    %c0_i32_0 = arith.constant 0 : i32
    return %arg0, %c0_i32 : i32, i32
  }
  func.func @transform_4(%arg0: i32) -> (i32, i32) {
    %c0_i32 = arith.constant 0 : i32
    %c0_i32_0 = arith.constant 0 : i32
    return %arg0, %c0_i32 : i32, i32
  }
}

module attributes {stable_mosaic.version = 11 : i64} {
  func.func @_conv_kernel(%arg0: i32, %arg1: memref<512x288xbf16, #tpu.memory_space<vmem>>, %arg2: memref<288x128xbf16, #tpu.memory_space<vmem>>, %arg3: memref<1x128xf32, #tpu.memory_space<vmem>>, %arg4: memref<512x1xf32, #tpu.memory_space<vmem>>, %arg5: memref<512x128xbf16, #tpu.memory_space<vmem>>) attributes {dimension_semantics = [#tpu.dimension_semantics<parallel>], iteration_bounds = array<i64: 4>, scalar_prefetch = 0 : i64, scratch_operands = 0 : i64, tpu.core_type = #tpu.core_type<tc>, window_params = [{transform_indices = @transform_0, window_bounds = array<i64: 512, 288>}, {pipeline_mode = #tpu.pipeline_mode<synchronous>, transform_indices = @transform_1, window_bounds = array<i64: 288, 128>}, {pipeline_mode = #tpu.pipeline_mode<synchronous>, transform_indices = @transform_2, window_bounds = array<i64: 1, 128>}, {transform_indices = @transform_3, window_bounds = array<i64: 512, 1>}, {transform_indices = @transform_4, window_bounds = array<i64: 512, 128>}]} {
    %c0 = arith.constant 0 : index
    %c0_0 = arith.constant 0 : index
    %0 = vector.load %arg1[%c0, %c0_0] : memref<512x288xbf16, #tpu.memory_space<vmem>>, vector<512x288xbf16>
    %c0_1 = arith.constant 0 : index
    %c0_2 = arith.constant 0 : index
    %1 = vector.load %arg2[%c0_1, %c0_2] : memref<288x128xbf16, #tpu.memory_space<vmem>>, vector<288x128xbf16>
    %cst = arith.constant dense<0.000000e+00> : vector<512x128xf32>
    %2 = tpu.matmul %0, %1, %cst {dimension_numbers = #tpu.dot_dimension_numbers<[1], [0], [0], [1], [0, 0, 1, 1], [], []>} : vector<512x288xbf16>, vector<288x128xbf16>, vector<512x128xf32> -> vector<512x128xf32>
    %c0_3 = arith.constant 0 : index
    %c0_4 = arith.constant 0 : index
    %3 = vector.load %arg3[%c0_3, %c0_4] : memref<1x128xf32, #tpu.memory_space<vmem>>, vector<1x128xf32>
    %4 = vector.broadcast %3 : vector<1x128xf32> to vector<512x128xf32>
    %5 = arith.addf %2, %4 : vector<512x128xf32>
    %cst_5 = arith.constant 0.000000e+00 : f32
    %6 = vector.broadcast %cst_5 : f32 to vector<512x128xf32>
    %7 = arith.maximumf %5, %6 : vector<512x128xf32>
    %c0_6 = arith.constant 0 : index
    %c0_7 = arith.constant 0 : index
    %8 = vector.load %arg4[%c0_6, %c0_7] : memref<512x1xf32, #tpu.memory_space<vmem>>, vector<512x1xf32>
    %cst_8 = arith.constant 5.000000e-01 : f32
    %9 = vector.broadcast %cst_8 : f32 to vector<512x1xf32>
    %10 = arith.cmpf ogt, %8, %9 : vector<512x1xf32>
    %cst_9 = arith.constant 0.000000e+00 : f32
    %11 = vector.shape_cast %10 : vector<512x1xi1> to vector<512x1xi1>
    %12 = vector.broadcast %11 : vector<512x1xi1> to vector<512x128xi1>
    %13 = vector.broadcast %cst_9 : f32 to vector<512x128xf32>
    %14 = arith.select %12, %7, %13 : vector<512x128xi1>, vector<512x128xf32>
    %15 = arith.truncf %14 : vector<512x128xf32> to vector<512x128xbf16>
    %c0_10 = arith.constant 0 : index
    %c0_11 = arith.constant 0 : index
    %16 = vector.load %arg5[%c0_10, %c0_11] : memref<512x128xbf16, #tpu.memory_space<vmem>>, vector<512x128xbf16>
    tpu.vector_store %arg5[%c0_10, %c0_11], %15 {strides = array<i32>} : memref<512x128xbf16, #tpu.memory_space<vmem>>, vector<512x128xbf16>,
    return
  }
  func.func @transform_0(%arg0: i32) -> (i32, i32) {
    %c0_i32 = arith.constant 0 : i32
    %c0_i32_0 = arith.constant 0 : i32
    return %arg0, %c0_i32 : i32, i32
  }
  func.func @transform_1(%arg0: i32) -> (i32, i32) {
    %c0_i32 = arith.constant 0 : i32
    %c0_i32_0 = arith.constant 0 : i32
    %c0_i32_1 = arith.constant 0 : i32
    return %c0_i32, %c0_i32_0 : i32, i32
  }
  func.func @transform_2(%arg0: i32) -> (i32, i32) {
    %c0_i32 = arith.constant 0 : i32
    %c0_i32_0 = arith.constant 0 : i32
    %c0_i32_1 = arith.constant 0 : i32
    return %c0_i32, %c0_i32_0 : i32, i32
  }
  func.func @transform_3(%arg0: i32) -> (i32, i32) {
    %c0_i32 = arith.constant 0 : i32
    %c0_i32_0 = arith.constant 0 : i32
    return %arg0, %c0_i32 : i32, i32
  }
  func.func @transform_4(%arg0: i32) -> (i32, i32) {
    %c0_i32 = arith.constant 0 : i32
    %c0_i32_0 = arith.constant 0 : i32
    return %arg0, %c0_i32 : i32, i32
  }
}

module attributes {stable_mosaic.version = 11 : i64} {
  func.func @_conv_kernel(%arg0: i32, %arg1: memref<400x256xbf16, #tpu.memory_space<vmem>>, %arg2: memref<256x128xbf16, #tpu.memory_space<vmem>>, %arg3: memref<1x128xf32, #tpu.memory_space<vmem>>, %arg4: memref<400x1xf32, #tpu.memory_space<vmem>>, %arg5: memref<400x128xbf16, #tpu.memory_space<vmem>>) attributes {dimension_semantics = [#tpu.dimension_semantics<parallel>], iteration_bounds = array<i64: 1>, scalar_prefetch = 0 : i64, scratch_operands = 0 : i64, tpu.core_type = #tpu.core_type<tc>, window_params = [{transform_indices = @transform_0, window_bounds = array<i64: 400, 256>}, {pipeline_mode = #tpu.pipeline_mode<synchronous>, transform_indices = @transform_1, window_bounds = array<i64: 256, 128>}, {pipeline_mode = #tpu.pipeline_mode<synchronous>, transform_indices = @transform_2, window_bounds = array<i64: 1, 128>}, {transform_indices = @transform_3, window_bounds = array<i64: 400, 1>}, {transform_indices = @transform_4, window_bounds = array<i64: 400, 128>}]} {
    %c0 = arith.constant 0 : index
    %c0_0 = arith.constant 0 : index
    %0 = vector.load %arg1[%c0, %c0_0] : memref<400x256xbf16, #tpu.memory_space<vmem>>, vector<400x256xbf16>
    %c0_1 = arith.constant 0 : index
    %c0_2 = arith.constant 0 : index
    %1 = vector.load %arg2[%c0_1, %c0_2] : memref<256x128xbf16, #tpu.memory_space<vmem>>, vector<256x128xbf16>
    %cst = arith.constant dense<0.000000e+00> : vector<400x128xf32>
    %2 = tpu.matmul %0, %1, %cst {dimension_numbers = #tpu.dot_dimension_numbers<[1], [0], [0], [1], [0, 0, 1, 1], [], []>} : vector<400x256xbf16>, vector<256x128xbf16>, vector<400x128xf32> -> vector<400x128xf32>
    %c0_3 = arith.constant 0 : index
    %c0_4 = arith.constant 0 : index
    %3 = vector.load %arg3[%c0_3, %c0_4] : memref<1x128xf32, #tpu.memory_space<vmem>>, vector<1x128xf32>
    %4 = vector.broadcast %3 : vector<1x128xf32> to vector<400x128xf32>
    %5 = arith.addf %2, %4 : vector<400x128xf32>
    %cst_5 = arith.constant 0.000000e+00 : f32
    %6 = vector.broadcast %cst_5 : f32 to vector<400x128xf32>
    %7 = arith.maximumf %5, %6 : vector<400x128xf32>
    %c0_6 = arith.constant 0 : index
    %c0_7 = arith.constant 0 : index
    %8 = vector.load %arg4[%c0_6, %c0_7] : memref<400x1xf32, #tpu.memory_space<vmem>>, vector<400x1xf32>
    %cst_8 = arith.constant 5.000000e-01 : f32
    %9 = vector.broadcast %cst_8 : f32 to vector<400x1xf32>
    %10 = arith.cmpf ogt, %8, %9 : vector<400x1xf32>
    %cst_9 = arith.constant 0.000000e+00 : f32
    %11 = vector.shape_cast %10 : vector<400x1xi1> to vector<400x1xi1>
    %12 = vector.broadcast %11 : vector<400x1xi1> to vector<400x128xi1>
    %13 = vector.broadcast %cst_9 : f32 to vector<400x128xf32>
    %14 = arith.select %12, %7, %13 : vector<400x128xi1>, vector<400x128xf32>
    %15 = arith.truncf %14 : vector<400x128xf32> to vector<400x128xbf16>
    %c0_10 = arith.constant 0 : index
    %c0_11 = arith.constant 0 : index
    %16 = vector.load %arg5[%c0_10, %c0_11] : memref<400x128xbf16, #tpu.memory_space<vmem>>, vector<400x128xbf16>
    tpu.vector_store %arg5[%c0_10, %c0_11], %15 {strides = array<i32>} : memref<400x128xbf16, #tpu.memory_space<vmem>>, vector<400x128xbf16>,
    return
  }
  func.func @transform_0(%arg0: i32) -> (i32, i32) {
    %c0_i32 = arith.constant 0 : i32
    %c0_i32_0 = arith.constant 0 : i32
    return %arg0, %c0_i32 : i32, i32
  }
  func.func @transform_1(%arg0: i32) -> (i32, i32) {
    %c0_i32 = arith.constant 0 : i32
    %c0_i32_0 = arith.constant 0 : i32
    %c0_i32_1 = arith.constant 0 : i32
    return %c0_i32, %c0_i32_0 : i32, i32
  }
  func.func @transform_2(%arg0: i32) -> (i32, i32) {
    %c0_i32 = arith.constant 0 : i32
    %c0_i32_0 = arith.constant 0 : i32
    %c0_i32_1 = arith.constant 0 : i32
    return %c0_i32, %c0_i32_0 : i32, i32
  }
  func.func @transform_3(%arg0: i32) -> (i32, i32) {
    %c0_i32 = arith.constant 0 : i32
    %c0_i32_0 = arith.constant 0 : i32
    return %arg0, %c0_i32 : i32, i32
  }
  func.func @transform_4(%arg0: i32) -> (i32, i32) {
    %c0_i32 = arith.constant 0 : i32
    %c0_i32_0 = arith.constant 0 : i32
    return %arg0, %c0_i32 : i32, i32
  }
}

module attributes {stable_mosaic.version = 11 : i64} {
  func.func @_conv_kernel(%arg0: i32, %arg1: memref<112x256xbf16, #tpu.memory_space<vmem>>, %arg2: memref<256x128xbf16, #tpu.memory_space<vmem>>, %arg3: memref<1x128xf32, #tpu.memory_space<vmem>>, %arg4: memref<112x1xf32, #tpu.memory_space<vmem>>, %arg5: memref<112x128xbf16, #tpu.memory_space<vmem>>) attributes {dimension_semantics = [#tpu.dimension_semantics<parallel>], iteration_bounds = array<i64: 1>, scalar_prefetch = 0 : i64, scratch_operands = 0 : i64, tpu.core_type = #tpu.core_type<tc>, window_params = [{transform_indices = @transform_0, window_bounds = array<i64: 112, 256>}, {pipeline_mode = #tpu.pipeline_mode<synchronous>, transform_indices = @transform_1, window_bounds = array<i64: 256, 128>}, {pipeline_mode = #tpu.pipeline_mode<synchronous>, transform_indices = @transform_2, window_bounds = array<i64: 1, 128>}, {transform_indices = @transform_3, window_bounds = array<i64: 112, 1>}, {transform_indices = @transform_4, window_bounds = array<i64: 112, 128>}]} {
    %c0 = arith.constant 0 : index
    %c0_0 = arith.constant 0 : index
    %0 = vector.load %arg1[%c0, %c0_0] : memref<112x256xbf16, #tpu.memory_space<vmem>>, vector<112x256xbf16>
    %c0_1 = arith.constant 0 : index
    %c0_2 = arith.constant 0 : index
    %1 = vector.load %arg2[%c0_1, %c0_2] : memref<256x128xbf16, #tpu.memory_space<vmem>>, vector<256x128xbf16>
    %cst = arith.constant dense<0.000000e+00> : vector<112x128xf32>
    %2 = tpu.matmul %0, %1, %cst {dimension_numbers = #tpu.dot_dimension_numbers<[1], [0], [0], [1], [0, 0, 1, 1], [], []>} : vector<112x256xbf16>, vector<256x128xbf16>, vector<112x128xf32> -> vector<112x128xf32>
    %c0_3 = arith.constant 0 : index
    %c0_4 = arith.constant 0 : index
    %3 = vector.load %arg3[%c0_3, %c0_4] : memref<1x128xf32, #tpu.memory_space<vmem>>, vector<1x128xf32>
    %4 = vector.broadcast %3 : vector<1x128xf32> to vector<112x128xf32>
    %5 = arith.addf %2, %4 : vector<112x128xf32>
    %cst_5 = arith.constant 0.000000e+00 : f32
    %6 = vector.broadcast %cst_5 : f32 to vector<112x128xf32>
    %7 = arith.maximumf %5, %6 : vector<112x128xf32>
    %c0_6 = arith.constant 0 : index
    %c0_7 = arith.constant 0 : index
    %8 = vector.load %arg4[%c0_6, %c0_7] : memref<112x1xf32, #tpu.memory_space<vmem>>, vector<112x1xf32>
    %cst_8 = arith.constant 5.000000e-01 : f32
    %9 = vector.broadcast %cst_8 : f32 to vector<112x1xf32>
    %10 = arith.cmpf ogt, %8, %9 : vector<112x1xf32>
    %cst_9 = arith.constant 0.000000e+00 : f32
    %11 = vector.shape_cast %10 : vector<112x1xi1> to vector<112x1xi1>
    %12 = vector.broadcast %11 : vector<112x1xi1> to vector<112x128xi1>
    %13 = vector.broadcast %cst_9 : f32 to vector<112x128xf32>
    %14 = arith.select %12, %7, %13 : vector<112x128xi1>, vector<112x128xf32>
    %15 = arith.truncf %14 : vector<112x128xf32> to vector<112x128xbf16>
    %c0_10 = arith.constant 0 : index
    %c0_11 = arith.constant 0 : index
    %16 = vector.load %arg5[%c0_10, %c0_11] : memref<112x128xbf16, #tpu.memory_space<vmem>>, vector<112x128xbf16>
    tpu.vector_store %arg5[%c0_10, %c0_11], %15 {strides = array<i32>} : memref<112x128xbf16, #tpu.memory_space<vmem>>, vector<112x128xbf16>,
    return
  }
  func.func @transform_0(%arg0: i32) -> (i32, i32) {
    %c0_i32 = arith.constant 0 : i32
    %c0_i32_0 = arith.constant 0 : i32
    return %arg0, %c0_i32 : i32, i32
  }
  func.func @transform_1(%arg0: i32) -> (i32, i32) {
    %c0_i32 = arith.constant 0 : i32
    %c0_i32_0 = arith.constant 0 : i32
    %c0_i32_1 = arith.constant 0 : i32
    return %c0_i32, %c0_i32_0 : i32, i32
  }
  func.func @transform_2(%arg0: i32) -> (i32, i32) {
    %c0_i32 = arith.constant 0 : i32
    %c0_i32_0 = arith.constant 0 : i32
    %c0_i32_1 = arith.constant 0 : i32
    return %c0_i32, %c0_i32_0 : i32, i32
  }
  func.func @transform_3(%arg0: i32) -> (i32, i32) {
    %c0_i32 = arith.constant 0 : i32
    %c0_i32_0 = arith.constant 0 : i32
    return %arg0, %c0_i32 : i32, i32
  }
  func.func @transform_4(%arg0: i32) -> (i32, i32) {
    %c0_i32 = arith.constant 0 : i32
    %c0_i32_0 = arith.constant 0 : i32
    return %arg0, %c0_i32 : i32, i32
  }
}

module attributes {stable_mosaic.version = 11 : i64} {
  func.func @_conv_kernel(%arg0: i32, %arg1: memref<32x576xbf16, #tpu.memory_space<vmem>>, %arg2: memref<576x128xbf16, #tpu.memory_space<vmem>>, %arg3: memref<1x128xf32, #tpu.memory_space<vmem>>, %arg4: memref<32x1xf32, #tpu.memory_space<vmem>>, %arg5: memref<32x128xbf16, #tpu.memory_space<vmem>>) attributes {dimension_semantics = [#tpu.dimension_semantics<parallel>], iteration_bounds = array<i64: 1>, scalar_prefetch = 0 : i64, scratch_operands = 0 : i64, tpu.core_type = #tpu.core_type<tc>, window_params = [{transform_indices = @transform_0, window_bounds = array<i64: 32, 576>}, {pipeline_mode = #tpu.pipeline_mode<synchronous>, transform_indices = @transform_1, window_bounds = array<i64: 576, 128>}, {pipeline_mode = #tpu.pipeline_mode<synchronous>, transform_indices = @transform_2, window_bounds = array<i64: 1, 128>}, {transform_indices = @transform_3, window_bounds = array<i64: 32, 1>}, {transform_indices = @transform_4, window_bounds = array<i64: 32, 128>}]} {
    %c0 = arith.constant 0 : index
    %c0_0 = arith.constant 0 : index
    %0 = vector.load %arg1[%c0, %c0_0] : memref<32x576xbf16, #tpu.memory_space<vmem>>, vector<32x576xbf16>
    %c0_1 = arith.constant 0 : index
    %c0_2 = arith.constant 0 : index
    %1 = vector.load %arg2[%c0_1, %c0_2] : memref<576x128xbf16, #tpu.memory_space<vmem>>, vector<576x128xbf16>
    %cst = arith.constant dense<0.000000e+00> : vector<32x128xf32>
    %2 = tpu.matmul %0, %1, %cst {dimension_numbers = #tpu.dot_dimension_numbers<[1], [0], [0], [1], [0, 0, 1, 1], [], []>} : vector<32x576xbf16>, vector<576x128xbf16>, vector<32x128xf32> -> vector<32x128xf32>
    %c0_3 = arith.constant 0 : index
    %c0_4 = arith.constant 0 : index
    %3 = vector.load %arg3[%c0_3, %c0_4] : memref<1x128xf32, #tpu.memory_space<vmem>>, vector<1x128xf32>
    %4 = vector.broadcast %3 : vector<1x128xf32> to vector<32x128xf32>
    %5 = arith.addf %2, %4 : vector<32x128xf32>
    %cst_5 = arith.constant 0.000000e+00 : f32
    %6 = vector.broadcast %cst_5 : f32 to vector<32x128xf32>
    %7 = arith.maximumf %5, %6 : vector<32x128xf32>
    %c0_6 = arith.constant 0 : index
    %c0_7 = arith.constant 0 : index
    %8 = vector.load %arg4[%c0_6, %c0_7] : memref<32x1xf32, #tpu.memory_space<vmem>>, vector<32x1xf32>
    %cst_8 = arith.constant 5.000000e-01 : f32
    %9 = vector.broadcast %cst_8 : f32 to vector<32x1xf32>
    %10 = arith.cmpf ogt, %8, %9 : vector<32x1xf32>
    %cst_9 = arith.constant 0.000000e+00 : f32
    %11 = vector.shape_cast %10 : vector<32x1xi1> to vector<32x1xi1>
    %12 = vector.broadcast %11 : vector<32x1xi1> to vector<32x128xi1>
    %13 = vector.broadcast %cst_9 : f32 to vector<32x128xf32>
    %14 = arith.select %12, %7, %13 : vector<32x128xi1>, vector<32x128xf32>
    %15 = arith.truncf %14 : vector<32x128xf32> to vector<32x128xbf16>
    %c0_10 = arith.constant 0 : index
    %c0_11 = arith.constant 0 : index
    %16 = vector.load %arg5[%c0_10, %c0_11] : memref<32x128xbf16, #tpu.memory_space<vmem>>, vector<32x128xbf16>
    tpu.vector_store %arg5[%c0_10, %c0_11], %15 {strides = array<i32>} : memref<32x128xbf16, #tpu.memory_space<vmem>>, vector<32x128xbf16>,
    return
  }
  func.func @transform_0(%arg0: i32) -> (i32, i32) {
    %c0_i32 = arith.constant 0 : i32
    %c0_i32_0 = arith.constant 0 : i32
    return %arg0, %c0_i32 : i32, i32
  }
  func.func @transform_1(%arg0: i32) -> (i32, i32) {
    %c0_i32 = arith.constant 0 : i32
    %c0_i32_0 = arith.constant 0 : i32
    %c0_i32_1 = arith.constant 0 : i32
    return %c0_i32, %c0_i32_0 : i32, i32
  }
  func.func @transform_2(%arg0: i32) -> (i32, i32) {
    %c0_i32 = arith.constant 0 : i32
    %c0_i32_0 = arith.constant 0 : i32
    %c0_i32_1 = arith.constant 0 : i32
    return %c0_i32, %c0_i32_0 : i32, i32
  }
  func.func @transform_3(%arg0: i32) -> (i32, i32) {
    %c0_i32 = arith.constant 0 : i32
    %c0_i32_0 = arith.constant 0 : i32
    return %arg0, %c0_i32 : i32, i32
  }
  func.func @transform_4(%arg0: i32) -> (i32, i32) {
    %c0_i32 = arith.constant 0 : i32
    %c0_i32_0 = arith.constant 0 : i32
    return %arg0, %c0_i32 : i32, i32
  }
}

module attributes {stable_mosaic.version = 11 : i64} {
  func.func @_conv_kernel(%arg0: i32, %arg1: memref<16x1024xbf16, #tpu.memory_space<vmem>>, %arg2: memref<1024x128xbf16, #tpu.memory_space<vmem>>, %arg3: memref<1x128xf32, #tpu.memory_space<vmem>>, %arg4: memref<16x1xf32, #tpu.memory_space<vmem>>, %arg5: memref<16x128xf32, #tpu.memory_space<vmem>>) attributes {dimension_semantics = [#tpu.dimension_semantics<parallel>], iteration_bounds = array<i64: 1>, scalar_prefetch = 0 : i64, scratch_operands = 0 : i64, tpu.core_type = #tpu.core_type<tc>, window_params = [{transform_indices = @transform_0, window_bounds = array<i64: 16, 1024>}, {pipeline_mode = #tpu.pipeline_mode<synchronous>, transform_indices = @transform_1, window_bounds = array<i64: 1024, 128>}, {pipeline_mode = #tpu.pipeline_mode<synchronous>, transform_indices = @transform_2, window_bounds = array<i64: 1, 128>}, {transform_indices = @transform_3, window_bounds = array<i64: 16, 1>}, {transform_indices = @transform_4, window_bounds = array<i64: 16, 128>}]} {
    %c0 = arith.constant 0 : index
    %c0_0 = arith.constant 0 : index
    %0 = vector.load %arg1[%c0, %c0_0] : memref<16x1024xbf16, #tpu.memory_space<vmem>>, vector<16x1024xbf16>
    %c0_1 = arith.constant 0 : index
    %c0_2 = arith.constant 0 : index
    %1 = vector.load %arg2[%c0_1, %c0_2] : memref<1024x128xbf16, #tpu.memory_space<vmem>>, vector<1024x128xbf16>
    %cst = arith.constant dense<0.000000e+00> : vector<16x128xf32>
    %2 = tpu.matmul %0, %1, %cst {dimension_numbers = #tpu.dot_dimension_numbers<[1], [0], [0], [1], [0, 0, 1, 1], [], []>} : vector<16x1024xbf16>, vector<1024x128xbf16>, vector<16x128xf32> -> vector<16x128xf32>
    %c0_3 = arith.constant 0 : index
    %c0_4 = arith.constant 0 : index
    %3 = vector.load %arg3[%c0_3, %c0_4] : memref<1x128xf32, #tpu.memory_space<vmem>>, vector<1x128xf32>
    %4 = vector.broadcast %3 : vector<1x128xf32> to vector<16x128xf32>
    %5 = arith.addf %2, %4 : vector<16x128xf32>
    %c0_5 = arith.constant 0 : index
    %c0_6 = arith.constant 0 : index
    %6 = vector.load %arg4[%c0_5, %c0_6] : memref<16x1xf32, #tpu.memory_space<vmem>>, vector<16x1xf32>
    %cst_7 = arith.constant 5.000000e-01 : f32
    %7 = vector.broadcast %cst_7 : f32 to vector<16x1xf32>
    %8 = arith.cmpf ogt, %6, %7 : vector<16x1xf32>
    %cst_8 = arith.constant 0.000000e+00 : f32
    %9 = vector.shape_cast %8 : vector<16x1xi1> to vector<16x1xi1>
    %10 = vector.broadcast %9 : vector<16x1xi1> to vector<16x128xi1>
    %11 = vector.broadcast %cst_8 : f32 to vector<16x128xf32>
    %12 = arith.select %10, %5, %11 : vector<16x128xi1>, vector<16x128xf32>
    %13 = tpu.iota {dimensions = array<i32: 1>} : vector<16x128xi32>
    %c10_i32 = arith.constant 10 : i32
    %14 = vector.broadcast %c10_i32 : i32 to vector<16x128xi32>
    %15 = arith.cmpi slt, %13, %14 : vector<16x128xi32>
    %cst_9 = arith.constant 0xFF800000 : f32
    %16 = vector.broadcast %cst_9 : f32 to vector<16x128xf32>
    %17 = arith.select %15, %12, %16 : vector<16x128xi1>, vector<16x128xf32>
    %cst_10 = arith.constant dense<0xFF800000> : vector<16xf32>
    %18 = vector.multi_reduction <maximumf>, %17, %cst_10 [1] : vector<16x128xf32> to vector<16xf32>
    %19 = vector.shape_cast %18 : vector<16xf32> to vector<16x1xf32>
    %20 = vector.broadcast %19 : vector<16x1xf32> to vector<16x128xf32>
    %21 = arith.subf %17, %20 : vector<16x128xf32>
    %22 = math.exp %21 : vector<16x128xf32>
    %cst_11 = arith.constant dense<0.000000e+00> : vector<16xf32>
    %23 = vector.multi_reduction <add>, %22, %cst_11 [1] : vector<16x128xf32> to vector<16xf32>
    %24 = vector.shape_cast %23 : vector<16xf32> to vector<16x1xf32>
    %25 = math.log %24 : vector<16x1xf32>
    %26 = vector.broadcast %25 : vector<16x1xf32> to vector<16x128xf32>
    %27 = arith.subf %21, %26 : vector<16x128xf32>
    %cst_12 = arith.constant 0.000000e+00 : f32
    %28 = vector.broadcast %cst_12 : f32 to vector<16x128xf32>
    %29 = arith.select %15, %27, %28 : vector<16x128xi1>, vector<16x128xf32>
    %c0_13 = arith.constant 0 : index
    %c0_14 = arith.constant 0 : index
    %30 = vector.load %arg5[%c0_13, %c0_14] : memref<16x128xf32, #tpu.memory_space<vmem>>, vector<16x128xf32>
    tpu.vector_store %arg5[%c0_13, %c0_14], %29 {strides = array<i32>} : memref<16x128xf32, #tpu.memory_space<vmem>>, vector<16x128xf32>,
    return
  }
  func.func @transform_0(%arg0: i32) -> (i32, i32) {
    %c0_i32 = arith.constant 0 : i32
    %c0_i32_0 = arith.constant 0 : i32
    return %arg0, %c0_i32 : i32, i32
  }
  func.func @transform_1(%arg0: i32) -> (i32, i32) {
    %c0_i32 = arith.constant 0 : i32
    %c0_i32_0 = arith.constant 0 : i32
    %c0_i32_1 = arith.constant 0 : i32
    return %c0_i32, %c0_i32_0 : i32, i32
  }
  func.func @transform_2(%arg0: i32) -> (i32, i32) {
    %c0_i32 = arith.constant 0 : i32
    %c0_i32_0 = arith.constant 0 : i32
    %c0_i32_1 = arith.constant 0 : i32
    return %c0_i32, %c0_i32_0 : i32, i32
  }
  func.func @transform_3(%arg0: i32) -> (i32, i32) {
    %c0_i32 = arith.constant 0 : i32
    %c0_i32_0 = arith.constant 0 : i32
    return %arg0, %c0_i32 : i32, i32
  }
  func.func @transform_4(%arg0: i32) -> (i32, i32) {
    %c0_i32 = arith.constant 0 : i32
    %c0_i32_0 = arith.constant 0 : i32
    return %arg0, %c0_i32 : i32, i32
  }
}

</mosaic_0001>

<bundles_post_ra>
// kernel: net_ptq_forward.6
= control target key start
LH: loop header
LB: loop body
LE: loop exit
PB: predicated region body
PF: predicated region fallthrough
CT: control target
= control target key end

     0   :  { %s2390_s15 = smov 0   ;;  %s3002_s0 = inlined_call_operand.vmem [shape: bf16[2048,16], index: 0, kind: input, shape index: {}]   ;;  %s3003_s1 = inlined_call_operand.vmem [shape: bf16[16,128], index: 1, kind: input, shape index: {}]   ;;  %s3004_s2 = inlined_call_operand.vmem [shape: f32[1,128], index: 2, kind: input, shape index: {}]   ;;  %s3005_s3 = inlined_call_operand.vmem [shape: f32[2048,1], index: 3, kind: input, shape index: {}]   ;;  %s3006_s4 = inlined_call_operand.vmem [shape: bf16[2048,128], index: 4, kind: output, shape index: {}]  }
   0x1 LB: > { %s1813_s16 = sadd.s32 4294967295, %s2362_s15   ;;  %p1817_p0 = scmp.ge.s32.totalorder %s2362_s15, 1  ;;  %s2362_s15 = sphi %s2390_s15, %s14_s15  }
   0x2   : > { %p174_p1 = scmp.lt.s32.totalorder %s2362_s15, 5 }
   0x4   : > { %p175_p2 = pnand %p1817_p0, %p174_p1 }
   0x5   : > { %v2323_v0 = vld [vmem:[%s3003_s1] sm:$0xff] (!%p175_p2)   ;;  %v2364_v1 = vmov (!%p175_p2), 0   ;;  %s1818_s19 = sshll.u32 (!%p175_p2), %s1813_s16, 6  ;;  %vm463_vm0 = vcmask (!%p175_p2), 130048  }
   0x6   : > { %178 = sbr.rel (%p175_p2) target bundleno = 305 (0x131), region = 36  ;;  %2322 = vset.pattern.permute.xlu1 (!%p175_p2), %v2364_v1  ;;  %2321 = vset.pattern.permute.xlu0 (!%p175_p2), %v2364_v1  ;;  %p206_p3 = scmp.lt.s32.totalorder (!%p175_p2), %s1818_s19, 255 }
   0x7   : > { %2244 = vmatprep.subr.bf16.mxu0 (!%p175_p2), %v2323_v0  ;;  %2310 = vmatprep.subr.bf16.mxu1 (!%p175_p2), %v2323_v0 }
   0x8   : > { %2245 = vmatpush3.bf16.msra.mxu0 (!%p175_p2), %v2323_v0  ;;  %2311 = vmatpush3.bf16.msra.mxu1 (!%p175_p2), %v2323_v0 }
   0xd   : > { %s3008_s19 = smov (!%p206_p3, %s1818_s19), 255 }
   0xe   : > { %s1821_s20 = sshll.u32 %s3008_s19, 3  ;;  %s1819_s21 = sshll.u32 %s3008_s19, 2 }
   0xf   : > { %s2410_s24 = scalar_lea.vmem %s3005_s3, %s1821_s20  ;;  %s2417_s27 = scalar_lea.vmem %s3002_s0, %s1819_s21 }
  0x10   : > { %v915_v2 = vld [vmem:[%s2410_s24 + $0x10] sm:$0xff]  ;;  %v913_v3 = vld [vmem:[%s2410_s24] sm:$0xff]  ;;  %v2326_v8 = vld [vmem:[%s2417_s27 + $0x8] sm:$0xff]   ;;  %s2727_s6 = scalar_lea.vmem %s3006_s4, %s1819_s21 }
  0x11   : > { %vm979_vm1 = vcmp.gt.f32.partialorder %v915_v2, 0.5  ;;  %vm977_vm2 = vcmp.gt.f32.partialorder %v913_v3, 0.5  ;;  %v2324_v4 = vld [vmem:[%s2417_s27] sm:$0xff]   ;;  %v2327_v9 = vld [vmem:[%s2417_s27 + $0x88] sm:$0xff]   ;;  %v916_v10 = vld [vmem:[%s2410_s24 + $0x18] sm:$0xff] }
  0x12   : > { %v2325_v5 = vld [vmem:[%s2417_s27 + $0x80] sm:$0xff]   ;;  %v1043_v6 = vsel %vm979_vm1, 1, %v2364_v1  ;;  %v1041_v7 = vsel %vm977_vm2, 1, %v2364_v1  ;;  %2246 = vmatprep.mubr.msk.bf16.mxu0 %vm463_vm0, %v2324_v4  ;;  %v914_v11 = vld [vmem:[%s2410_s24 + $0x8] sm:$0xff]  ;;  %vm980_vm3 = vcmp.gt.f32.partialorder %v916_v10, 0.5  ;;  %v2328_v17 = vld [vmem:[%s2417_s27 + $0x10] sm:$0xff]  }
  0x13   : > { %1112 = vperm.xlu1 %2322, %v1043_v6   ;;  %1106 = vperm.xlu0 %2321, %v1041_v7   ;;  %v918_v12 = vld [vmem:[%s2410_s24 + $0x28] sm:$0xff]  ;;  %vm978_vm4 = vcmp.gt.f32.partialorder %v914_v11, 0.5  ;;  %v917_v13 = vld [vmem:[%s2410_s24 + $0x20] sm:$0xff]  ;;  %v1044_v14 = vsel %vm980_vm3, 1, %v2364_v1  ;;  %v2329_v19 = vld [vmem:[%s2417_s27 + $0x90] sm:$0xff]  }
  0x14   : > { %2278 = vmatprep.mubr.msk.bf16.mxu1 %vm463_vm0, %v2325_v5  ;;  %2247 = vmatmul.mubr.msk.bf16.vlgmr.msra.gmra.mrb[0].mxu0 %vm463_vm0, %v2326_v8  ;;  %vm982_vm5 = vcmp.gt.f32.partialorder %v918_v12, 0.5  ;;  %v1042_v15 = vsel %vm978_vm4, 1, %v2364_v1  ;;  %vm981_vm6 = vcmp.gt.f32.partialorder %v917_v13, 0.5  ;;  %v2330_v20 = vld [vmem:[%s2417_s27 + $0x18] sm:$0xff]   ;;  %v919_v23 = vld [vmem:[%s2410_s24 + $0x30] sm:$0xff]  ;;  %v922_v24 = vld [vmem:[%s2410_s24 + $0x48] sm:$0xff] }
  0x15   : > { %2279 = vmatmul.mubr.msk.bf16.vlgmr.msra.gmra.mrb[0].mxu1 %vm463_vm0, %v2327_v9  ;;  %v1046_v16 = vsel %vm982_vm5, 1, %v2364_v1  ;;  %v1045_v18 = vsel %vm981_vm6, 1, %v2364_v1  ;;  %2250 = vmatprep.mubr.msk.bf16.mxu0 %vm463_vm0, %v2328_v17  ;;  %v2331_v21 = vld [vmem:[%s2417_s27 + $0x98] sm:$0xff]   ;;  %vm983_vm8 = vcmp.gt.f32.partialorder %v919_v23, 0.5  ;;  %v921_v25 = vld [vmem:[%s2410_s24 + $0x40] sm:$0xff]  ;;  %vm986_vm9 = vcmp.gt.f32.partialorder %v922_v24, 0.5 }
  0x16   : > { %2282 = vmatprep.mubr.msk.bf16.mxu1 %vm463_vm0, %v2329_v19  ;;  %v920_v22 = vld [vmem:[%s2410_s24 + $0x38] sm:$0xff]  ;;  %v1047_v27 = vsel %vm983_vm8, 1, %v2364_v1  ;;  %vm985_vm10 = vcmp.gt.f32.partialorder %v921_v25, 0.5  ;;  %v2332_v28 = vld [vmem:[%s2417_s27 + $0x20] sm:$0xff]   ;;  %v1050_v30 = vsel %vm986_vm9, 1, %v2364_v1  ;;  %v2334_v32 = vld [vmem:[%s2417_s27 + $0x28] sm:$0xff]  }
  0x17   : > { %1115 = vperm.xlu1 %2322, %v1044_v14   ;;  %1109 = vperm.xlu0 %2321, %v1042_v15   ;;  %vm984_vm7 = vcmp.gt.f32.partialorder %v920_v22, 0.5  ;;  %v2333_v29 = vld [vmem:[%s2417_s27 + $0xa0] sm:$0xff]   ;;  %v1049_v31 = vsel %vm985_vm10, 1, %v2364_v1  ;;  %v924_v33 = vld [vmem:[%s2410_s24 + $0x58] sm:$0xff]  ;;  %v923_v34 = vld [vmem:[%s2410_s24 + $0x50] sm:$0xff] }
  0x18   : > { %v1048_v26 = vsel %vm984_vm7, 1, %v2364_v1  ;;  %v2335_v35 = vld [vmem:[%s2417_s27 + $0xa8] sm:$0xff]   ;;  %vm988_vm11 = vcmp.gt.f32.partialorder %v924_v33, 0.5  ;;  %vm987_vm12 = vcmp.gt.f32.partialorder %v923_v34, 0.5  ;;  %v925_v37 = vld [vmem:[%s2410_s24 + $0x60] sm:$0xff]  ;;  %v2336_v40 = vld [vmem:[%s2417_s27 + $0x30] sm:$0xff]  }
  0x19   : > { %v926_v36 = vld [vmem:[%s2410_s24 + $0x68] sm:$0xff]  ;;  %v1052_v38 = vsel %vm988_vm11, 1, %v2364_v1  ;;  %v1051_v39 = vsel %vm987_vm12, 1, %v2364_v1  ;;  %v2337_v41 = vld [vmem:[%s2417_s27 + $0xb0] sm:$0xff]   ;;  %vm989_vm14 = vcmp.gt.f32.partialorder %v925_v37, 0.5  ;;  %v928_v42 = vld [vmem:[%s2410_s24 + $0x78] sm:$0xff] }
  0x1a   : > { %vm990_vm13 = vcmp.gt.f32.partialorder %v926_v36, 0.5  ;;  %v927_v43 = vld [vmem:[%s2410_s24 + $0x70] sm:$0xff]  ;;  %v2338_v44 = vld [vmem:[%s2417_s27 + $0x38] sm:$0xff]   ;;  %v1053_v47 = vsel %vm989_vm14, 1, %v2364_v1  ;;  %v930_v48 = vld [vmem:[%s2410_s24 + $0x88] sm:$0xff]  ;;  %vm992_vm15 = vcmp.gt.f32.partialorder %v928_v42, 0.5 }
  0x1b   : > { %1121 = vperm.xlu1 %2322, %v1046_v16   ;;  %1118 = vperm.xlu0 %2321, %v1045_v18   ;;  %v2339_v45 = vld [vmem:[%s2417_s27 + $0xb8] sm:$0xff]   ;;  %v1054_v46 = vsel %vm990_vm13, 1, %v2364_v1  ;;  %v929_v49 = vld [vmem:[%s2410_s24 + $0x80] sm:$0xff]  ;;  %vm991_vm1 = vcmp.gt.f32.partialorder %v927_v43, 0.5  ;;  %vm994_vm2 = vcmp.gt.f32.partialorder %v930_v48, 0.5  ;;  %v1056_v52 = vsel %vm992_vm15, 1, %v2364_v1 }
  0x1c   : > { %2251 = vmatmul.mubr.msk.bf16.gmra.mrb[4].mxu0 %vm463_vm0, %v2330_v20  ;;  %v2340_v50 = vld [vmem:[%s2417_s27 + $0x40] sm:$0xff]   ;;  %v1055_v53 = vsel %vm991_vm1, 1, %v2364_v1  ;;  %vm993_vm3 = vcmp.gt.f32.partialorder %v929_v49, 0.5  ;;  %v932_v54 = vld [vmem:[%s2410_s24 + $0x98] sm:$0xff]  ;;  %v1058_v55 = vsel %vm994_vm2, 1, %v2364_v1  ;;  %v931_v56 = vld [vmem:[%s2410_s24 + $0x90] sm:$0xff] }
  0x1d   : > { %2283 = vmatmul.mubr.msk.bf16.gmra.mrb[4].mxu1 %vm463_vm0, %v2331_v21  ;;  %2254 = vmatprep.mubr.msk.bf16.mxu0 %vm463_vm0, %v2332_v28  ;;  %v2341_v51 = vld [vmem:[%s2417_s27 + $0xc0] sm:$0xff]   ;;  %v1057_v57 = vsel %vm993_vm3, 1, %v2364_v1  ;;  %v2342_v58 = vld [vmem:[%s2417_s27 + $0x48] sm:$0xff]   ;;  %vm996_vm4 = vcmp.gt.f32.partialorder %v932_v54, 0.5  ;;  %vm995_vm5 = vcmp.gt.f32.partialorder %v931_v56, 0.5  ;;  %v2344_v60 = vld [vmem:[%s2417_s27 + $0x50] sm:$0xff]  }
  0x1e   : > { %2286 = vmatprep.mubr.msk.bf16.mxu1 %vm463_vm0, %v2333_v29  ;;  %v2343_v59 = vld [vmem:[%s2417_s27 + $0xc8] sm:$0xff]   ;;  %v933_v62 = vld [vmem:[%s2410_s24 + $0xa0] sm:$0xff]  ;;  %v2345_v63 = vld [vmem:[%s2417_s27 + $0xd0] sm:$0xff]   ;;  %v1060_v0 = vsel %vm996_vm4, 1, %v2364_v1  ;;  %v1059_v2 = vsel %vm995_vm5, 1, %v2364_v1 }
  0x1f   : > { %1127 = vperm.xlu1 %2322, %v1048_v26   ;;  %1124 = vperm.xlu0 %2321, %v1047_v27   ;;  %v934_v61 = vld [vmem:[%s2410_s24 + $0xa8] sm:$0xff]  ;;  %vm997_vm7 = vcmp.gt.f32.partialorder %v933_v62, 0.5  ;;  %v936_v3 = vld [vmem:[%s2410_s24 + $0xb8] sm:$0xff]  ;;  %v935_v4 = vld [vmem:[%s2410_s24 + $0xb0] sm:$0xff] }
  0x20   : > { %vm998_vm6 = vcmp.gt.f32.partialorder %v934_v61, 0.5  ;;  %v1061_v6 = vsel %vm997_vm7, 1, %v2364_v1  ;;  %v2346_v7 = vld [vmem:[%s2417_s27 + $0x58] sm:$0xff]   ;;  %vm1000_vm8 = vcmp.gt.f32.partialorder %v936_v3, 0.5  ;;  %vm999_vm9 = vcmp.gt.f32.partialorder %v935_v4, 0.5  ;;  %v938_v9 = vld [vmem:[%s2410_s24 + $0xc8] sm:$0xff] }
  0x21   : > { %v1062_v5 = vsel %vm998_vm6, 1, %v2364_v1  ;;  %v2347_v8 = vld [vmem:[%s2417_s27 + $0xd8] sm:$0xff]   ;;  %v2348_v10 = vld [vmem:[%s2417_s27 + $0x60] sm:$0xff]   ;;  %v1064_v13 = vsel %vm1000_vm8, 1, %v2364_v1  ;;  %v1063_v14 = vsel %vm999_vm9, 1, %v2364_v1  ;;  %vm1002_vm10 = vcmp.gt.f32.partialorder %v938_v9, 0.5 }
  0x22   : > { %v937_v11 = vld [vmem:[%s2410_s24 + $0xc0] sm:$0xff]  ;;  %v940_v15 = vld [vmem:[%s2410_s24 + $0xd8] sm:$0xff]  ;;  %v939_v16 = vld [vmem:[%s2410_s24 + $0xd0] sm:$0xff]  ;;  %v1066_v17 = vsel %vm1002_vm10, 1, %v2364_v1 }
  0x23   : > { %1133 = vperm.xlu1 %2322, %v1050_v30   ;;  %1130 = vperm.xlu0 %2321, %v1049_v31   ;;  %v2349_v12 = vld [vmem:[%s2417_s27 + $0xe0] sm:$0xff]   ;;  %vm1001_vm11 = vcmp.gt.f32.partialorder %v937_v11, 0.5  ;;  %v2350_v19 = vld [vmem:[%s2417_s27 + $0x68] sm:$0xff]   ;;  %vm1004_vm12 = vcmp.gt.f32.partialorder %v940_v15, 0.5  ;;  %vm1003_vm13 = vcmp.gt.f32.partialorder %v939_v16, 0.5  ;;  %v2352_v21 = vld [vmem:[%s2417_s27 + $0x70] sm:$0xff]  }
  0x24   : > { %2255 = vmatmul.mubr.msk.bf16.gmra.mrb[8].mxu0 %vm463_vm0, %v2334_v32  ;;  %v1065_v18 = vsel %vm1001_vm11, 1, %v2364_v1  ;;  %v2351_v20 = vld [vmem:[%s2417_s27 + $0xe8] sm:$0xff]   ;;  %v941_v23 = vld [vmem:[%s2410_s24 + $0xe0] sm:$0xff]  ;;  %v2353_v24 = vld [vmem:[%s2417_s27 + $0xf0] sm:$0xff]   ;;  %v1068_v25 = vsel %vm1004_vm12, 1, %v2364_v1  ;;  %v1067_v26 = vsel %vm1003_vm13, 1, %v2364_v1 }
  0x25   : > { %2287 = vmatmul.mubr.msk.bf16.gmra.mrb[8].mxu1 %vm463_vm0, %v2335_v35  ;;  %2258 = vmatprep.mubr.msk.bf16.mxu0 %vm463_vm0, %v2336_v40  ;;  %v942_v22 = vld [vmem:[%s2410_s24 + $0xe8] sm:$0xff]  ;;  %vm1005_vm15 = vcmp.gt.f32.partialorder %v941_v23, 0.5  ;;  %v944_v27 = vld [vmem:[%s2410_s24 + $0xf8] sm:$0xff]  ;;  %v943_v28 = vld [vmem:[%s2410_s24 + $0xf0] sm:$0xff] }
  0x26   : > { %2290 = vmatprep.mubr.msk.bf16.mxu1 %vm463_vm0, %v2337_v41  ;;  %vm1006_vm14 = vcmp.gt.f32.partialorder %v942_v22, 0.5  ;;  %v1069_v30 = vsel %vm1005_vm15, 1, %v2364_v1  ;;  %v2354_v31 = vld [vmem:[%s2417_s27 + $0x78] sm:$0xff]   ;;  %vm1008_vm1 = vcmp.gt.f32.partialorder %v944_v27, 0.5  ;;  %vm1007_vm2 = vcmp.gt.f32.partialorder %v943_v28, 0.5  ;;  %v946_v33 = vld [vmem:[%s2410_s24 + $0x108] sm:$0xff] }
  0x27   : > { %1139 = vperm.xlu1 %2322, %v1052_v38   ;;  %1136 = vperm.xlu0 %2321, %v1051_v39   ;;  %v1070_v29 = vsel %vm1006_vm14, 1, %v2364_v1  ;;  %v2355_v32 = vld [vmem:[%s2417_s27 + $0xf8] sm:$0xff]   ;;  %v945_v34 = vld [vmem:[%s2410_s24 + $0x100] sm:$0xff]  ;;  %v1072_v35 = vsel %vm1008_vm1, 1, %v2364_v1  ;;  %v1071_v36 = vsel %vm1007_vm2, 1, %v2364_v1  ;;  %vm1010_vm3 = vcmp.gt.f32.partialorder %v946_v33, 0.5 }
  0x28   : > { %vm1009_vm4 = vcmp.gt.f32.partialorder %v945_v34, 0.5  ;;  %v948_v37 = vld [vmem:[%s2410_s24 + $0x118] sm:$0xff]  ;;  %v947_v38 = vld [vmem:[%s2410_s24 + $0x110] sm:$0xff]  ;;  %v1074_v39 = vsel %vm1010_vm3, 1, %v2364_v1  ;;  %v950_v41 = vld [vmem:[%s2410_s24 + $0x128] sm:$0xff] }
  0x29   : > { %v1073_v40 = vsel %vm1009_vm4, 1, %v2364_v1  ;;  %vm1012_vm5 = vcmp.gt.f32.partialorder %v948_v37, 0.5  ;;  %vm1011_vm6 = vcmp.gt.f32.partialorder %v947_v38, 0.5  ;;  %v949_v42 = vld [vmem:[%s2410_s24 + $0x120] sm:$0xff]  ;;  %v954_v49 = vld [vmem:[%s2410_s24 + $0x148] sm:$0xff]  ;;  %v955_v54 = vld [vmem:[%s2410_s24 + $0x150] sm:$0xff] }
  0x2a   : > { %v1076_v43 = vsel %vm1012_vm5, 1, %v2364_v1  ;;  %vm1013_vm7 = vcmp.gt.f32.partialorder %v949_v42, 0.5  ;;  %vm1018_vm10 = vcmp.gt.f32.partialorder %v954_v49, 0.5  ;;  %vm1019_vm13 = vcmp.gt.f32.partialorder %v955_v54, 0.5  ;;  %v960_v61 = vld [vmem:[%s2410_s24 + $0x178] sm:$0xff]  ;;  %v959_v62 = vld [vmem:[%s2410_s24 + $0x170] sm:$0xff] }
  0x2b   : > { %1145 = vperm.xlu1 %2322, %v1054_v46   ;;  %1142 = vperm.xlu0 %2321, %v1053_v47   ;;  %v951_v46 = vld [vmem:[%s2410_s24 + $0x130] sm:$0xff]  ;;  %v1077_v48 = vsel %vm1013_vm7, 1, %v2364_v1  ;;  %vm1024_vm1 = vcmp.gt.f32.partialorder %v960_v61, 0.5  ;;  %vm1023_vm2 = vcmp.gt.f32.partialorder %v959_v62, 0.5  ;;  %v961_v3 = vld [vmem:[%s2410_s24 + $0x180] sm:$0xff]  ;;  %v972_v22 = vld [vmem:[%s2410_s24 + $0x1d8] sm:$0xff] }
  0x2c   : > { %2259 = vmatmul.mubr.msk.bf16.gmra.mrb[12].mxu0 %vm463_vm0, %v2338_v44  ;;  %v1075_v44 = vsel %vm1011_vm6, 1, %v2364_v1  ;;  %vm1015_vm9 = vcmp.gt.f32.partialorder %v951_v46, 0.5  ;;  %v1088_v4 = vsel %vm1024_vm1, 1, %v2364_v1  ;;  %vm1025_vm4 = vcmp.gt.f32.partialorder %v961_v3, 0.5  ;;  %v965_v11 = vld [vmem:[%s2410_s24 + $0x1a0] sm:$0xff]  ;;  %v967_v15 = vld [vmem:[%s2410_s24 + $0x1b0] sm:$0xff] }
  0x2d   : > { %2291 = vmatmul.mubr.msk.bf16.gmra.mrb[12].mxu1 %vm463_vm0, %v2339_v45  ;;  %2262 = vmatprep.mubr.msk.bf16.mxu0 %vm463_vm0, %v2340_v50  ;;  %v952_v45 = vld [vmem:[%s2410_s24 + $0x138] sm:$0xff]  ;;  %v953_v50 = vld [vmem:[%s2410_s24 + $0x140] sm:$0xff]  ;;  %v1089_v9 = vsel %vm1025_vm4, 1, %v2364_v1  ;;  %vm1029_vm7 = vcmp.gt.f32.partialorder %v965_v11, 0.5  ;;  %v971_v23 = vld [vmem:[%s2410_s24 + $0x1d0] sm:$0xff] }
  0x2e   : > { %2294 = vmatprep.mubr.msk.bf16.mxu1 %vm463_vm0, %v2341_v51  ;;  %vm1016_vm8 = vcmp.gt.f32.partialorder %v952_v45, 0.5  ;;  %vm1017_vm11 = vcmp.gt.f32.partialorder %v953_v50, 0.5  ;;  %v973_v27 = vld [vmem:[%s2410_s24 + $0x1e0] sm:$0xff] }
  0x2f   : > { %1151 = vperm.xlu1 %2322, %v1056_v52   ;;  %1148 = vperm.xlu0 %2321, %v1055_v53   ;;  %v1080_v51 = vsel %vm1016_vm8, 1, %v2364_v1  ;;  %v1079_v52 = vsel %vm1015_vm9, 1, %v2364_v1  ;;  %v956_v53 = vld [vmem:[%s2410_s24 + $0x158] sm:$0xff]  ;;  %v1081_v56 = vsel %vm1017_vm11, 1, %v2364_v1  ;;  %vm1031_vm9 = vcmp.gt.f32.partialorder %v967_v15, 0.5 }
  0x30   : > { %vm1020_vm12 = vcmp.gt.f32.partialorder %v956_v53, 0.5 }
  0x33   : > { %1157 = vperm.xlu1 %2322, %v1058_v55   ;;  %1154 = vperm.xlu0 %2321, %v1057_v57   ;;  %v1082_v55 = vsel %vm1018_vm10, 1, %v2364_v1  ;;  %v958_v57 = vld [vmem:[%s2410_s24 + $0x168] sm:$0xff] }
  0x34   : > { %2263 = vmatmul.mubr.msk.bf16.gmra.mrb[16].mxu0 %vm463_vm0, %v2342_v58  ;;  %v957_v58 = vld [vmem:[%s2410_s24 + $0x160] sm:$0xff]  ;;  %vm1022_vm14 = vcmp.gt.f32.partialorder %v958_v57, 0.5 }
  0x35   : > { %2295 = vmatmul.mubr.msk.bf16.gmra.mrb[16].mxu1 %vm463_vm0, %v2343_v59  ;;  %2266 = vmatprep.mubr.msk.bf16.mxu0 %vm463_vm0, %v2344_v60  ;;  %v1084_v59 = vsel %vm1020_vm12, 1, %v2364_v1  ;;  %v1083_v60 = vsel %vm1019_vm13, 1, %v2364_v1  ;;  %vm1021_vm15 = vcmp.gt.f32.partialorder %v957_v58, 0.5  ;;  %vm1036_vm12 = vcmp.gt.f32.partialorder %v972_v22, 0.5 }
  0x36   : > { %2298 = vmatprep.mubr.msk.bf16.mxu1 %vm463_vm0, %v2345_v63  ;;  %v1086_v63 = vsel %vm1022_vm14, 1, %v2364_v1  ;;  %vm1035_vm13 = vcmp.gt.f32.partialorder %v971_v23, 0.5  ;;  %v1100_v28 = vsel %vm1036_vm12, 1, %v2364_v1 }
  0x37   : > { %1163 = vperm.xlu1 %2322, %v1060_v0   ;;  %1160 = vperm.xlu0 %2321, %v1059_v2   ;;  %v1085_v0 = vsel %vm1021_vm15, 1, %v2364_v1  ;;  %v962_v2 = vld [vmem:[%s2410_s24 + $0x188] sm:$0xff]  ;;  %vm1037_vm15 = vcmp.gt.f32.partialorder %v973_v27, 0.5 }
  0x38   : > { %vm1026_vm3 = vcmp.gt.f32.partialorder %v962_v2, 0.5  ;;  %v1101_v33 = vsel %vm1037_vm15, 1, %v2364_v1 }
  0x3b   : > { %1169 = vperm.xlu1 %2322, %v1062_v5   ;;  %1166 = vperm.xlu0 %2321, %v1061_v6   ;;  %v1087_v5 = vsel %vm1023_vm2, 1, %v2364_v1  ;;  %v964_v6 = vld [vmem:[%s2410_s24 + $0x198] sm:$0xff] }
  0x3c   : > { %2267 = vmatmul.mubr.msk.bf16.gmra.mrb[20].mxu0 %vm463_vm0, %v2346_v7  ;;  %v963_v7 = vld [vmem:[%s2410_s24 + $0x190] sm:$0xff]  ;;  %vm1028_vm5 = vcmp.gt.f32.partialorder %v964_v6, 0.5 }
  0x3d   : > { %2299 = vmatmul.mubr.msk.bf16.gmra.mrb[20].mxu1 %vm463_vm0, %v2347_v8  ;;  %2270 = vmatprep.mubr.msk.bf16.mxu0 %vm463_vm0, %v2348_v10  ;;  %v1090_v8 = vsel %vm1026_vm3, 1, %v2364_v1  ;;  %vm1027_vm6 = vcmp.gt.f32.partialorder %v963_v7, 0.5  ;;  %v966_v10 = vld [vmem:[%s2410_s24 + $0x1a8] sm:$0xff] }
  0x3e   : > { %2302 = vmatprep.mubr.msk.bf16.mxu1 %vm463_vm0, %v2349_v12  ;;  %v1092_v12 = vsel %vm1028_vm5, 1, %v2364_v1 }
  0x3f   : > { %1175 = vperm.xlu1 %2322, %v1064_v13   ;;  %1172 = vperm.xlu0 %2321, %v1063_v14   ;;  %v1091_v13 = vsel %vm1027_vm6, 1, %v2364_v1  ;;  %v968_v14 = vld [vmem:[%s2410_s24 + $0x1b8] sm:$0xff] }
  0x40   : > { %vm1032_vm8 = vcmp.gt.f32.partialorder %v968_v14, 0.5  ;;  %v2694_v14 = vld [vmem:[%s3004_s2] ss:$0 sm:$0xff] }
  0x43   : > { %1181 = vperm.xlu1 %2322, %v1066_v17   ;;  %1178 = vperm.xlu0 %2321, %v1065_v18   ;;  %v1093_v17 = vsel %vm1029_vm7, 1, %v2364_v1  ;;  %v970_v18 = vld [vmem:[%s2410_s24 + $0x1c8] sm:$0xff] }
  0x44   : > { %2271 = vmatmul.mubr.msk.bf16.gmra.mrb[24].mxu0 %vm463_vm0, %v2350_v19  ;;  %v969_v19 = vld [vmem:[%s2410_s24 + $0x1c0] sm:$0xff]  ;;  %vm1034_vm10 = vcmp.gt.f32.partialorder %v970_v18, 0.5 }
  0x45   : > { %2303 = vmatmul.mubr.msk.bf16.gmra.mrb[24].mxu1 %vm463_vm0, %v2351_v20  ;;  %2274 = vmatprep.mubr.msk.bf16.mxu0 %vm463_vm0, %v2352_v21  ;;  %v1096_v20 = vsel %vm1032_vm8, 1, %v2364_v1  ;;  %v1095_v21 = vsel %vm1031_vm9, 1, %v2364_v1  ;;  %vm1033_vm11 = vcmp.gt.f32.partialorder %v969_v19, 0.5 }
  0x46   : > { %2306 = vmatprep.mubr.msk.bf16.mxu1 %vm463_vm0, %v2353_v24  ;;  %v1098_v24 = vsel %vm1034_vm10, 1, %v2364_v1 }
  0x47   : > { %1187 = vperm.xlu1 %2322, %v1068_v25   ;;  %1184 = vperm.xlu0 %2321, %v1067_v26   ;;  %v1097_v25 = vsel %vm1033_vm11, 1, %v2364_v1  ;;  %v974_v26 = vld [vmem:[%s2410_s24 + $0x1e8] sm:$0xff] }
  0x48   : > { %vm1038_vm14 = vcmp.gt.f32.partialorder %v974_v26, 0.5 }
  0x4b   : > { %1193 = vperm.xlu1 %2322, %v1070_v29   ;;  %1190 = vperm.xlu0 %2321, %v1069_v30   ;;  %v1099_v29 = vsel %vm1035_vm13, 1, %v2364_v1  ;;  %v976_v30 = vld [vmem:[%s2410_s24 + $0x1f8] sm:$0xff] }
  0x4c   : > { %2275 = vmatmul.mubr.msk.bf16.gmra.mrb[28].mxu0 %vm463_vm0, %v2354_v31  ;;  %v975_v31 = vld [vmem:[%s2410_s24 + $0x1f0] sm:$0xff]  ;;  %vm1040_vm1 = vcmp.gt.f32.partialorder %v976_v30, 0.5 }
  0x4d   : > { %2307 = vmatmul.mubr.msk.bf16.gmra.mrb[28].mxu1 %vm463_vm0, %v2355_v32  ;;  %vm1014_vm0 = vcmp.gt.f32.partialorder %v950_v41, 0.5  ;;  %v1102_v32 = vsel %vm1038_vm14, 1, %v2364_v1  ;;  %vm1039_vm2 = vcmp.gt.f32.partialorder %v975_v31, 0.5  ;;  %v1104_v34 = vsel %vm1040_vm1, 1, %v2364_v1 }
  0x4e   : > { %v1078_v47 = vsel %vm1014_vm0, 1, %v2364_v1  ;;  %vm1030_vm0 = vcmp.gt.f32.partialorder %v966_v10, 0.5 }
  0x4f   : > { %1199 = vperm.xlu1 %2322, %v1072_v35   ;;  %1196 = vperm.xlu0 %2321, %v1071_v36   ;;  %v1094_v16 = vsel %vm1030_vm0, 1, %v2364_v1  ;;  %v1103_v35 = vsel %vm1039_vm2, 1, %v2364_v1 }
  0x53   : > { %1205 = vperm.xlu1 %2322, %v1074_v39   ;;  %1202 = vperm.xlu0 %2321, %v1073_v40  }
  0x57   : > { %1211 = vperm.xlu1 %2322, %v1076_v43   ;;  %1208 = vperm.xlu0 %2321, %v1075_v44  }
  0x5b   : > { %1217 = vperm.xlu1 %2322, %v1078_v47   ;;  %1214 = vperm.xlu0 %2321, %v1077_v48  }
  0x5f   : > { %1223 = vperm.xlu1 %2322, %v1080_v51   ;;  %1220 = vperm.xlu0 %2321, %v1079_v52  }
  0x63   : > { %1229 = vperm.xlu1 %2322, %v1082_v55   ;;  %1226 = vperm.xlu0 %2321, %v1081_v56  }
  0x67   : > { %1235 = vperm.xlu1 %2322, %v1084_v59   ;;  %1232 = vperm.xlu0 %2321, %v1083_v60  }
  0x6b   : > { %1241 = vperm.xlu1 %2322, %v1086_v63   ;;  %1238 = vperm.xlu0 %2321, %v1085_v0  }
  0x6f   : > { %1247 = vperm.xlu1 %2322, %v1088_v4   ;;  %1244 = vperm.xlu0 %2321, %v1087_v5  }
  0x73   : > { %1253 = vperm.xlu1 %2322, %v1090_v8   ;;  %1250 = vperm.xlu0 %2321, %v1089_v9  }
  0x77   : > { %1259 = vperm.xlu1 %2322, %v1092_v12   ;;  %1256 = vperm.xlu0 %2321, %v1091_v13  }
  0x7b   : > { %1265 = vperm.xlu1 %2322, %v1094_v16   ;;  %1262 = vperm.xlu0 %2321, %v1093_v17  }
  0x7f   : > { %1271 = vperm.xlu1 %2322, %v1096_v20   ;;  %1268 = vperm.xlu0 %2321, %v1095_v21  }
  0x83   : > { %1277 = vperm.xlu1 %2322, %v1098_v24   ;;  %1274 = vperm.xlu0 %2321, %v1097_v25  }
  0x87   : > { %1283 = vperm.xlu1 %2322, %v1100_v28   ;;  %1280 = vperm.xlu0 %2321, %v1099_v29  }
  0x8b   : > { %1289 = vperm.xlu1 %2322, %v1102_v32   ;;  %1286 = vperm.xlu0 %2321, %v1101_v33  }
  0x8f   : > { %1295 = vperm.xlu1 %2322, %v1104_v34   ;;  %1292 = vperm.xlu0 %2321, %v1103_v35  }
  0x92   : > { %v2611_v36 = vpop.permute.xlu1 %1112  ;;  %v2613_v37 = vpop.permute.xlu0 %1106 }
  0x93   : > { %vm1299_vm3 = vcmp.eq.s32.totalorder %v2611_v36, 1  ;;  %vm1297_vm4 = vcmp.eq.s32.totalorder %v2613_v37, 1 }
  0x96   : > { %v2615_v38 = vpop.permute.xlu1 %1115  ;;  %v2617_v39 = vpop.permute.xlu0 %1109 }
  0x97   : > { %vm1300_vm5 = vcmp.eq.s32.totalorder %v2615_v38, 1  ;;  %vm1298_vm6 = vcmp.eq.s32.totalorder %v2617_v39, 1 }
  0x9a   : > { %v2619_v40 = vpop.permute.xlu1 %1121  ;;  %v2621_v41 = vpop.permute.xlu0 %1118 }
  0x9b   : > { %vm1301_vm0 = vcmp.eq.s32.totalorder %v2621_v41, 1  ;;  %vm1302_vm12 = vcmp.eq.s32.totalorder %v2619_v40, 1 }
  0x9e   : > { %v2623_v42 = vpop.permute.xlu1 %1127  ;;  %v2625_v43 = vpop.permute.xlu0 %1124 }
  0x9f   : > { %vm1303_vm7 = vcmp.eq.s32.totalorder %v2625_v43, 1  ;;  %vm1304_vm13 = vcmp.eq.s32.totalorder %v2623_v42, 1 }
  0xa2   : > { %v2627_v44 = vpop.permute.xlu1 %1133  ;;  %v2629_v1 = vpop.permute.xlu0 %1130 }
  0xa3   : > { %vm1305_vm15 = vcmp.eq.s32.totalorder %v2629_v1, 1 }
  0xa6   : > { %v2631_v45 = vpop.permute.xlu1 %1139  ;;  %v2633_v46 = vpop.permute.xlu0 %1136 }
  0xa7   : > { %vm1307_vm14 = vcmp.eq.s32.totalorder %v2633_v46, 1 }
  0xaa   : > { %v2635_v47 = vpop.permute.xlu1 %1145  ;;  %v2637_v48 = vpop.permute.xlu0 %1142 }
  0xae   : > { %v2639_v49 = vpop.permute.xlu1 %1151  ;;  %v2641_v50 = vpop.permute.xlu0 %1148 }
  0xb2   : > { %v2643_v51 = vpop.permute.xlu1 %1157  ;;  %v2645_v52 = vpop.permute.xlu0 %1154 }
  0xb6   : > { %v2647_v53 = vpop.permute.xlu1 %1163  ;;  %v2649_v54 = vpop.permute.xlu0 %1160 }
  0xba   : > { %v2651_v55 = vpop.permute.xlu1 %1169  ;;  %v2653_v56 = vpop.permute.xlu0 %1166 }
  0xbe   : > { %v2655_v57 = vpop.permute.xlu1 %1175  ;;  %v2657_v58 = vpop.permute.xlu0 %1172 }
  0xc2   : > { %v2659_v59 = vpop.permute.xlu1 %1181  ;;  %v2661_v60 = vpop.permute.xlu0 %1178 }
  0xc6   : > { %v2663_v61 = vpop.permute.xlu1 %1187  ;;  %v2665_v62 = vpop.permute.xlu0 %1184 }
  0xca   : > { %v2667_v63 = vpop.permute.xlu1 %1193  ;;  %v2669_v0 = vpop.permute.xlu0 %1190 }
  0xce   : > { %v2671_v2 = vpop.permute.xlu1 %1199  ;;  %v2673_v3 = vpop.permute.xlu0 %1196 }
  0xd2   : > { %v2675_v4 = vpop.permute.xlu1 %1205  ;;  %v2677_v5 = vpop.permute.xlu0 %1202 }
  0xd3   : > { %vm1330_vm8 = vcmp.eq.s32.totalorder %v2675_v4, 1  ;;  %vm1329_vm11 = vcmp.eq.s32.totalorder %v2677_v5, 1 }
  0xd6   : > { %v1212_v6 = vpop.permute.xlu1 %1211  ;;  %v1209_v7 = vpop.permute.xlu0 %1208 }
  0xd7   : > { %vm1332_vm9 = vcmp.eq.s32.totalorder %v1212_v6, 1  ;;  %vm1331_vm10 = vcmp.eq.s32.totalorder %v1209_v7, 1 }
  0xda   : > { %v2679_v8 = vpop.permute.xlu1 %1217  ;;  %v2681_v9 = vpop.permute.xlu0 %1214 }
  0xdb   : > { %vm1334_vm1 = vcmp.eq.s32.totalorder %v2679_v8, 1 }
  0xde   : > { %v2683_v10 = vpop.permute.xlu1 %1223  ;;  %v2685_v11 = vpop.permute.xlu0 %1220 }
  0xdf   : > { %vm1335_vm2 = vcmp.eq.s32.totalorder %v2685_v11, 1 }
  0xe2   : > { %v2687_v12 = vpop.permute.xlu1 %1229  ;;  %v2689_v13 = vpop.permute.xlu0 %1226 }
  0xe6   : > { %v2696_v15 = vpop.permute.xlu1 %1235  ;;  %v2698_v16 = vpop.permute.xlu0 %1232 }
  0xe7   : > { %v2248_v17 = vpop.f32.mrb[0].mxu0 }
  0xe8   : > { %v603_v18 = vadd.f32 %v2248_v17, %v2694_v14  ;;  %v2280_v19 = vpop.f32.mrb[0].mxu1  ;;  %v594_v20 = vpop.f32.mrb[1].mxu0 }
  0xe9   : > { %v731_v21 = vadd.f32 %v2280_v19, %v2694_v14  ;;  %v595_v22 = vadd.f32 %v2694_v14, %v594_v20  ;;  %v722_v23 = vpop.f32.mrb[1].mxu1  ;;  %v2249_v24 = vpop.f32.mrb[2].mxu0 }
  0xea   : > { %v851_v25 = vmax.f32 %v603_v18, 0.0  ;;  %v723_v26 = vadd.f32 %v2694_v14, %v722_v23  ;;  %v606_v27 = vadd.f32 %v2249_v24, %v2694_v14  ;;  %v2281_v28 = vpop.f32.mrb[2].mxu1  ;;  %v2708_v29 = vpop.permute.xlu1 %1241 }
  0xeb   : > { %v883_v30 = vmax.f32 %v731_v21, 0.0  ;;  %v849_v31 = vmax.f32 %v595_v22, 0.0  ;;  %v734_v32 = vadd.f32 %v2281_v28, %v2694_v14  ;;  %v2712_v33 = vpop.permute.xlu0 %1238  ;;  %v597_v34 = vpop.f32.mrb[3].mxu0 }
  0xec   : > { %v1363_v35 = vsel %vm1299_vm3, %v851_v25, 0.0  ;;  %v852_v17 = vmax.f32 %v606_v27, 0.0  ;;  %v725_v18 = vpop.f32.mrb[3].mxu1  ;;  %v881_v20 = vmax.f32 %v723_v26, 0.0  ;;  %v598_v22 = vadd.f32 %v2694_v14, %v597_v34 }
  0xed   : > { %v1361_v19 = vsel %vm1297_vm4, %v849_v31, 0.0  ;;  %v884_v21 = vmax.f32 %v734_v32, 0.0  ;;  %v726_v23 = vadd.f32 %v2694_v14, %v725_v18  ;;  %v1395_v24 = vsel %vm1331_vm10, %v883_v30, 0.0 }
  0xee   : > { %v1364_v36 = vsel %vm1300_vm5, %v852_v17, 0.0  ;;  %v2732_v37 = vpop.permute.xlu1 %1247  ;;  %v850_v27 = vmax.f32 %v598_v22, 0.0  ;;  %v1393_v17 = vsel %vm1329_vm11, %v881_v20, 0.0  ;;  %vm1308_vm3 = vcmp.eq.s32.totalorder %v2631_v45, 1 }
  0xef   : > { %v2028_v25 = vpack.c.bf16 %v1364_v36, %v1363_v35  ;;  %v1396_v26 = vsel %vm1332_vm9, %v884_v21, 0.0  ;;  %v2734_v6 = vpop.permute.xlu0 %1244  ;;  %v2252_v7 = vpop.f32.mrb[4].mxu0  ;;  %v882_v31 = vmax.f32 %v726_v23, 0.0  ;;  %vm1333_vm4 = vcmp.eq.s32.totalorder %v2681_v9, 1 }
  0xf0   : > { %v2108_v28 = vpack.c.bf16 %v1396_v26, %v1395_v24  ;;  %v619_v38 = vadd.f32 %v2252_v7, %v2694_v14  ;;  %v2284_v32 = vpop.f32.mrb[4].mxu1  ;;  %v610_v34 = vpop.f32.mrb[5].mxu0  ;;  %v1362_v30 = vsel %vm1298_vm6, %v850_v27, 0.0  ;;  %vm1336_vm5 = vcmp.eq.s32.totalorder %v2683_v10, 1 }
  0xf1   : > { %2180 = vst [vmem:[%s2727_s6 + $0x8] sm:$0xff] %v2028_v25   ;;  %v747_v35 = vadd.f32 %v2284_v32, %v2694_v14  ;;  %v611_v18 = vadd.f32 %v2694_v14, %v610_v34  ;;  %v738_v21 = vpop.f32.mrb[5].mxu1  ;;  %v2253_v22 = vpop.f32.mrb[6].mxu0  ;;  %v2023_v5 = vpack.c.bf16 %v1362_v30, %v1361_v19  ;;  %v1394_v36 = vsel %vm1330_vm8, %v882_v31, 0.0 }
  0xf2   : > { %2196 = vst [vmem:[%s2727_s6 + $0x88] sm:$0xff] %v2108_v28   ;;  %v855_v23 = vmax.f32 %v619_v38, 0.0  ;;  %v739_v24 = vadd.f32 %v2694_v14, %v738_v21  ;;  %v2285_v20 = vpop.f32.mrb[6].mxu1  ;;  %v2748_v25 = vpop.permute.xlu1 %1253  ;;  %v2103_v39 = vpack.c.bf16 %v1394_v36, %v1393_v17  ;;  %v622_v7 = vadd.f32 %v2253_v22, %v2694_v14 }
  0xf3   : > { %v887_v26 = vmax.f32 %v747_v35, 0.0  ;;  %v853_v27 = vmax.f32 %v611_v18, 0.0  ;;  %v2751_v32 = vpop.permute.xlu0 %1250  ;;  %v613_v34 = vpop.f32.mrb[7].mxu0  ;;  %2024 = vst [vmem:[%s2727_s6] sm:$0xff] %v2023_v5   ;;  %v750_v19 = vadd.f32 %v2285_v20, %v2694_v14  ;;  %vm1306_vm6 = vcmp.eq.s32.totalorder %v2627_v44, 1 }
  0xf4   : > { %v1367_v4 = vsel %vm1303_vm7, %v855_v23, 0.0  ;;  %v741_v28 = vpop.f32.mrb[7].mxu1  ;;  %2195 = vst [vmem:[%s2727_s6 + $0x80] sm:$0xff] %v2103_v39   ;;  %v885_v38 = vmax.f32 %v739_v24, 0.0  ;;  %v856_v17 = vmax.f32 %v622_v7, 0.0  ;;  %v614_v35 = vadd.f32 %v2694_v14, %v613_v34 }
  0xf5   : > { %v1365_v31 = vsel %vm1301_vm0, %v853_v27, 0.0  ;;  %v888_v30 = vmax.f32 %v750_v19, 0.0  ;;  %v742_v43 = vadd.f32 %v2694_v14, %v741_v28  ;;  %v1399_v21 = vsel %vm1335_vm2, %v887_v26, 0.0 }
  0xf6   : > { %v2767_v18 = vpop.permute.xlu1 %1259  ;;  %v1368_v41 = vsel %vm1304_vm13, %v856_v17, 0.0  ;;  %v854_v23 = vmax.f32 %v614_v35, 0.0  ;;  %v1397_v27 = vsel %vm1333_vm4, %v885_v38, 0.0  ;;  %vm1311_vm0 = vcmp.eq.s32.totalorder %v2641_v50, 1 }
  0xf7   : > { %v2774_v22 = vpop.permute.xlu0 %1256  ;;  %v2256_v11 = vpop.f32.mrb[8].mxu0  ;;  %v2038_v5 = vpack.c.bf16 %v1368_v41, %v1367_v4  ;;  %v1400_v36 = vsel %vm1336_vm5, %v888_v30, 0.0  ;;  %v886_v24 = vmax.f32 %v742_v43, 0.0  ;;  %vm1338_vm7 = vcmp.eq.s32.totalorder %v2687_v12, 1 }
  0xf8   : > { %v2288_v20 = vpop.f32.mrb[8].mxu1  ;;  %v626_v39 = vpop.f32.mrb[9].mxu0  ;;  %v2118_v7 = vpack.c.bf16 %v1400_v36, %v1399_v21  ;;  %v635_v9 = vadd.f32 %v2256_v11, %v2694_v14  ;;  %v1366_v34 = vsel %vm1302_vm12, %v854_v23, 0.0  ;;  %vm1337_vm8 = vcmp.eq.s32.totalorder %v2689_v13, 1 }
  0xf9   : > { %v763_v10 = vadd.f32 %v2288_v20, %v2694_v14  ;;  %v754_v26 = vpop.f32.mrb[9].mxu1  ;;  %v2257_v42 = vpop.f32.mrb[10].mxu0  ;;  %2182 = vst [vmem:[%s2727_s6 + $0x18] sm:$0xff] %v2038_v5   ;;  %v1398_v4 = vsel %vm1334_vm1, %v886_v24, 0.0  ;;  %v627_v19 = vadd.f32 %v2694_v14, %v626_v39  ;;  %v2033_v30 = vpack.c.bf16 %v1366_v34, %v1365_v31 }
  0xfa   : > { %v755_v28 = vadd.f32 %v2694_v14, %v754_v26  ;;  %v2289_v38 = vpop.f32.mrb[10].mxu1  ;;  %v2786_v17 = vpop.permute.xlu1 %1265  ;;  %2198 = vst [vmem:[%s2727_s6 + $0x98] sm:$0xff] %v2118_v7   ;;  %v2113_v35 = vpack.c.bf16 %v1398_v4, %v1397_v27  ;;  %v859_v43 = vmax.f32 %v635_v9, 0.0  ;;  %v638_v8 = vadd.f32 %v2257_v42, %v2694_v14 }
  0xfb   : > { %v891_v21 = vmax.f32 %v763_v10, 0.0  ;;  %v629_v41 = vpop.f32.mrb[11].mxu0  ;;  %v857_v40 = vmax.f32 %v627_v19, 0.0  ;;  %v766_v5 = vadd.f32 %v2289_v38, %v2694_v14  ;;  %v757_v36 = vpop.f32.mrb[11].mxu1  ;;  %2181 = vst [vmem:[%s2727_s6 + $0x10] sm:$0xff] %v2033_v30   ;;  %vm1309_vm9 = vcmp.eq.s32.totalorder %v2637_v48, 1 }
  0xfc   : > { %v889_v11 = vmax.f32 %v755_v28, 0.0  ;;  %2197 = vst [vmem:[%s2727_s6 + $0x90] sm:$0xff] %v2113_v35   ;;  %v1371_v31 = vsel %vm1307_vm14, %v859_v43, 0.0  ;;  %vm1312_vm10 = vcmp.eq.s32.totalorder %v2639_v49, 1  ;;  %vm1339_vm11 = vcmp.eq.s32.totalorder %v2698_v16, 1  ;;  %v2803_v39 = vpop.permute.xlu0 %1262 }
  0xfd   : > { %v1369_v23 = vsel %vm1305_vm15, %v857_v40, 0.0  ;;  %v860_v24 = vmax.f32 %v638_v8, 0.0  ;;  %v892_v20 = vmax.f32 %v766_v5, 0.0  ;;  %vm1340_vm12 = vcmp.eq.s32.totalorder %v2696_v15, 1 }
  0xfe   : > { %v1403_v27 = vsel %vm1339_vm11, %v891_v21, 0.0  ;;  %v630_v7 = vadd.f32 %v2694_v14, %v629_v41  ;;  %v758_v46 = vadd.f32 %v2694_v14, %v757_v36  ;;  %v2808_v9 = vpop.permute.xlu1 %1271  ;;  %v1401_v16 = vsel %vm1337_vm8, %v889_v11, 0.0 }
  0xff   : > { %v2260_v10 = vpop.f32.mrb[12].mxu0  ;;  %v1372_v1 = vsel %vm1308_vm3, %v860_v24, 0.0  ;;  %v1404_v26 = vsel %vm1340_vm12, %v892_v20, 0.0  ;;  %vm1310_vm13 = vcmp.eq.s32.totalorder %v2635_v47, 1  ;;  %vm1315_vm14 = vcmp.eq.s32.totalorder %v2649_v54, 1 }
 0x100   : > { %v651_v42 = vadd.f32 %v2260_v10, %v2694_v14  ;;  %v2292_v15 = vpop.f32.mrb[12].mxu1  ;;  %v642_v34 = vpop.f32.mrb[13].mxu0  ;;  %v2048_v4 = vpack.c.bf16 %v1372_v1, %v1371_v31  ;;  %v2128_v19 = vpack.c.bf16 %v1404_v26, %v1403_v27  ;;  %v858_v28 = vmax.f32 %v630_v7, 0.0 }
 0x101   : > { %v890_v38 = vmax.f32 %v758_v46, 0.0  ;;  %v770_v30 = vpop.f32.mrb[13].mxu1  ;;  %v2261_v35 = vpop.f32.mrb[14].mxu0  ;;  %v779_v43 = vadd.f32 %v2292_v15, %v2694_v14  ;;  %v643_v45 = vadd.f32 %v2694_v14, %v642_v34  ;;  %vm1313_vm15 = vcmp.eq.s32.totalorder %v2645_v52, 1 }
 0x102   : > { %v863_v13 = vmax.f32 %v651_v42, 0.0  ;;  %v771_v21 = vadd.f32 %v2694_v14, %v770_v30  ;;  %v2293_v41 = vpop.f32.mrb[14].mxu1  ;;  %2184 = vst [vmem:[%s2727_s6 + $0x28] sm:$0xff] %v2048_v4   ;;  %2200 = vst [vmem:[%s2727_s6 + $0xa8] sm:$0xff] %v2128_v19   ;;  %v1370_v40 = vsel %vm1306_vm6, %v858_v28, 0.0  ;;  %v654_v8 = vadd.f32 %v2261_v35, %v2694_v14  ;;  %v645_v36 = vpop.f32.mrb[15].mxu0 }
 0x103   : > { %v1402_v11 = vsel %vm1338_vm7, %v890_v38, 0.0  ;;  %v782_v5 = vadd.f32 %v2293_v41, %v2694_v14  ;;  %v2043_v31 = vpack.c.bf16 %v1370_v40, %v1369_v23  ;;  %v895_v27 = vmax.f32 %v779_v43, 0.0  ;;  %v773_v44 = vpop.f32.mrb[15].mxu1  ;;  %v2837_v50 = vpop.permute.xlu0 %1268 }
 0x104   : > { %v2123_v24 = vpack.c.bf16 %v1402_v11, %v1401_v16  ;;  %v1375_v20 = vsel %vm1311_vm0, %v863_v13, 0.0  ;;  %v861_v12 = vmax.f32 %v643_v45, 0.0  ;;  %v893_v7 = vmax.f32 %v771_v21, 0.0  ;;  %v2844_v15 = vpop.permute.xlu1 %1277 }
 0x105   : > { %v864_v46 = vmax.f32 %v654_v8, 0.0  ;;  %v896_v10 = vmax.f32 %v782_v5, 0.0  ;;  %vm1316_vm1 = vcmp.eq.s32.totalorder %v2647_v53, 1  ;;  %vm1341_vm2 = vcmp.eq.s32.totalorder %v2712_v33, 1  ;;  %2183 = vst [vmem:[%s2727_s6 + $0x20] sm:$0xff] %v2043_v31  }
 0x106   : > { %vm1344_vm3 = vcmp.eq.s32.totalorder %v2732_v37, 1  ;;  %vm1343_vm4 = vcmp.eq.s32.totalorder %v2734_v6, 1  ;;  %2199 = vst [vmem:[%s2727_s6 + $0xa0] sm:$0xff] %v2123_v24   ;;  %v646_v23 = vadd.f32 %v2694_v14, %v645_v36  ;;  %v1373_v1 = vsel %vm1309_vm9, %v861_v12, 0.0 }
 0x107   : > { %v1407_v16 = vsel %vm1343_vm4, %v895_v27, 0.0  ;;  %v1376_v26 = vsel %vm1312_vm10, %v864_v46, 0.0  ;;  %v1408_v42 = vsel %vm1344_vm3, %v896_v10, 0.0  ;;  %v2264_v37 = vpop.f32.mrb[16].mxu0  ;;  %v774_v19 = vadd.f32 %v2694_v14, %v773_v44 }
 0x108   : > { %v2058_v6 = vpack.c.bf16 %v1376_v26, %v1375_v20  ;;  %v2138_v34 = vpack.c.bf16 %v1408_v42, %v1407_v16  ;;  %v862_v4 = vmax.f32 %v646_v23, 0.0  ;;  %v2296_v28 = vpop.f32.mrb[16].mxu1  ;;  %v658_v38 = vpop.f32.mrb[17].mxu0  ;;  %vm1342_vm5 = vcmp.eq.s32.totalorder %v2708_v29, 1 }
 0x109   : > { %v1405_v48 = vsel %vm1341_vm2, %v893_v7, 0.0  ;;  %v667_v49 = vadd.f32 %v2264_v37, %v2694_v14  ;;  %v795_v30 = vadd.f32 %v2296_v28, %v2694_v14  ;;  %v786_v35 = vpop.f32.mrb[17].mxu1  ;;  %v2265_v13 = vpop.f32.mrb[18].mxu0  ;;  %vm1314_vm6 = vcmp.eq.s32.totalorder %v2643_v51, 1 }
 0x10a   : > { %vm1346_vm0 = vcmp.eq.s32.totalorder %v2748_v25, 1  ;;  %2186 = vst [vmem:[%s2727_s6 + $0x38] sm:$0xff] %v2058_v6   ;;  %2202 = vst [vmem:[%s2727_s6 + $0xb8] sm:$0xff] %v2138_v34   ;;  %v1374_v43 = vsel %vm1310_vm13, %v862_v4, 0.0  ;;  %v894_v45 = vmax.f32 %v774_v19, 0.0  ;;  %v659_v21 = vadd.f32 %v2694_v14, %v658_v38  ;;  %v2297_v41 = vpop.f32.mrb[18].mxu1  ;;  %v2873_v29 = vpop.permute.xlu0 %1274 }
 0x10b   : > { %v787_v33 = vadd.f32 %v2694_v14, %v786_v35  ;;  %v2053_v40 = vpack.c.bf16 %v1374_v43, %v1373_v1  ;;  %v867_v11 = vmax.f32 %v667_v49, 0.0  ;;  %v899_v8 = vmax.f32 %v795_v30, 0.0  ;;  %v661_v36 = vpop.f32.mrb[19].mxu0  ;;  %v789_v27 = vpop.f32.mrb[19].mxu1 }
 0x10c   : > { %v670_v5 = vadd.f32 %v2265_v13, %v2694_v14  ;;  %vm1319_vm7 = vcmp.eq.s32.totalorder %v2657_v58, 1  ;;  %v1406_v31 = vsel %vm1342_vm5, %v894_v45, 0.0  ;;  %v865_v47 = vmax.f32 %v659_v21, 0.0  ;;  %v2879_v23 = vpop.permute.xlu1 %1283 }
 0x10d   : > { %v897_v24 = vmax.f32 %v787_v33, 0.0  ;;  %v798_v20 = vadd.f32 %v2297_v41, %v2694_v14  ;;  %vm1317_vm8 = vcmp.eq.s32.totalorder %v2653_v56, 1  ;;  %vm1345_vm9 = vcmp.eq.s32.totalorder %v2751_v32, 1  ;;  %2185 = vst [vmem:[%s2727_s6 + $0x30] sm:$0xff] %v2053_v40  }
 0x10e   : > { %v2133_v44 = vpack.c.bf16 %v1406_v31, %v1405_v48  ;;  %v1379_v12 = vsel %vm1315_vm14, %v867_v11, 0.0  ;;  %v868_v7 = vmax.f32 %v670_v5, 0.0  ;;  %vm1320_vm10 = vcmp.eq.s32.totalorder %v2655_v57, 1 }
 0x10f   : > { %vm1348_vm11 = vcmp.eq.s32.totalorder %v2767_v18, 1  ;;  %vm1347_vm12 = vcmp.eq.s32.totalorder %v2774_v22, 1  ;;  %v1377_v46 = vsel %vm1313_vm15, %v865_v47, 0.0  ;;  %v900_v10 = vmax.f32 %v798_v20, 0.0  ;;  %v2268_v26 = vpop.f32.mrb[20].mxu0  ;;  %v2910_v47 = vpop.permute.xlu0 %1280 }
 0x110   : > { %vm1352_vm13 = vcmp.eq.s32.totalorder %v2808_v9, 1  ;;  %2201 = vst [vmem:[%s2727_s6 + $0xb0] sm:$0xff] %v2133_v44   ;;  %v1380_v54 = vsel %vm1316_vm1, %v868_v7, 0.0  ;;  %v662_v16 = vadd.f32 %v2694_v14, %v661_v36  ;;  %v790_v1 = vadd.f32 %v2694_v14, %v789_v27  ;;  %v2300_v6 = vpop.f32.mrb[20].mxu1  ;;  %v674_v34 = vpop.f32.mrb[21].mxu0 }
 0x111   : > { %vm1349_vm14 = vcmp.eq.s32.totalorder %v2803_v39, 1  ;;  %v1411_v22 = vsel %vm1347_vm12, %v899_v8, 0.0  ;;  %v1409_v52 = vsel %vm1345_vm9, %v897_v24, 0.0  ;;  %v2068_v42 = vpack.c.bf16 %v1380_v54, %v1379_v12  ;;  %v802_v38 = vpop.f32.mrb[21].mxu1  ;;  %v2269_v48 = vpop.f32.mrb[22].mxu0 }
 0x112   : > { %v1412_v37 = vsel %vm1348_vm11, %v900_v10, 0.0  ;;  %vm1318_vm15 = vcmp.eq.s32.totalorder %v2651_v55, 1  ;;  %vm1350_vm1 = vcmp.eq.s32.totalorder %v2786_v17, 1  ;;  %v866_v4 = vmax.f32 %v662_v16, 0.0  ;;  %v2301_v35 = vpop.f32.mrb[22].mxu1  ;;  %v677_v13 = vpop.f32.mrb[23].mxu0 }
 0x113   : > { %v2148_v53 = vpack.c.bf16 %v1412_v37, %v1411_v22  ;;  %v898_v19 = vmax.f32 %v790_v1, 0.0  ;;  %v683_v28 = vadd.f32 %v2268_v26, %v2694_v14  ;;  %2188 = vst [vmem:[%s2727_s6 + $0x48] sm:$0xff] %v2068_v42   ;;  %v811_v32 = vadd.f32 %v2300_v6, %v2694_v14  ;;  %v805_v41 = vpop.f32.mrb[23].mxu1  ;;  %v2919_v58 = vpop.permute.xlu1 %1289 }
 0x114   : > { %v675_v18 = vadd.f32 %v2694_v14, %v674_v34  ;;  %v803_v49 = vadd.f32 %v2694_v14, %v802_v38  ;;  %v686_v30 = vadd.f32 %v2269_v48, %v2694_v14  ;;  %v1378_v43 = vsel %vm1314_vm6, %v866_v4, 0.0  ;;  %v2941_v55 = vpop.permute.xlu0 %1286 }
 0x115   : > { %2204 = vst [vmem:[%s2727_s6 + $0xc8] sm:$0xff] %v2148_v53   ;;  %v1410_v45 = vsel %vm1346_vm0, %v898_v19, 0.0  ;;  %v871_v21 = vmax.f32 %v683_v28, 0.0  ;;  %v814_v33 = vadd.f32 %v2301_v35, %v2694_v14  ;;  %v2063_v40 = vpack.c.bf16 %v1378_v43, %v1377_v46 }
 0x116   : > { %v2143_v11 = vpack.c.bf16 %v1410_v45, %v1409_v52  ;;  %v903_v8 = vmax.f32 %v811_v32, 0.0  ;;  %v869_v5 = vmax.f32 %v675_v18, 0.0  ;;  %vm1321_vm2 = vcmp.eq.s32.totalorder %v2661_v60, 1 }
 0x117   : > { %vm1324_vm3 = vcmp.eq.s32.totalorder %v2663_v61, 1  ;;  %vm1323_vm4 = vcmp.eq.s32.totalorder %v2665_v62, 1  ;;  %v1383_v51 = vsel %vm1319_vm7, %v871_v21, 0.0  ;;  %v901_v25 = vmax.f32 %v803_v49, 0.0  ;;  %2187 = vst [vmem:[%s2727_s6 + $0x40] sm:$0xff] %v2063_v40   ;;  %v2272_v7 = vpop.f32.mrb[24].mxu0 }
 0x118   : > { %v872_v36 = vmax.f32 %v686_v30, 0.0  ;;  %v904_v31 = vmax.f32 %v814_v33, 0.0  ;;  %vm1351_vm5 = vcmp.eq.s32.totalorder %v2837_v50, 1  ;;  %2203 = vst [vmem:[%s2727_s6 + $0xc0] sm:$0xff] %v2143_v11   ;;  %v1381_v24 = vsel %vm1317_vm8, %v869_v5, 0.0  ;;  %v2304_v16 = vpop.f32.mrb[24].mxu1 }
 0x119   : > { %v678_v20 = vadd.f32 %v2694_v14, %v677_v13  ;;  %v806_v27 = vadd.f32 %v2694_v14, %v805_v41  ;;  %vm1353_vm6 = vcmp.eq.s32.totalorder %v2873_v29, 1  ;;  %v1415_v44 = vsel %vm1351_vm5, %v903_v8, 0.0  ;;  %v690_v1 = vpop.f32.mrb[25].mxu0  ;;  %v818_v52 = vpop.f32.mrb[25].mxu1 }
 0x11a   : > { %v1384_v12 = vsel %vm1320_vm10, %v872_v36, 0.0  ;;  %v1416_v50 = vsel %vm1352_vm13, %v904_v31, 0.0  ;;  %vm1322_vm0 = vcmp.eq.s32.totalorder %v2659_v59, 1  ;;  %vm1354_vm7 = vcmp.eq.s32.totalorder %v2844_v15, 1  ;;  %v2273_v42 = vpop.f32.mrb[26].mxu0  ;;  %v2305_v53 = vpop.f32.mrb[26].mxu1 }
 0x11b   : > { %v2078_v56 = vpack.c.bf16 %v1384_v12, %v1383_v51  ;;  %v2158_v46 = vpack.c.bf16 %v1416_v50, %v1415_v44  ;;  %v870_v10 = vmax.f32 %v678_v20, 0.0  ;;  %v902_v54 = vmax.f32 %v806_v27, 0.0  ;;  %v693_v4 = vpop.f32.mrb[27].mxu0  ;;  %v821_v32 = vpop.f32.mrb[27].mxu1 }
 0x11c   : > { %v1413_v57 = vsel %vm1349_vm14, %v901_v25, 0.0  ;;  %v699_v26 = vadd.f32 %v2272_v7, %v2694_v14  ;;  %v827_v9 = vadd.f32 %v2304_v16, %v2694_v14  ;;  %v691_v22 = vadd.f32 %v2694_v14, %v690_v1  ;;  %v1296_v41 = vpop.permute.xlu1 %1295 }
 0x11d   : > { %2190 = vst [vmem:[%s2727_s6 + $0x58] sm:$0xff] %v2078_v56   ;;  %2206 = vst [vmem:[%s2727_s6 + $0xd8] sm:$0xff] %v2158_v46   ;;  %v1382_v37 = vsel %vm1318_vm15, %v870_v10, 0.0  ;;  %v1414_v6 = vsel %vm1350_vm1, %v902_v54, 0.0  ;;  %v819_v34 = vadd.f32 %v2694_v14, %v818_v52  ;;  %v702_v39 = vadd.f32 %v2273_v42, %v2694_v14  ;;  %v1293_v46 = vpop.permute.xlu0 %1292 }
 0x11e   : > { %vm1327_vm8 = vcmp.eq.s32.totalorder %v2673_v3, 1  ;;  %v2073_v19 = vpack.c.bf16 %v1382_v37, %v1381_v24  ;;  %v2153_v28 = vpack.c.bf16 %v1414_v6, %v1413_v57  ;;  %v875_v38 = vmax.f32 %v699_v26, 0.0 }
 0x11f   : > { %v907_v48 = vmax.f32 %v827_v9, 0.0  ;;  %v873_v18 = vmax.f32 %v691_v22, 0.0  ;;  %v905_v17 = vmax.f32 %v819_v34, 0.0  ;;  %v876_v49 = vmax.f32 %v702_v39, 0.0  ;;  %v2276_v62 = vpop.f32.mrb[28].mxu0 }
 0x120   : > { %v830_v30 = vadd.f32 %v2305_v53, %v2694_v14  ;;  %vm1325_vm9 = vcmp.eq.s32.totalorder %v2669_v0, 1  ;;  %vm1356_vm10 = vcmp.eq.s32.totalorder %v2879_v23, 1  ;;  %vm1355_vm11 = vcmp.eq.s32.totalorder %v2910_v47, 1  ;;  %2189 = vst [vmem:[%s2727_s6 + $0x50] sm:$0xff] %v2073_v19   ;;  %2205 = vst [vmem:[%s2727_s6 + $0xd0] sm:$0xff] %v2153_v28   ;;  %v2308_v25 = vpop.f32.mrb[28].mxu1 }
 0x121   : > { %v694_v35 = vadd.f32 %v2694_v14, %v693_v4  ;;  %v822_v13 = vadd.f32 %v2694_v14, %v821_v32  ;;  %vm1328_vm12 = vcmp.eq.s32.totalorder %v2671_v2, 1  ;;  %v1387_v43 = vsel %vm1323_vm4, %v875_v38, 0.0  ;;  %v706_v36 = vpop.f32.mrb[29].mxu0  ;;  %v834_v29 = vpop.f32.mrb[29].mxu1 }
 0x122   : > { %v1385_v45 = vsel %vm1321_vm2, %v873_v18, 0.0  ;;  %v1388_v21 = vsel %vm1324_vm3, %v876_v49, 0.0  ;;  %v908_v33 = vmax.f32 %v830_v30, 0.0  ;;  %vm1326_vm13 = vcmp.eq.s32.totalorder %v2667_v63, 1  ;;  %v2277_v23 = vpop.f32.mrb[30].mxu0  ;;  %v2309_v7 = vpop.f32.mrb[30].mxu1 }
 0x123   : > { %vm1358_vm14 = vcmp.eq.s32.totalorder %v2919_v58, 1  ;;  %vm1357_vm15 = vcmp.eq.s32.totalorder %v2941_v55, 1  ;;  %v2088_v40 = vpack.c.bf16 %v1388_v21, %v1387_v43  ;;  %v874_v11 = vmax.f32 %v694_v35, 0.0  ;;  %v709_v56 = vpop.f32.mrb[31].mxu0  ;;  %v837_v16 = vpop.f32.mrb[31].mxu1 }
 0x124   : > { %v906_v8 = vmax.f32 %v822_v13, 0.0  ;;  %v1419_v60 = vsel %vm1355_vm11, %v907_v48, 0.0  ;;  %v1417_v61 = vsel %vm1353_vm6, %v905_v17, 0.0  ;;  %v1420_v5 = vsel %vm1356_vm10, %v908_v33, 0.0 }
 0x125   : > { %v715_v51 = vadd.f32 %v2276_v62, %v2694_v14  ;;  %2192 = vst [vmem:[%s2727_s6 + $0x68] sm:$0xff] %v2088_v40   ;;  %v2168_v31 = vpack.c.bf16 %v1420_v5, %v1419_v60  ;;  %v1386_v24 = vsel %vm1322_vm0, %v874_v11, 0.0  ;;  %v843_v20 = vadd.f32 %v2308_v25, %v2694_v14 }
 0x126   : > { %v1418_v47 = vsel %vm1354_vm7, %v906_v8, 0.0  ;;  %v2083_v27 = vpack.c.bf16 %v1386_v24, %v1385_v45  ;;  %v707_v50 = vadd.f32 %v2694_v14, %v706_v36  ;;  %v835_v10 = vadd.f32 %v2694_v14, %v834_v29 }
 0x127   : > { %v2163_v44 = vpack.c.bf16 %v1418_v47, %v1417_v61  ;;  %v879_v12 = vmax.f32 %v715_v51, 0.0  ;;  %2208 = vst [vmem:[%s2727_s6 + $0xe8] sm:$0xff] %v2168_v31   ;;  %v911_v59 = vmax.f32 %v843_v20, 0.0  ;;  %v718_v15 = vadd.f32 %v2277_v23, %v2694_v14 }
 0x128   : > { %v846_v54 = vadd.f32 %v2309_v7, %v2694_v14  ;;  %2191 = vst [vmem:[%s2727_s6 + $0x60] sm:$0xff] %v2083_v27   ;;  %v877_v57 = vmax.f32 %v707_v50, 0.0  ;;  %v710_v26 = vadd.f32 %v2694_v14, %v709_v56  ;;  %v838_v9 = vadd.f32 %v2694_v14, %v837_v16 }
 0x129   : > { %2207 = vst [vmem:[%s2727_s6 + $0xe0] sm:$0xff] %v2163_v44   ;;  %v1391_v1 = vsel %vm1327_vm8, %v879_v12, 0.0  ;;  %vm1360_vm1 = vcmp.eq.s32.totalorder %v1296_v41, 1  ;;  %v909_v22 = vmax.f32 %v835_v10, 0.0  ;;  %v880_v52 = vmax.f32 %v718_v15, 0.0 }
 0x12a   : > { %v912_v42 = vmax.f32 %v846_v54, 0.0  ;;  %vm1359_vm2 = vcmp.eq.s32.totalorder %v1293_v46, 1  ;;  %v1389_v37 = vsel %vm1325_vm9, %v877_v57, 0.0  ;;  %v878_v6 = vmax.f32 %v710_v26, 0.0 }
 0x12b   : > { %v910_v3 = vmax.f32 %v838_v9, 0.0  ;;  %v1423_v34 = vsel %vm1359_vm2, %v911_v59, 0.0  ;;  %v1421_v39 = vsel %vm1357_vm15, %v909_v22, 0.0  ;;  %v1392_v14 = vsel %vm1328_vm12, %v880_v52, 0.0 }
 0x12c   : > { %v1424_v53 = vsel %vm1360_vm1, %v912_v42, 0.0  ;;  %v2098_v4 = vpack.c.bf16 %v1392_v14, %v1391_v1  ;;  %v1390_v28 = vsel %vm1326_vm13, %v878_v6, 0.0 }
 0x12d   : > { %v2178_v19 = vpack.c.bf16 %v1424_v53, %v1423_v34  ;;  %v1422_v0 = vsel %vm1358_vm14, %v910_v3, 0.0  ;;  %v2093_v38 = vpack.c.bf16 %v1390_v28, %v1389_v37 }
 0x12e   : > { %v2173_v48 = vpack.c.bf16 %v1422_v0, %v1421_v39  ;;  %2194 = vst [vmem:[%s2727_s6 + $0x78] sm:$0xff] %v2098_v4  }
 0x12f   : > { %2210 = vst [vmem:[%s2727_s6 + $0xf8] sm:$0xff] %v2178_v19   ;;  %2193 = vst [vmem:[%s2727_s6 + $0x70] sm:$0xff] %v2093_v38  }
 0x130   : > { %2209 = vst [vmem:[%s2727_s6 + $0xf0] sm:$0xff] %v2173_v48  }
 0x131 PF: > { %s14_s15 = sadd.s32 1, %s2362_s15  }
 0x132   : > { %p11_p4 = scmp.ge.s32.totalorder %s14_s15, 6  }
 0x134   :  { %13 = sbr.rel (!%p11_p4) target bundleno = 1 (0x1), region = 69 }

// kernel: net_ptq_forward.7
= control target key start
LH: loop header
LB: loop body
LE: loop exit
PB: predicated region body
PF: predicated region fallthrough
CT: control target
= control target key end

     0   :  { %s3431_s15 = smov 0   ;;  %s4259_s0 = inlined_call_operand.vmem [shape: bf16[2048,288], index: 0, kind: input, shape index: {}]   ;;  %s4260_s1 = inlined_call_operand.vmem [shape: bf16[288,128], index: 1, kind: input, shape index: {}]   ;;  %s4261_s2 = inlined_call_operand.vmem [shape: f32[1,128], index: 2, kind: input, shape index: {}]   ;;  %s4262_s3 = inlined_call_operand.vmem [shape: f32[2048,1], index: 3, kind: input, shape index: {}]   ;;  %s4263_s4 = inlined_call_operand.vmem [shape: bf16[2048,128], index: 4, kind: output, shape index: {}]  }
   0x1 LB: > { %s2625_s16 = sadd.s32 4294967295, %s3403_s15   ;;  %p2629_p0 = scmp.ge.s32.totalorder %s3403_s15, 1  ;;  %s3403_s15 = sphi %s3431_s15, %s14_s15  }
   0x2   : > { %p175_p1 = scmp.lt.s32.totalorder %s3403_s15, 5 }
   0x4   : > { %p176_p2 = pnand %p2629_p0, %p175_p1 }
   0x6   : > { %179 = sbr.rel (%p176_p2) target bundleno = 486 (0x1e6), region = 36 }
   0xd   : > { %v3250_v0 = vld [vmem:[%s4260_s1] sm:$0xff]   ;;  %v3405_v1 = vmov 0   ;;  %s2630_s19 = sshll.u32 %s2625_s16, 6  ;;  %v3251_v2 = vld [vmem:[%s4260_s1 + $0x8] sm:$0xff]   ;;  %v3252_v3 = vld [vmem:[%s4260_s1 + $0x10] sm:$0xff]  }
   0xe   : > { %1083 = vmatprep.subr.bf16.mxu0 %v3405_v1  ;;  %3206 = vmatprep.subr.bf16.mxu1 %v3405_v1  ;;  %p208_p3 = scmp.lt.s32.totalorder %s2630_s19, 255  ;;  %v3253_v4 = vld [vmem:[%s4260_s1 + $0x18] sm:$0xff]   ;;  %v3254_v5 = vld [vmem:[%s4260_s1 + $0x20] sm:$0xff]   ;;  %v3255_v7 = vld [vmem:[%s4260_s1 + $0x28] sm:$0xff]  }
   0xf   : > { %1084 = vmatpush1.bf16.msra.mxu0 %v3250_v0  ;;  %3222 = vmatpush1.bf16.msra.mxu1 %v3250_v0  ;;  %v3256_v9 = vld [vmem:[%s4260_s1 + $0x30] sm:$0xff]   ;;  %v3257_v10 = vld [vmem:[%s4260_s1 + $0x38] sm:$0xff]   ;;  %v3258_v16 = vld [vmem:[%s4260_s1 + $0x40] sm:$0xff]  }
  0x10   : > { %1085 = vmatprep.subr.bf16.mxu0 %v3405_v1  ;;  %3207 = vmatprep.subr.bf16.mxu1 %v3405_v1  ;;  %s4303_s19 = smov (!%p208_p3, %s2630_s19), 255  ;;  %v3259_v22 = vld [vmem:[%s4260_s1 + $0x48] sm:$0xff]   ;;  %v3260_v27 = vld [vmem:[%s4260_s1 + $0x50] sm:$0xff]   ;;  %v3261_v32 = vld [vmem:[%s4260_s1 + $0x58] sm:$0xff]  }
  0x11   : > { %3249 = vset.pattern.permute.xlu1 %v3405_v1  ;;  %3248 = vset.pattern.permute.xlu0 %v3405_v1  ;;  %s3238_s26 = smul.u32 12, %s4303_s19  ;;  %s2633_s8 = sshll.u32 %s4303_s19, 3  ;;  %v3262_v37 = vld [vmem:[%s4260_s1 + $0x60] sm:$0xff]   ;;  %v3263_v40 = vld [vmem:[%s4260_s1 + $0x68] sm:$0xff]   ;;  %v3264_v47 = vld [vmem:[%s4260_s1 + $0x70] sm:$0xff]  }
  0x12   : > { %s3490_s13 = scalar_lea.vmem %s4262_s3, %s2633_s8  ;;  %v3265_v52 = vld [vmem:[%s4260_s1 + $0x78] sm:$0xff]   ;;  %v3272_v53 = vld [vmem:[%s4260_s1 + $0x80] sm:$0xff]   ;;  %v3297_v63 = vld [vmem:[%s4260_s1 + $0x88] sm:$0xff]   ;;  %s2635_s14 = sshll.u32 %s4303_s19, 2 }
  0x13   : > { %1086 = vmatpush1.bf16.msra.mxu0 %v3251_v2  ;;  %3223 = vmatpush1.bf16.msra.mxu1 %v3251_v2  ;;  %s3470_s5 = scalar_lea.vmem %s4259_s0, %s3238_s26  ;;  %v1727_v11 = vld [vmem:[%s3490_s13 + $0x10] sm:$0xff]  ;;  %v1725_v12 = vld [vmem:[%s3490_s13] sm:$0xff]  ;;  %v1728_v13 = vld [vmem:[%s3490_s13 + $0x18] sm:$0xff]  ;;  %s3960_s19 = scalar_lea.vmem %s4263_s4, %s2635_s14 }
  0x14   : > { %1087 = vmatprep.subr.bf16.mxu0 %v3405_v1  ;;  %3208 = vmatprep.subr.bf16.mxu1 %v3405_v1  ;;  %v3268_v6 = vld [vmem:[%s3470_s5 + $0x4] ss:$12 sps:$4 sm:$0xff]   ;;  %vm1791_vm0 = vcmp.gt.f32.partialorder %v1727_v11, 0.5  ;;  %v1726_v14 = vld [vmem:[%s3490_s13 + $0x8] sm:$0xff]  ;;  %vm1789_vm1 = vcmp.gt.f32.partialorder %v1725_v12, 0.5  ;;  %vm1792_vm2 = vcmp.gt.f32.partialorder %v1728_v13, 0.5 }
  0x15   : > { %v3271_v8 = vld [vmem:[%s3470_s5 + $0x244] ss:$12 sps:$4 sm:$0xff]   ;;  %1115 = vmatprep.mubr.bf16.mxu0 %v3268_v6  ;;  %v1855_v15 = vsel %vm1791_vm0, 1, %v3405_v1  ;;  %v1853_v17 = vsel %vm1789_vm1, 1, %v3405_v1  ;;  %vm1790_vm3 = vcmp.gt.f32.partialorder %v1726_v14, 0.5  ;;  %v1856_v18 = vsel %vm1792_vm2, 1, %v3405_v1 }
  0x16   : > { %1307 = vmatprep.mubr.bf16.mxu1 %v3271_v8  ;;  %1924 = vperm.xlu1 %3249, %v1855_v15   ;;  %v1854_v19 = vsel %vm1790_vm3, 1, %v3405_v1  ;;  %v1730_v20 = vld [vmem:[%s3490_s13 + $0x28] sm:$0xff]  ;;  %v1729_v21 = vld [vmem:[%s3490_s13 + $0x20] sm:$0xff]  ;;  %v1732_v23 = vld [vmem:[%s3490_s13 + $0x38] sm:$0xff] }
  0x17   : > { %1088 = vmatpush1.bf16.msra.mxu0 %v3252_v3  ;;  %3224 = vmatpush1.bf16.msra.mxu1 %v3252_v3  ;;  %vm1794_vm4 = vcmp.gt.f32.partialorder %v1730_v20, 0.5  ;;  %vm1793_vm5 = vcmp.gt.f32.partialorder %v1729_v21, 0.5  ;;  %v1731_v24 = vld [vmem:[%s3490_s13 + $0x30] sm:$0xff]  ;;  %vm1796_vm6 = vcmp.gt.f32.partialorder %v1732_v23, 0.5  ;;  %v1734_v28 = vld [vmem:[%s3490_s13 + $0x48] sm:$0xff]  ;;  %v1733_v29 = vld [vmem:[%s3490_s13 + $0x40] sm:$0xff] }
  0x18   : > { %1089 = vmatprep.subr.bf16.mxu0 %v3405_v1  ;;  %3209 = vmatprep.subr.bf16.mxu1 %v3405_v1  ;;  %v1858_v25 = vsel %vm1794_vm4, 1, %v3405_v1  ;;  %v1857_v26 = vsel %vm1793_vm5, 1, %v3405_v1  ;;  %vm1795_vm7 = vcmp.gt.f32.partialorder %v1731_v24, 0.5  ;;  %v1860_v30 = vsel %vm1796_vm6, 1, %v3405_v1  ;;  %v1736_v33 = vld [vmem:[%s3490_s13 + $0x58] sm:$0xff]  ;;  %v1735_v34 = vld [vmem:[%s3490_s13 + $0x50] sm:$0xff] }
  0x19   : > { %1918 = vperm.xlu0 %3248, %v1853_v17   ;;  %v1859_v31 = vsel %vm1795_vm7, 1, %v3405_v1  ;;  %vm1798_vm8 = vcmp.gt.f32.partialorder %v1734_v28, 0.5  ;;  %vm1797_vm9 = vcmp.gt.f32.partialorder %v1733_v29, 0.5  ;;  %vm1800_vm10 = vcmp.gt.f32.partialorder %v1736_v33, 0.5  ;;  %v1738_v38 = vld [vmem:[%s3490_s13 + $0x68] sm:$0xff]  ;;  %v1737_v39 = vld [vmem:[%s3490_s13 + $0x60] sm:$0xff] }
  0x1a   : > { %1927 = vperm.xlu1 %3249, %v1856_v18   ;;  %v1862_v35 = vsel %vm1798_vm8, 1, %v3405_v1  ;;  %v1861_v36 = vsel %vm1797_vm9, 1, %v3405_v1  ;;  %vm1799_vm11 = vcmp.gt.f32.partialorder %v1735_v34, 0.5  ;;  %v1864_v41 = vsel %vm1800_vm10, 1, %v3405_v1  ;;  %v1740_v43 = vld [vmem:[%s3490_s13 + $0x78] sm:$0xff]  ;;  %v1739_v44 = vld [vmem:[%s3490_s13 + $0x70] sm:$0xff] }
  0x1b   : > { %1090 = vmatpush1.bf16.msra.mxu0 %v3253_v4  ;;  %3225 = vmatpush1.bf16.msra.mxu1 %v3253_v4  ;;  %v1863_v42 = vsel %vm1799_vm11, 1, %v3405_v1  ;;  %vm1802_vm12 = vcmp.gt.f32.partialorder %v1738_v38, 0.5  ;;  %vm1801_vm13 = vcmp.gt.f32.partialorder %v1737_v39, 0.5  ;;  %vm1804_vm14 = vcmp.gt.f32.partialorder %v1740_v43, 0.5  ;;  %v1742_v48 = vld [vmem:[%s3490_s13 + $0x88] sm:$0xff]  ;;  %v1741_v49 = vld [vmem:[%s3490_s13 + $0x80] sm:$0xff] }
  0x1c   : > { %1091 = vmatprep.subr.bf16.mxu0 %v3405_v1  ;;  %3210 = vmatprep.subr.bf16.mxu1 %v3405_v1  ;;  %v1866_v45 = vsel %vm1802_vm12, 1, %v3405_v1  ;;  %v1865_v46 = vsel %vm1801_vm13, 1, %v3405_v1  ;;  %vm1803_vm15 = vcmp.gt.f32.partialorder %v1739_v44, 0.5  ;;  %v1868_v50 = vsel %vm1804_vm14, 1, %v3405_v1  ;;  %v3266_v54 = vld [vmem:[%s3470_s5] ss:$12 sps:$4 sm:$0xff]  }
  0x1d   : > { %1921 = vperm.xlu0 %3248, %v1854_v19   ;;  %v1867_v51 = vsel %vm1803_vm15, 1, %v3405_v1  ;;  %vm1806_vm0 = vcmp.gt.f32.partialorder %v1742_v48, 0.5  ;;  %vm1805_vm1 = vcmp.gt.f32.partialorder %v1741_v49, 0.5  ;;  %v1744_v55 = vld [vmem:[%s3490_s13 + $0x98] sm:$0xff]  ;;  %v1743_v56 = vld [vmem:[%s3490_s13 + $0x90] sm:$0xff]  ;;  %v1746_v61 = vld [vmem:[%s3490_s13 + $0xa8] sm:$0xff] }
  0x1e   : > { %1933 = vperm.xlu1 %3249, %v1858_v25   ;;  %v3269_v57 = vld [vmem:[%s3470_s5 + $0x240] ss:$12 sps:$4 sm:$0xff]   ;;  %v3273_v58 = vld [vmem:[%s3470_s5 + $0x1c] ss:$12 sps:$4 sm:$0xff]   ;;  %v1870_v59 = vsel %vm1806_vm0, 1, %v3405_v1  ;;  %v1869_v60 = vsel %vm1805_vm1, 1, %v3405_v1 }
  0x1f   : > { %1092 = vmatpush1.bf16.msra.mxu0 %v3254_v5  ;;  %3226 = vmatpush1.bf16.msra.mxu1 %v3254_v5  ;;  %vm1808_vm2 = vcmp.gt.f32.partialorder %v1744_v55, 0.5  ;;  %vm1807_vm3 = vcmp.gt.f32.partialorder %v1743_v56, 0.5  ;;  %v3275_v62 = vld [vmem:[%s3470_s5 + $0x25c] ss:$12 sps:$4 sm:$0xff]   ;;  %v1745_v0 = vld [vmem:[%s3490_s13 + $0xa0] sm:$0xff]  ;;  %vm1810_vm4 = vcmp.gt.f32.partialorder %v1746_v61, 0.5 }
  0x20   : > { %1093 = vmatprep.subr.bf16.mxu0 %v3405_v1  ;;  %3211 = vmatprep.subr.bf16.mxu1 %v3405_v1  ;;  %v1872_v2 = vsel %vm1808_vm2, 1, %v3405_v1  ;;  %v1871_v3 = vsel %vm1807_vm3, 1, %v3405_v1  ;;  %vm1809_vm5 = vcmp.gt.f32.partialorder %v1745_v0, 0.5  ;;  %v1748_v4 = vld [vmem:[%s3490_s13 + $0xb8] sm:$0xff]  ;;  %v1747_v5 = vld [vmem:[%s3490_s13 + $0xb0] sm:$0xff]  ;;  %v1750_v12 = vld [vmem:[%s3490_s13 + $0xc8] sm:$0xff] }
  0x21   : > { %1930 = vperm.xlu0 %3248, %v1857_v26   ;;  %v3277_v6 = vld [vmem:[%s3470_s5 + $0x18] ss:$12 sps:$4 sm:$0xff]   ;;  %v3279_v8 = vld [vmem:[%s3470_s5 + $0x34] ss:$12 sps:$4 sm:$0xff]   ;;  %vm1812_vm6 = vcmp.gt.f32.partialorder %v1748_v4, 0.5  ;;  %vm1811_vm7 = vcmp.gt.f32.partialorder %v1747_v5, 0.5 }
  0x22   : > { %1939 = vperm.xlu1 %3249, %v1860_v30   ;;  %v3281_v11 = vld [vmem:[%s3470_s5 + $0x274] ss:$12 sps:$4 sm:$0xff]   ;;  %v1876_v14 = vsel %vm1812_vm6, 1, %v3405_v1  ;;  %v1875_v15 = vsel %vm1811_vm7, 1, %v3405_v1  ;;  %vm1814_vm8 = vcmp.gt.f32.partialorder %v1750_v12, 0.5  ;;  %v1752_v18 = vld [vmem:[%s3490_s13 + $0xd8] sm:$0xff] }
  0x23   : > { %1094 = vmatpush1.bf16.msra.mxu0 %v3255_v7  ;;  %3227 = vmatpush1.bf16.msra.mxu1 %v3255_v7  ;;  %v3278_v7 = vld [vmem:[%s3470_s5 + $0x258] ss:$12 sps:$4 sm:$0xff]   ;;  %v3284_v17 = vld [vmem:[%s3470_s5 + $0x270] ss:$12 sps:$4 sm:$0xff]   ;;  %vm1816_vm10 = vcmp.gt.f32.partialorder %v1752_v18, 0.5  ;;  %v1754_v24 = vld [vmem:[%s3490_s13 + $0xe8] sm:$0xff] }
  0x24   : > { %1095 = vmatprep.subr.bf16.mxu0 %v3405_v1  ;;  %3212 = vmatprep.subr.bf16.mxu1 %v3405_v1  ;;  %v1749_v13 = vld [vmem:[%s3490_s13 + $0xc0] sm:$0xff]  ;;  %v1751_v19 = vld [vmem:[%s3490_s13 + $0xd0] sm:$0xff]  ;;  %v3285_v20 = vld [vmem:[%s3470_s5 + $0x4c] ss:$12 sps:$4 sm:$0xff]   ;;  %v1880_v26 = vsel %vm1816_vm10, 1, %v3405_v1  ;;  %vm1818_vm12 = vcmp.gt.f32.partialorder %v1754_v24, 0.5 }
  0x25   : > { %1936 = vperm.xlu0 %3248, %v1859_v31   ;;  %vm1813_vm9 = vcmp.gt.f32.partialorder %v1749_v13, 0.5  ;;  %v3287_v21 = vld [vmem:[%s3470_s5 + $0x28c] ss:$12 sps:$4 sm:$0xff]   ;;  %vm1815_vm11 = vcmp.gt.f32.partialorder %v1751_v19, 0.5  ;;  %v1753_v25 = vld [vmem:[%s3490_s13 + $0xe0] sm:$0xff]  ;;  %v1755_v29 = vld [vmem:[%s3490_s13 + $0xf0] sm:$0xff] }
  0x26   : > { %1945 = vperm.xlu1 %3249, %v1862_v35   ;;  %v1877_v23 = vsel %vm1813_vm9, 1, %v3405_v1  ;;  %vm1817_vm13 = vcmp.gt.f32.partialorder %v1753_v25, 0.5  ;;  %v1756_v28 = vld [vmem:[%s3490_s13 + $0xf8] sm:$0xff]  ;;  %v3289_v30 = vld [vmem:[%s3470_s5 + $0x48] ss:$12 sps:$4 sm:$0xff]   ;;  %v1882_v33 = vsel %vm1818_vm12, 1, %v3405_v1 }
  0x27   : > { %1096 = vmatpush1.bf16.msra.mxu0 %v3256_v9  ;;  %3228 = vmatpush1.bf16.msra.mxu1 %v3256_v9  ;;  %v1874_v9 = vsel %vm1810_vm4, 1, %v3405_v1  ;;  %v3290_v31 = vld [vmem:[%s3470_s5 + $0x288] ss:$12 sps:$4 sm:$0xff]   ;;  %v1881_v34 = vsel %vm1817_vm13, 1, %v3405_v1  ;;  %v3293_v35 = vld [vmem:[%s3470_s5 + $0x2a4] ss:$12 sps:$4 sm:$0xff]  }
  0x28   : > { %1097 = vmatprep.subr.bf16.mxu0 %v3405_v1  ;;  %3213 = vmatprep.subr.bf16.mxu1 %v3405_v1  ;;  %vm1820_vm14 = vcmp.gt.f32.partialorder %v1756_v28, 0.5  ;;  %vm1819_vm15 = vcmp.gt.f32.partialorder %v1755_v29, 0.5  ;;  %v1759_v43 = vld [vmem:[%s3490_s13 + $0x110] sm:$0xff]  ;;  %v3298_v44 = vld [vmem:[%s3470_s5 + $0x7c] ss:$12 sps:$4 sm:$0xff]   ;;  %v1761_v49 = vld [vmem:[%s3490_s13 + $0x120] sm:$0xff] }
  0x29   : > { %1942 = vperm.xlu0 %3248, %v1861_v36   ;;  %v1758_v36 = vld [vmem:[%s3490_s13 + $0x108] sm:$0xff]  ;;  %v1884_v38 = vsel %vm1820_vm14, 1, %v3405_v1  ;;  %v1883_v39 = vsel %vm1819_vm15, 1, %v3405_v1  ;;  %vm1823_vm3 = vcmp.gt.f32.partialorder %v1759_v43, 0.5  ;;  %v3303_v55 = vld [vmem:[%s3470_s5 + $0x2b8] ss:$12 sps:$4 sm:$0xff]  }
  0x2a   : > { %1951 = vperm.xlu1 %3249, %v1864_v41   ;;  %vm1822_vm0 = vcmp.gt.f32.partialorder %v1758_v36, 0.5  ;;  %v3296_v41 = vld [vmem:[%s3470_s5 + $0x2a0] ss:$12 sps:$4 sm:$0xff]   ;;  %v3308_v0 = vld [vmem:[%s3470_s5 + $0x90] ss:$12 sps:$4 sm:$0xff]  }
  0x2b   : > { %1098 = vmatpush1.bf16.msra.mxu0 %v3257_v10  ;;  %3229 = vmatpush1.bf16.msra.mxu1 %v3257_v10  ;;  %v1873_v10 = vsel %vm1809_vm5, 1, %v3405_v1  ;;  %v1762_v48 = vld [vmem:[%s3490_s13 + $0x128] sm:$0xff]  ;;  %vm1825_vm5 = vcmp.gt.f32.partialorder %v1761_v49, 0.5  ;;  %v3304_v56 = vld [vmem:[%s3470_s5 + $0x94] ss:$12 sps:$4 sm:$0xff]   ;;  %v1772_v13 = vld [vmem:[%s3490_s13 + $0x178] sm:$0xff] }
  0x2c   : > { %1099 = vmatprep.subr.bf16.mxu0 %v3405_v1  ;;  %3214 = vmatprep.subr.bf16.mxu1 %v3405_v1  ;;  %vm1826_vm4 = vcmp.gt.f32.partialorder %v1762_v48, 0.5  ;;  %v1765_v61 = vld [vmem:[%s3490_s13 + $0x140] sm:$0xff]  ;;  %v1767_v4 = vld [vmem:[%s3490_s13 + $0x150] sm:$0xff]  ;;  %v3310_v5 = vld [vmem:[%s3470_s5 + $0xac] ss:$12 sps:$4 sm:$0xff]   ;;  %vm1836_vm14 = vcmp.gt.f32.partialorder %v1772_v13, 0.5 }
  0x2d   : > { %1948 = vperm.xlu0 %3248, %v1863_v42   ;;  %v1760_v42 = vld [vmem:[%s3490_s13 + $0x118] sm:$0xff]  ;;  %vm1829_vm9 = vcmp.gt.f32.partialorder %v1765_v61, 0.5  ;;  %v3318_v18 = vld [vmem:[%s3470_s5 + $0x8] ss:$12 sps:$4 sm:$0xff]   ;;  %v3320_v28 = vld [vmem:[%s3470_s5 + $0x20] ss:$12 sps:$4 sm:$0xff]  }
  0x2e   : > { %1957 = vperm.xlu1 %3249, %v1866_v45   ;;  %v3300_v45 = vld [vmem:[%s3470_s5 + $0x2bc] ss:$12 sps:$4 sm:$0xff]   ;;  %vm1824_vm2 = vcmp.gt.f32.partialorder %v1760_v42, 0.5  ;;  %v3326_v43 = vld [vmem:[%s3470_s5 + $0xf4] ss:$12 sps:$4 sm:$0xff]  }
  0x2f   : > { %1100 = vmatpush1.bf16.msra.mxu0 %v3258_v16  ;;  %3230 = vmatpush1.bf16.msra.mxu1 %v3258_v16  ;;  %v3283_v16 = vld [vmem:[%s3470_s5 + $0x30] ss:$12 sps:$4 sm:$0xff]   ;;  %v3346_v13 = vld [vmem:[%s3470_s5 + $0x154] ss:$12 sps:$4 sm:$0xff]  }
  0x30   : > { %1101 = vmatprep.subr.bf16.mxu0 %v3405_v1  ;;  %3215 = vmatprep.subr.bf16.mxu1 %v3405_v1  ;;  %v1776_v25 = vld [vmem:[%s3490_s13 + $0x198] sm:$0xff] }
  0x31   : > { %1954 = vperm.xlu0 %3248, %v1865_v46   ;;  %v1886_v46 = vsel %vm1822_vm0, 1, %v3405_v1  ;;  %vm986_vm0 = vcmask 261120   ;;  %v1784_v49 = vld [vmem:[%s3490_s13 + $0x1d8] sm:$0xff] }
  0x32   : > { %1963 = vperm.xlu1 %3249, %v1868_v50   ;;  %v1888_v50 = vsel %vm1824_vm2, 1, %v3405_v1  ;;  %v1788_v61 = vld [vmem:[%s3490_s13 + $0x1f8] sm:$0xff] }
  0x33   : > { %1102 = vmatpush1.bf16.msra.mxu0 %v3259_v22  ;;  %3231 = vmatpush1.bf16.msra.mxu1 %v3259_v22  ;;  %v1878_v22 = vsel %vm1814_vm8, 1, %v3405_v1 }
  0x34   : > { %1103 = vmatprep.subr.bf16.mxu0 %v3405_v1  ;;  %3216 = vmatprep.subr.bf16.mxu1 %v3405_v1 }
  0x35   : > { %1960 = vperm.xlu0 %3248, %v1867_v51   ;;  %v1887_v51 = vsel %vm1823_vm3, 1, %v3405_v1  ;;  %vm1840_vm3 = vcmp.gt.f32.partialorder %v1776_v25, 0.5  ;;  %v3361_v25 = vld [vmem:[%s3470_s5 + $0x19c] ss:$12 sps:$4 sm:$0xff]  }
  0x36   : > { %1969 = vperm.xlu1 %3249, %v1870_v59   ;;  %v3306_v59 = vld [vmem:[%s3470_s5 + $0x2d4] ss:$12 sps:$4 sm:$0xff]  }
  0x37   : > { %1104 = vmatpush1.bf16.msra.mxu0 %v3260_v27  ;;  %3232 = vmatpush1.bf16.msra.mxu1 %v3260_v27  ;;  %v1879_v27 = vsel %vm1815_vm11, 1, %v3405_v1  ;;  %vm1831_vm11 = vcmp.gt.f32.partialorder %v1767_v4, 0.5  ;;  %v3336_v4 = vld [vmem:[%s3470_s5 + $0x124] ss:$12 sps:$4 sm:$0xff]  }
  0x38   : > { %1105 = vmatprep.subr.bf16.mxu0 %v3405_v1  ;;  %3217 = vmatprep.subr.bf16.mxu1 %v3405_v1  ;;  %v1895_v12 = vsel %vm1831_vm11, 1, %v3405_v1  ;;  %vm1848_vm11 = vcmp.gt.f32.partialorder %v1784_v49, 0.5 }
  0x39   : > { %1966 = vperm.xlu0 %3248, %v1869_v60   ;;  %v1766_v60 = vld [vmem:[%s3490_s13 + $0x148] sm:$0xff] }
  0x3a   : > { %1975 = vperm.xlu1 %3249, %v1872_v2   ;;  %vm1830_vm8 = vcmp.gt.f32.partialorder %v1766_v60, 0.5  ;;  %v3309_v2 = vld [vmem:[%s3470_s5 + $0x2d0] ss:$12 sps:$4 sm:$0xff]  }
  0x3b   : > { %1106 = vmatpush1.bf16.msra.mxu0 %v3261_v32  ;;  %3233 = vmatpush1.bf16.msra.mxu1 %v3261_v32  ;;  %v3291_v32 = vld [vmem:[%s3470_s5 + $0x64] ss:$12 sps:$4 sm:$0xff]  }
  0x3c   : > { %1107 = vmatprep.subr.bf16.mxu0 %v3405_v1  ;;  %3218 = vmatprep.subr.bf16.mxu1 %v3405_v1 }
  0x3d   : > { %1972 = vperm.xlu0 %3248, %v1871_v3   ;;  %v1768_v3 = vld [vmem:[%s3490_s13 + $0x158] sm:$0xff] }
  0x3e   : > { %1981 = vperm.xlu1 %3249, %v1874_v9   ;;  %vm1832_vm10 = vcmp.gt.f32.partialorder %v1768_v3, 0.5  ;;  %v1770_v9 = vld [vmem:[%s3490_s13 + $0x168] sm:$0xff] }
  0x3f   : > { %1108 = vmatpush1.bf16.msra.mxu0 %v3262_v37  ;;  %3234 = vmatpush1.bf16.msra.mxu1 %v3262_v37  ;;  %v1757_v37 = vld [vmem:[%s3490_s13 + $0x100] sm:$0xff]  ;;  %vm1834_vm12 = vcmp.gt.f32.partialorder %v1770_v9, 0.5 }
  0x40   : > { %1109 = vmatprep.subr.bf16.mxu0 %v3405_v1  ;;  %3219 = vmatprep.subr.bf16.mxu1 %v3405_v1  ;;  %vm1821_vm1 = vcmp.gt.f32.partialorder %v1757_v37, 0.5  ;;  %v1898_v19 = vsel %vm1834_vm12, 1, %v3405_v1  ;;  %v1780_v37 = vld [vmem:[%s3490_s13 + $0x1b8] sm:$0xff]  ;;  %v3340_v9 = vld [vmem:[%s3470_s5 + $0xe0] ss:$12 sps:$4 sm:$0xff]  }
  0x41   : > { %1978 = vperm.xlu0 %3248, %v1873_v10   ;;  %v1769_v10 = vld [vmem:[%s3490_s13 + $0x160] sm:$0xff] }
  0x42   : > { %1987 = vperm.xlu1 %3249, %v1876_v14   ;;  %vm1833_vm13 = vcmp.gt.f32.partialorder %v1769_v10, 0.5  ;;  %v3314_v14 = vld [vmem:[%s3470_s5 + $0xa8] ss:$12 sps:$4 sm:$0xff]  }
  0x43   : > { %1110 = vmatpush1.bf16.msra.mxu0 %v3263_v40  ;;  %3235 = vmatpush1.bf16.msra.mxu1 %v3263_v40  ;;  %v3295_v40 = vld [vmem:[%s3470_s5 + $0x60] ss:$12 sps:$4 sm:$0xff]   ;;  %v3341_v10 = vld [vmem:[%s3470_s5 + $0x13c] ss:$12 sps:$4 sm:$0xff]  }
  0x44   : > { %1111 = vmatprep.subr.bf16.mxu0 %v3405_v1  ;;  %3220 = vmatprep.subr.bf16.mxu1 %v3405_v1 }
  0x45   : > { %1984 = vperm.xlu0 %3248, %v1875_v15   ;;  %v3315_v15 = vld [vmem:[%s3470_s5 + $0x2e8] ss:$12 sps:$4 sm:$0xff]  }
  0x46   : > { %1993 = vperm.xlu1 %3249, %v1878_v22   ;;  %v1773_v22 = vld [vmem:[%s3490_s13 + $0x180] sm:$0xff] }
  0x47   : > { %1112 = vmatpush1.bf16.msra.mxu0 %v3264_v47  ;;  %3236 = vmatpush1.bf16.msra.mxu1 %v3264_v47  ;;  %v1885_v47 = vsel %vm1821_vm1, 1, %v3405_v1  ;;  %vm1837_vm2 = vcmp.gt.f32.partialorder %v1773_v22, 0.5  ;;  %v3358_v22 = vld [vmem:[%s3470_s5 + $0x188] ss:$12 sps:$4 sm:$0xff]  }
  0x48   : > { %1113 = vmatprep.subr.bf16.mxu0 %v3405_v1  ;;  %3221 = vmatprep.subr.bf16.mxu1 %v3405_v1 }
  0x49   : > { %1990 = vperm.xlu0 %3248, %v1877_v23   ;;  %v1900_v23 = vsel %vm1836_vm14, 1, %v3405_v1 }
  0x4a   : > { %1999 = vperm.xlu1 %3249, %v1880_v26   ;;  %v1775_v26 = vld [vmem:[%s3490_s13 + $0x190] sm:$0xff] }
  0x4b   : > { %1114 = vmatpush1.bf16.msra.mxu0 %v3265_v52  ;;  %3237 = vmatpush1.bf16.msra.mxu1 %v3265_v52  ;;  %v1764_v52 = vld [vmem:[%s3490_s13 + $0x138] sm:$0xff] }
  0x4c   : > { %3138 = vmatprep.subr.bf16.mxu1 %v3272_v53  ;;  %vm1828_vm6 = vcmp.gt.f32.partialorder %v1764_v52, 0.5  ;;  %v3330_v52 = vld [vmem:[%s3470_s5 + $0x80] ss:$12 sps:$4 sm:$0xff]  }
  0x4d   : > { %1996 = vperm.xlu0 %3248, %v1879_v27   ;;  %v3319_v27 = vld [vmem:[%s3470_s5 + $0xc0] ss:$12 sps:$4 sm:$0xff]  }
  0x4e   : > { %1116 = vmatmul.mubr.bf16.vlgmr.msra.gmra.mrb[0].mxu0 %v3266_v54  ;;  %1308 = vmatmul.mubr.bf16.vlgmr.msra.gmra.mrb[0].mxu1 %v3269_v57  ;;  %v3302_v54 = vld [vmem:[%s3470_s5 + $0x78] ss:$12 sps:$4 sm:$0xff]   ;;  %v1890_v57 = vsel %vm1826_vm4, 1, %v3405_v1  ;;  %vm1839_vm4 = vcmp.gt.f32.partialorder %v1775_v26, 0.5 }
  0x4f   : > { %3139 = vmatpush3.bf16.msra.mxu1 %v3272_v53  ;;  %1123 = vmatprep.mubr.bf16.mxu0 %v3273_v58  ;;  %v1763_v53 = vld [vmem:[%s3490_s13 + $0x130] sm:$0xff]  ;;  %v1889_v58 = vsel %vm1825_vm5, 1, %v3405_v1  ;;  %v1903_v36 = vsel %vm1839_vm4, 1, %v3405_v1  ;;  %v3363_v26 = vld [vmem:[%s3470_s5 + $0x1b8] ss:$12 sps:$4 sm:$0xff]  }
  0x50   : > { %1315 = vmatprep.mubr.bf16.mxu1 %v3275_v62  ;;  %3140 = vmatprep.subr.bf16.mxu1 %v3297_v63  ;;  %vm1827_vm7 = vcmp.gt.f32.partialorder %v1763_v53, 0.5  ;;  %v1892_v62 = vsel %vm1828_vm6, 1, %v3405_v1 }
  0x51   : > { %2005 = vperm.xlu1 %3249, %v1882_v33   ;;  %2002 = vperm.xlu0 %3248, %v1881_v34   ;;  %v1778_v33 = vld [vmem:[%s3490_s13 + $0x1a8] sm:$0xff]  ;;  %v1777_v34 = vld [vmem:[%s3490_s13 + $0x1a0] sm:$0xff] }
  0x52   : > { %vm1842_vm5 = vcmp.gt.f32.partialorder %v1778_v33, 0.5  ;;  %vm1841_vm6 = vcmp.gt.f32.partialorder %v1777_v34, 0.5  ;;  %v3371_v33 = vld [vmem:[%s3470_s5 + $0x1cc] ss:$12 sps:$4 sm:$0xff]  }
  0x53   : > { %3141 = vmatpush3.bf16.msra.mxu1 %v3297_v63  ;;  %v1891_v63 = vsel %vm1827_vm7, 1, %v3405_v1  ;;  %v1905_v42 = vsel %vm1841_vm6, 1, %v3405_v1  ;;  %vm1844_vm7 = vcmp.gt.f32.partialorder %v1780_v37, 0.5  ;;  %v3373_v34 = vld [vmem:[%s3470_s5 + $0x218] ss:$12 sps:$4 sm:$0xff]  }
  0x54   : > { %v3376_v37 = vld [vmem:[%s3470_s5 + $0x1e4] ss:$12 sps:$4 sm:$0xff]  }
  0x55   : > { %2011 = vperm.xlu1 %3249, %v1884_v38   ;;  %2008 = vperm.xlu0 %3248, %v1883_v39   ;;  %v1779_v38 = vld [vmem:[%s3490_s13 + $0x1b0] sm:$0xff]  ;;  %v3324_v39 = vld [vmem:[%s3470_s5 + $0xd8] ss:$12 sps:$4 sm:$0xff]  }
  0x56   : > { %1124 = vmatmul.mubr.bf16.gmra.mrb[4].mxu0 %v3277_v6  ;;  %1316 = vmatmul.mubr.bf16.gmra.mrb[4].mxu1 %v3278_v7  ;;  %v3312_v6 = vld [vmem:[%s3470_s5 + $0x2ec] ss:$12 sps:$4 sm:$0xff]   ;;  %v1894_v7 = vsel %vm1830_vm8, 1, %v3405_v1  ;;  %vm1843_vm8 = vcmp.gt.f32.partialorder %v1779_v38, 0.5  ;;  %v3378_v38 = vld [vmem:[%s3470_s5 + $0x248] ss:$12 sps:$4 sm:$0xff]  }
  0x57   : > { %1131 = vmatprep.mubr.bf16.mxu0 %v3279_v8  ;;  %1323 = vmatprep.mubr.bf16.mxu1 %v3281_v11  ;;  %v1893_v8 = vsel %vm1829_vm9, 1, %v3405_v1  ;;  %v1896_v11 = vsel %vm1832_vm10, 1, %v3405_v1  ;;  %v1907_v48 = vsel %vm1843_vm8, 1, %v3405_v1 }
  0x59   : > { %2017 = vperm.xlu1 %3249, %v1886_v46   ;;  %2014 = vperm.xlu0 %3248, %v1885_v47   ;;  %v1781_v46 = vld [vmem:[%s3490_s13 + $0x1c0] sm:$0xff]  ;;  %v1908_v47 = vsel %vm1844_vm7, 1, %v3405_v1 }
  0x5a   : > { %vm1845_vm10 = vcmp.gt.f32.partialorder %v1781_v46, 0.5  ;;  %v3385_v46 = vld [vmem:[%s3470_s5 + $0x290] ss:$12 sps:$4 sm:$0xff]  }
  0x5d   : > { %2023 = vperm.xlu1 %3249, %v1888_v50   ;;  %2020 = vperm.xlu0 %3248, %v1887_v51   ;;  %v1783_v50 = vld [vmem:[%s3490_s13 + $0x1d0] sm:$0xff] }
  0x5e   : > { %1132 = vmatmul.mubr.bf16.gmra.mrb[8].mxu0 %v3283_v16  ;;  %1324 = vmatmul.mubr.bf16.gmra.mrb[8].mxu1 %v3284_v17  ;;  %v1771_v16 = vld [vmem:[%s3490_s13 + $0x170] sm:$0xff]  ;;  %vm1847_vm12 = vcmp.gt.f32.partialorder %v1783_v50, 0.5 }
  0x5f   : > { %1139 = vmatprep.mubr.bf16.mxu0 %v3285_v20  ;;  %1331 = vmatprep.mubr.bf16.mxu1 %v3287_v21  ;;  %v3316_v17 = vld [vmem:[%s3470_s5 + $0xc4] ss:$12 sps:$4 sm:$0xff]   ;;  %v1897_v20 = vsel %vm1833_vm13, 1, %v3405_v1  ;;  %vm1835_vm15 = vcmp.gt.f32.partialorder %v1771_v16, 0.5  ;;  %v1774_v21 = vld [vmem:[%s3490_s13 + $0x188] sm:$0xff]  ;;  %v1911_v60 = vsel %vm1847_vm12, 1, %v3405_v1 }
  0x60   : > { %v1899_v24 = vsel %vm1835_vm15, 1, %v3405_v1  ;;  %vm1838_vm1 = vcmp.gt.f32.partialorder %v1774_v21, 0.5  ;;  %v3329_v51 = vld [vmem:[%s3470_s5 + $0xf0] ss:$12 sps:$4 sm:$0xff]   ;;  %vm1852_vm15 = vcmp.gt.f32.partialorder %v1788_v61, 0.5 }
  0x61   : > { %2029 = vperm.xlu1 %3249, %v1890_v57   ;;  %2026 = vperm.xlu0 %3248, %v1889_v58   ;;  %v1902_v29 = vsel %vm1838_vm1, 1, %v3405_v1  ;;  %v1786_v57 = vld [vmem:[%s3490_s13 + $0x1e8] sm:$0xff]  ;;  %v1785_v58 = vld [vmem:[%s3490_s13 + $0x1e0] sm:$0xff] }
  0x62   : > { %vm1850_vm13 = vcmp.gt.f32.partialorder %v1786_v57, 0.5  ;;  %vm1849_vm14 = vcmp.gt.f32.partialorder %v1785_v58, 0.5  ;;  %v3350_v16 = vld [vmem:[%s3470_s5 + $0x140] ss:$12 sps:$4 sm:$0xff]   ;;  %v3356_v21 = vld [vmem:[%s3470_s5 + $0x184] ss:$12 sps:$4 sm:$0xff]  }
  0x63   : > { %v1913_v3 = vsel %vm1849_vm14, 1, %v3405_v1 }
  0x65   : > { %2035 = vperm.xlu1 %3249, %v1892_v62   ;;  %2032 = vperm.xlu0 %3248, %v1891_v63   ;;  %v1787_v62 = vld [vmem:[%s3490_s13 + $0x1f0] sm:$0xff] }
  0x66   : > { %1140 = vmatmul.mubr.bf16.gmra.mrb[12].mxu0 %v3289_v30  ;;  %1332 = vmatmul.mubr.bf16.gmra.mrb[12].mxu1 %v3290_v31  ;;  %v1901_v30 = vsel %vm1837_vm2, 1, %v3405_v1  ;;  %v3321_v31 = vld [vmem:[%s3470_s5 + $0xdc] ss:$12 sps:$4 sm:$0xff]   ;;  %vm1851_vm1 = vcmp.gt.f32.partialorder %v1787_v62, 0.5 }
  0x67   : > { %1147 = vmatprep.mubr.bf16.mxu0 %v3291_v32  ;;  %1339 = vmatprep.mubr.bf16.mxu1 %v3293_v35  ;;  %v3323_v32 = vld [vmem:[%s3470_s5 + $0x38] ss:$12 sps:$4 sm:$0xff]   ;;  %v1904_v35 = vsel %vm1840_vm3, 1, %v3405_v1  ;;  %v3334_v63 = vld [vmem:[%s3470_s5 + $0x108] ss:$12 sps:$4 sm:$0xff]  }
  0x69   : > { %2041 = vperm.xlu1 %3249, %v1894_v7   ;;  %2038 = vperm.xlu0 %3248, %v1893_v8   ;;  %v1915_v7 = vsel %vm1851_vm1, 1, %v3405_v1  ;;  %v3339_v8 = vld [vmem:[%s3470_s5 + $0x120] ss:$12 sps:$4 sm:$0xff]  }
  0x6d   : > { %2047 = vperm.xlu1 %3249, %v1896_v11   ;;  %2044 = vperm.xlu0 %3248, %v1895_v12   ;;  %v3343_v11 = vld [vmem:[%s3470_s5 + $0xf8] ss:$12 sps:$4 sm:$0xff]   ;;  %v3345_v12 = vld [vmem:[%s3470_s5 + $0x110] ss:$12 sps:$4 sm:$0xff]  }
  0x6e   : > { %1148 = vmatmul.mubr.bf16.gmra.mrb[16].mxu0 %v3295_v40  ;;  %1340 = vmatmul.mubr.bf16.gmra.mrb[16].mxu1 %v3296_v41  ;;  %v3325_v40 = vld [vmem:[%s3470_s5 + $0x50] ss:$12 sps:$4 sm:$0xff]   ;;  %v1906_v41 = vsel %vm1842_vm5, 1, %v3405_v1 }
  0x6f   : > { %1155 = vmatprep.mubr.bf16.mxu0 %v3298_v44  ;;  %1347 = vmatprep.mubr.bf16.mxu1 %v3300_v45  ;;  %v3328_v44 = vld [vmem:[%s3470_s5 + $0x68] ss:$12 sps:$4 sm:$0xff]  }
  0x70   : > { %v1782_v45 = vld [vmem:[%s3490_s13 + $0x1c8] sm:$0xff] }
  0x71   : > { %2053 = vperm.xlu1 %3249, %v1898_v19   ;;  %2050 = vperm.xlu0 %3248, %v1897_v20   ;;  %vm1846_vm9 = vcmp.gt.f32.partialorder %v1782_v45, 0.5  ;;  %v3354_v19 = vld [vmem:[%s3470_s5 + $0x168] ss:$12 sps:$4 sm:$0xff]   ;;  %v3355_v20 = vld [vmem:[%s3470_s5 + $0x170] ss:$12 sps:$4 sm:$0xff]  }
  0x72   : > { %v1910_v53 = vsel %vm1846_vm9, 1, %v3405_v1  ;;  %v3384_v45 = vld [vmem:[%s3470_s5 + $0x1f8] ss:$12 sps:$4 sm:$0xff]  }
  0x75   : > { %2059 = vperm.xlu1 %3249, %v1900_v23   ;;  %2056 = vperm.xlu0 %3248, %v1899_v24   ;;  %v3359_v23 = vld [vmem:[%s3470_s5 + $0x180] ss:$12 sps:$4 sm:$0xff]  }
  0x76   : > { %1156 = vmatmul.mubr.bf16.gmra.mrb[20].mxu0 %v3302_v54  ;;  %1348 = vmatmul.mubr.bf16.gmra.mrb[20].mxu1 %v3303_v55  ;;  %v1909_v54 = vsel %vm1845_vm10, 1, %v3405_v1  ;;  %v3331_v55 = vld [vmem:[%s3470_s5 + $0x10c] ss:$12 sps:$4 sm:$0xff]  }
  0x77   : > { %1163 = vmatprep.mubr.bf16.mxu0 %v3304_v56  ;;  %1355 = vmatprep.mubr.bf16.mxu1 %v3306_v59  ;;  %v3333_v56 = vld [vmem:[%s3470_s5 + $0x98] ss:$12 sps:$4 sm:$0xff]   ;;  %v1912_v59 = vsel %vm1848_vm11, 1, %v3405_v1  ;;  %v3360_v24 = vld [vmem:[%s3470_s5 + $0x1a0] ss:$12 sps:$4 sm:$0xff]  }
  0x79   : > { %2065 = vperm.xlu1 %3249, %v1902_v29   ;;  %2062 = vperm.xlu0 %3248, %v1901_v30   ;;  %v3366_v29 = vld [vmem:[%s3470_s5 + $0x1b4] ss:$12 sps:$4 sm:$0xff]  }
  0x7a   : > { %v3368_v30 = vld [vmem:[%s3470_s5 + $0x1e8] ss:$12 sps:$4 sm:$0xff]  }
  0x7d   : > { %2071 = vperm.xlu1 %3249, %v1904_v35   ;;  %2068 = vperm.xlu0 %3248, %v1903_v36   ;;  %v3374_v35 = vld [vmem:[%s3470_s5 + $0x1c8] ss:$12 sps:$4 sm:$0xff]   ;;  %v3375_v36 = vld [vmem:[%s3470_s5 + $0x230] ss:$12 sps:$4 sm:$0xff]  }
  0x7e   : > { %1164 = vmatmul.mubr.bf16.gmra.mrb[24].mxu0 %v3308_v0  ;;  %1356 = vmatmul.mubr.bf16.gmra.mrb[24].mxu1 %v3309_v2  ;;  %v3335_v0 = vld [vmem:[%s3470_s5 + $0xb0] ss:$12 sps:$4 sm:$0xff]   ;;  %v1914_v2 = vsel %vm1850_vm13, 1, %v3405_v1 }
  0x7f   : > { %1171 = vmatprep.mubr.bf16.mxu0 %v3310_v5  ;;  %1363 = vmatprep.mubr.bf16.mxu1 %v3312_v6  ;;  %v3338_v5 = vld [vmem:[%s3470_s5 + $0xc8] ss:$12 sps:$4 sm:$0xff]   ;;  %v1916_v6 = vsel %vm1852_vm15, 1, %v3405_v1  ;;  %v3344_v1 = vld [vmem:[%s3470_s5 + $0x138] ss:$12 sps:$4 sm:$0xff]  }
  0x81   : > { %2077 = vperm.xlu1 %3249, %v1906_v41   ;;  %2074 = vperm.xlu0 %3248, %v1905_v42   ;;  %v3381_v41 = vld [vmem:[%s3470_s5 + $0x1fc] ss:$12 sps:$4 sm:$0xff]   ;;  %v3383_v42 = vld [vmem:[%s3470_s5 + $0x278] ss:$12 sps:$4 sm:$0xff]  }
  0x85   : > { %2083 = vperm.xlu1 %3249, %v1908_v47   ;;  %2080 = vperm.xlu0 %3248, %v1907_v48   ;;  %v3386_v47 = vld [vmem:[%s3470_s5 + $0x214] ss:$12 sps:$4 sm:$0xff]  }
  0x86   : > { %1172 = vmatmul.mubr.bf16.gmra.mrb[28].mxu0 %v3314_v14  ;;  %1364 = vmatmul.mubr.bf16.gmra.mrb[28].mxu1 %v3315_v15  ;;  %v3348_v14 = vld [vmem:[%s3470_s5 + $0x128] ss:$12 sps:$4 sm:$0xff]   ;;  %v3349_v15 = vld [vmem:[%s3470_s5 + $0x150] ss:$12 sps:$4 sm:$0xff]  }
  0x87   : > { %1179 = vmatprep.mubr.bf16.mxu0 %v3316_v17  ;;  %3142 = vmatprep.mubr.msk.bf16.mxu1 %vm986_vm0, %v3318_v18  ;;  %v3351_v17 = vld [vmem:[%s3470_s5 + $0x16c] ss:$12 sps:$4 sm:$0xff]   ;;  %v3388_v48 = vld [vmem:[%s3470_s5 + $0x2a8] ss:$12 sps:$4 sm:$0xff]  }
  0x88   : > { %v3353_v18 = vld [vmem:[%s3470_s5 + $0x158] ss:$12 sps:$4 sm:$0xff]  }
  0x89   : > { %2089 = vperm.xlu1 %3249, %v1910_v53   ;;  %2086 = vperm.xlu0 %3248, %v1909_v54   ;;  %v3391_v53 = vld [vmem:[%s3470_s5 + $0x22c] ss:$12 sps:$4 sm:$0xff]  }
  0x8a   : > { %v3393_v54 = vld [vmem:[%s3470_s5 + $0x2d8] ss:$12 sps:$4 sm:$0xff]  }
  0x8d   : > { %2095 = vperm.xlu1 %3249, %v1912_v59   ;;  %2092 = vperm.xlu0 %3248, %v1911_v60   ;;  %v3394_v59 = vld [vmem:[%s3470_s5 + $0x228] ss:$12 sps:$4 sm:$0xff]   ;;  %v3395_v60 = vld [vmem:[%s3470_s5 + $0x2f0] ss:$12 sps:$4 sm:$0xff]  }
  0x8e   : > { %1180 = vmatmul.mubr.bf16.gmra.mrb[32].mxu0 %v3319_v27  ;;  %3143 = vmatmul.mubr.msk.bf16.vlgmr.msra.gmra.mrb[32].mxu1 %vm986_vm0, %v3320_v28  ;;  %v3364_v27 = vld [vmem:[%s3470_s5 + $0x198] ss:$12 sps:$4 sm:$0xff]   ;;  %v3365_v28 = vld [vmem:[%s3470_s5 + $0x1d0] ss:$12 sps:$4 sm:$0xff]  }
  0x8f   : > { %1187 = vmatprep.mubr.bf16.mxu0 %v3321_v31  ;;  %3146 = vmatprep.mubr.msk.bf16.mxu1 %vm986_vm0, %v3323_v32  ;;  %v3369_v31 = vld [vmem:[%s3470_s5 + $0x1b0] ss:$12 sps:$4 sm:$0xff]   ;;  %v3370_v32 = vld [vmem:[%s3470_s5 + $0x200] ss:$12 sps:$4 sm:$0xff]  }
  0x91   : > { %2101 = vperm.xlu1 %3249, %v1914_v2   ;;  %2098 = vperm.xlu0 %3248, %v1913_v3  }
  0x95   : > { %2107 = vperm.xlu1 %3249, %v1916_v6   ;;  %2104 = vperm.xlu0 %3248, %v1915_v7  }
  0x96   : > { %1188 = vmatmul.mubr.bf16.gmra.mrb[36].mxu0 %v3324_v39  ;;  %3147 = vmatmul.mubr.msk.bf16.gmra.mrb[36].mxu1 %vm986_vm0, %v3325_v40  ;;  %v3379_v39 = vld [vmem:[%s3470_s5 + $0x1e0] ss:$12 sps:$4 sm:$0xff]  }
  0x97   : > { %1195 = vmatprep.mubr.bf16.mxu0 %v3326_v43  ;;  %3150 = vmatprep.mubr.msk.bf16.mxu1 %vm986_vm0, %v3328_v44  ;;  %v3380_v40 = vld [vmem:[%s3470_s5 + $0x260] ss:$12 sps:$4 sm:$0xff]   ;;  %v3782_v43 = vpop.permute.xlu1 %1924 }
  0x98   : > { %v3784_v44 = vpop.permute.xlu0 %1918 }
  0x99   : > { %vm2109_vm2 = vcmp.eq.s32.totalorder %v3784_v44, 1 }
  0x9b   : > { %v3790_v49 = vpop.permute.xlu1 %1927 }
  0x9c   : > { %v3792_v50 = vpop.permute.xlu0 %1921  ;;  %vm2112_vm3 = vcmp.eq.s32.totalorder %v3790_v49, 1 }
  0x9d   : > { %vm2110_vm4 = vcmp.eq.s32.totalorder %v3792_v50, 1 }
  0x9e   : > { %1196 = vmatmul.mubr.bf16.gmra.mrb[40].mxu0 %v3329_v51  ;;  %3151 = vmatmul.mubr.msk.bf16.gmra.mrb[40].mxu1 %vm986_vm0, %v3330_v52  ;;  %v3389_v51 = vld [vmem:[%s3470_s5 + $0x210] ss:$12 sps:$4 sm:$0xff]   ;;  %v3390_v52 = vld [vmem:[%s3470_s5 + $0x2c0] ss:$12 sps:$4 sm:$0xff]  }
  0x9f   : > { %1203 = vmatprep.mubr.bf16.mxu0 %v3331_v55  ;;  %3154 = vmatprep.mubr.msk.bf16.mxu1 %vm986_vm0, %v3333_v56  ;;  %v3800_v55 = vpop.permute.xlu1 %1933 }
  0xa0   : > { %v3802_v56 = vpop.permute.xlu0 %1930  ;;  %vm2114_vm5 = vcmp.eq.s32.totalorder %v3800_v55, 1 }
  0xa1   : > { %vm2113_vm8 = vcmp.eq.s32.totalorder %v3802_v56, 1 }
  0xa3   : > { %v3806_v57 = vpop.permute.xlu1 %1939 }
  0xa4   : > { %v3808_v58 = vpop.permute.xlu0 %1936  ;;  %vm2116_vm6 = vcmp.eq.s32.totalorder %v3806_v57, 1 }
  0xa5   : > { %vm2115_vm7 = vcmp.eq.s32.totalorder %v3808_v58, 1 }
  0xa6   : > { %1204 = vmatmul.mubr.bf16.gmra.mrb[44].mxu0 %v3334_v63  ;;  %3155 = vmatmul.mubr.msk.bf16.gmra.mrb[44].mxu1 %vm986_vm0, %v3335_v0 }
  0xa7   : > { %1211 = vmatprep.mubr.bf16.mxu0 %v3336_v4  ;;  %3158 = vmatprep.mubr.msk.bf16.mxu1 %vm986_vm0, %v3338_v5  ;;  %v3813_v61 = vpop.permute.xlu1 %1945 }
  0xa8   : > { %v3815_v62 = vpop.permute.xlu0 %1942  ;;  %vm2118_vm9 = vcmp.eq.s32.totalorder %v3813_v61, 1 }
  0xa9   : > { %vm2117_vm12 = vcmp.eq.s32.totalorder %v3815_v62, 1 }
  0xab   : > { %v3817_v63 = vpop.permute.xlu1 %1951 }
  0xac   : > { %v3819_v0 = vpop.permute.xlu0 %1948  ;;  %vm2120_vm10 = vcmp.eq.s32.totalorder %v3817_v63, 1 }
  0xad   : > { %vm2119_vm11 = vcmp.eq.s32.totalorder %v3819_v0, 1 }
  0xae   : > { %1212 = vmatmul.mubr.bf16.gmra.mrb[48].mxu0 %v3339_v8  ;;  %3159 = vmatmul.mubr.msk.bf16.gmra.mrb[48].mxu1 %vm986_vm0, %v3340_v9 }
  0xaf   : > { %1219 = vmatprep.mubr.bf16.mxu0 %v3341_v10  ;;  %3162 = vmatprep.mubr.msk.bf16.mxu1 %vm986_vm0, %v3343_v11  ;;  %v3821_v2 = vpop.permute.xlu1 %1957 }
  0xb0   : > { %v3823_v3 = vpop.permute.xlu0 %1954  ;;  %vm2122_vm13 = vcmp.eq.s32.totalorder %v3821_v2, 1 }
  0xb1   : > { %vm2121_vm1 = vcmp.eq.s32.totalorder %v3823_v3, 1 }
  0xb3   : > { %v3825_v4 = vpop.permute.xlu1 %1963 }
  0xb4   : > { %v3827_v5 = vpop.permute.xlu0 %1960  ;;  %vm2124_vm14 = vcmp.eq.s32.totalorder %v3825_v4, 1 }
  0xb5   : > { %vm2123_vm15 = vcmp.eq.s32.totalorder %v3827_v5, 1 }
  0xb6   : > { %1220 = vmatmul.mubr.bf16.gmra.mrb[52].mxu0 %v3344_v1  ;;  %3163 = vmatmul.mubr.msk.bf16.gmra.mrb[52].mxu1 %vm986_vm0, %v3345_v12 }
  0xb7   : > { %1227 = vmatprep.mubr.bf16.mxu0 %v3346_v13  ;;  %3166 = vmatprep.mubr.msk.bf16.mxu1 %vm986_vm0, %v3348_v14  ;;  %v3829_v6 = vpop.permute.xlu1 %1969 }
  0xb8   : > { %v3831_v7 = vpop.permute.xlu0 %1966 }
  0xbe   : > { %1228 = vmatmul.mubr.bf16.gmra.mrb[56].mxu0 %v3349_v15  ;;  %3167 = vmatmul.mubr.msk.bf16.gmra.mrb[56].mxu1 %vm986_vm0, %v3350_v16  ;;  %v3841_v15 = vpop.permute.xlu1 %1975  ;;  %v3843_v16 = vpop.permute.xlu0 %1972 }
  0xbf   : > { %1235 = vmatprep.mubr.bf16.mxu0 %v3351_v17  ;;  %3170 = vmatprep.mubr.msk.bf16.mxu1 %vm986_vm0, %v3353_v18 }
  0xc6   : > { %1236 = vmatmul.mubr.bf16.gmra.mrb[60].mxu0 %v3354_v19  ;;  %3171 = vmatmul.mubr.msk.bf16.gmra.mrb[60].mxu1 %vm986_vm0, %v3355_v20 }
  0xc7   : > { %1243 = vmatprep.mubr.bf16.mxu0 %v3356_v21  ;;  %3174 = vmatprep.mubr.msk.bf16.mxu1 %vm986_vm0, %v3358_v22 }
  0xce   : > { %1244 = vmatmul.mubr.bf16.gmra.mrb[64].mxu0 %v3359_v23  ;;  %3175 = vmatmul.mubr.msk.bf16.gmra.mrb[64].mxu1 %vm986_vm0, %v3360_v24 }
  0xcf   : > { %1251 = vmatprep.mubr.bf16.mxu0 %v3361_v25  ;;  %3178 = vmatprep.mubr.msk.bf16.mxu1 %vm986_vm0, %v3363_v26  ;;  %v3853_v25 = vpop.permute.xlu1 %1981  ;;  %v3855_v26 = vpop.permute.xlu0 %1978 }
  0xd6   : > { %1252 = vmatmul.mubr.bf16.gmra.mrb[68].mxu0 %v3364_v27  ;;  %3179 = vmatmul.mubr.msk.bf16.gmra.mrb[68].mxu1 %vm986_vm0, %v3365_v28 }
  0xd7   : > { %1259 = vmatprep.mubr.bf16.mxu0 %v3366_v29  ;;  %3182 = vmatprep.mubr.msk.bf16.mxu1 %vm986_vm0, %v3368_v30 }
  0xde   : > { %1260 = vmatmul.mubr.bf16.gmra.mrb[72].mxu0 %v3369_v31  ;;  %3183 = vmatmul.mubr.msk.bf16.gmra.mrb[72].mxu1 %vm986_vm0, %v3370_v32 }
  0xdf   : > { %1267 = vmatprep.mubr.bf16.mxu0 %v3371_v33  ;;  %3186 = vmatprep.mubr.msk.bf16.mxu1 %vm986_vm0, %v3373_v34 }
  0xe6   : > { %1268 = vmatmul.mubr.bf16.gmra.mrb[76].mxu0 %v3374_v35  ;;  %3187 = vmatmul.mubr.msk.bf16.gmra.mrb[76].mxu1 %vm986_vm0, %v3375_v36  ;;  %v3865_v35 = vpop.permute.xlu1 %1987  ;;  %v3867_v36 = vpop.permute.xlu0 %1984 }
  0xe7   : > { %1275 = vmatprep.mubr.bf16.mxu0 %v3376_v37  ;;  %3190 = vmatprep.mubr.msk.bf16.mxu1 %vm986_vm0, %v3378_v38 }
  0xee   : > { %1276 = vmatmul.mubr.bf16.gmra.mrb[80].mxu0 %v3379_v39  ;;  %3191 = vmatmul.mubr.msk.bf16.gmra.mrb[80].mxu1 %vm986_vm0, %v3380_v40 }
  0xef   : > { %1283 = vmatprep.mubr.bf16.mxu0 %v3381_v41  ;;  %3194 = vmatprep.mubr.msk.bf16.mxu1 %vm986_vm0, %v3383_v42 }
  0xf6   : > { %1284 = vmatmul.mubr.bf16.gmra.mrb[84].mxu0 %v3384_v45  ;;  %3195 = vmatmul.mubr.msk.bf16.gmra.mrb[84].mxu1 %vm986_vm0, %v3385_v46 }
  0xf7   : > { %1291 = vmatprep.mubr.bf16.mxu0 %v3386_v47  ;;  %3198 = vmatprep.mubr.msk.bf16.mxu1 %vm986_vm0, %v3388_v48  ;;  %v3877_v47 = vpop.permute.xlu1 %1993  ;;  %v3879_v48 = vpop.permute.xlu0 %1990 }
  0xfe   : > { %1292 = vmatmul.mubr.bf16.gmra.mrb[88].mxu0 %v3389_v51  ;;  %3199 = vmatmul.mubr.msk.bf16.gmra.mrb[88].mxu1 %vm986_vm0, %v3390_v52 }
  0xff   : > { %1299 = vmatprep.mubr.bf16.mxu0 %v3391_v53  ;;  %3202 = vmatprep.mubr.msk.bf16.mxu1 %vm986_vm0, %v3393_v54 }
 0x106   : > { %1300 = vmatmul.mubr.bf16.gmra.mrb[92].mxu0 %v3394_v59  ;;  %3203 = vmatmul.mubr.msk.bf16.gmra.mrb[92].mxu1 %vm986_vm0, %v3395_v60  ;;  %vm2111_vm0 = vcmp.eq.s32.totalorder %v3782_v43, 1 }
 0x121   : > { %v3833_v8 = vpop.f32.mrb[0].mxu0  ;;  %v3835_v9 = vpop.f32.mrb[0].mxu1 }
 0x122   : > { %4264 = vst [vmem:[#allocation2_spill] sm:$0xff] %v3835_v9  ;;  %v1119_v10 = vpop.f32.mrb[1].mxu0  ;;  %v1311_v11 = vpop.f32.mrb[1].mxu1 }
 0x123   : > { %v3837_v1 = vpop.f32.mrb[2].mxu0  ;;  %v3839_v12 = vpop.f32.mrb[2].mxu1 }
 0x124   : > { %4265 = vst [vmem:[#allocation3_spill] sm:$0xff] %v3839_v12  ;;  %v1122_v13 = vpop.f32.mrb[3].mxu0  ;;  %v1314_v14 = vpop.f32.mrb[3].mxu1 }
 0x125   : > { %v3889_v13 = vpop.permute.xlu1 %1999  ;;  %v3891_v14 = vpop.permute.xlu0 %1996 }
 0x129   : > { %v3845_v17 = vpop.f32.mrb[4].mxu0  ;;  %v3847_v18 = vpop.f32.mrb[4].mxu1 }
 0x12a   : > { %4266 = vst [vmem:[#allocation4_spill] sm:$0xff] %v3847_v18  ;;  %v1127_v19 = vpop.f32.mrb[5].mxu0  ;;  %v1319_v20 = vpop.f32.mrb[5].mxu1 }
 0x12b   : > { %v3849_v21 = vpop.f32.mrb[6].mxu0  ;;  %v3851_v22 = vpop.f32.mrb[6].mxu1 }
 0x12c   : > { %4267 = vst [vmem:[#allocation5_spill] sm:$0xff] %v3851_v22  ;;  %v1130_v23 = vpop.f32.mrb[7].mxu0  ;;  %v1322_v24 = vpop.f32.mrb[7].mxu1 }
 0x131   : > { %v3857_v27 = vpop.f32.mrb[8].mxu0  ;;  %v3859_v28 = vpop.f32.mrb[8].mxu1 }
 0x132   : > { %4268 = vst [vmem:[#allocation6_spill] sm:$0xff] %v3859_v28  ;;  %v1135_v29 = vpop.f32.mrb[9].mxu0  ;;  %v1327_v30 = vpop.f32.mrb[9].mxu1 }
 0x133   : > { %v3861_v31 = vpop.f32.mrb[10].mxu0  ;;  %v3863_v32 = vpop.f32.mrb[10].mxu1 }
 0x134   : > { %4269 = vst [vmem:[#allocation7_spill] sm:$0xff] %v3863_v32  ;;  %v1138_v33 = vpop.f32.mrb[11].mxu0  ;;  %v1330_v34 = vpop.f32.mrb[11].mxu1 }
 0x139   : > { %v3869_v37 = vpop.f32.mrb[12].mxu0  ;;  %v3871_v38 = vpop.f32.mrb[12].mxu1 }
 0x13a   : > { %4270 = vst [vmem:[#allocation8_spill] sm:$0xff] %v3871_v38  ;;  %v1143_v39 = vpop.f32.mrb[13].mxu0  ;;  %v1335_v40 = vpop.f32.mrb[13].mxu1 }
 0x13b   : > { %v3873_v41 = vpop.f32.mrb[14].mxu0  ;;  %v3875_v42 = vpop.f32.mrb[14].mxu1 }
 0x13c   : > { %4271 = vst [vmem:[#allocation9_spill] sm:$0xff] %v3875_v42  ;;  %v1146_v45 = vpop.f32.mrb[15].mxu0  ;;  %v1338_v46 = vpop.f32.mrb[15].mxu1 }
 0x13d   : > { %v3901_v39 = vpop.permute.xlu1 %2005  ;;  %v3903_v40 = vpop.permute.xlu0 %2002 }
 0x141   : > { %v3881_v51 = vpop.f32.mrb[16].mxu0  ;;  %v3883_v52 = vpop.f32.mrb[16].mxu1 }
 0x142   : > { %4272 = vst [vmem:[#allocation10_spill] sm:$0xff] %v3883_v52  ;;  %v1151_v53 = vpop.f32.mrb[17].mxu0  ;;  %v1343_v54 = vpop.f32.mrb[17].mxu1 }
 0x143   : > { %v3885_v59 = vpop.f32.mrb[18].mxu0  ;;  %v3887_v60 = vpop.f32.mrb[18].mxu1 }
 0x144   : > { %4273 = vst [vmem:[#allocation11_spill] sm:$0xff] %v3887_v60  ;;  %v1154_v10 = vpop.f32.mrb[19].mxu0  ;;  %v1346_v11 = vpop.f32.mrb[19].mxu1 }
 0x145   : > { %v3913_v60 = vpop.permute.xlu1 %2011 }
 0x149   : > { %v3893_v19 = vpop.f32.mrb[20].mxu0  ;;  %v3895_v20 = vpop.f32.mrb[20].mxu1 }
 0x14a   : > { %4274 = vst [vmem:[#allocation12_spill] sm:$0xff] %v3895_v20  ;;  %v1159_v23 = vpop.f32.mrb[21].mxu0  ;;  %v1351_v24 = vpop.f32.mrb[21].mxu1 }
 0x14b   : > { %v3897_v29 = vpop.f32.mrb[22].mxu0  ;;  %v3899_v30 = vpop.f32.mrb[22].mxu1 }
 0x14c   : > { %4275 = vst [vmem:[#allocation13_spill] sm:$0xff] %v3899_v30  ;;  %v1162_v33 = vpop.f32.mrb[23].mxu0  ;;  %v1354_v34 = vpop.f32.mrb[23].mxu1 }
 0x14d   : > { %v3915_v33 = vpop.permute.xlu0 %2008 }
 0x14e   : > { %4278 = vst [vmem:[#allocation16_spill] sm:$0xff] %v3915_v33 }
 0x151   : > { %v3905_v45 = vpop.f32.mrb[24].mxu0  ;;  %v3907_v46 = vpop.f32.mrb[24].mxu1 }
 0x152   : > { %4276 = vst [vmem:[#allocation14_spill] sm:$0xff] %v3907_v46  ;;  %v1167_v53 = vpop.f32.mrb[25].mxu0  ;;  %v1359_v54 = vpop.f32.mrb[25].mxu1 }
 0x153   : > { %v3909_v10 = vpop.f32.mrb[26].mxu0  ;;  %v3911_v11 = vpop.f32.mrb[26].mxu1 }
 0x154   : > { %4277 = vst [vmem:[#allocation15_spill] sm:$0xff] %v3911_v11  ;;  %v1170_v23 = vpop.f32.mrb[27].mxu0  ;;  %v1362_v24 = vpop.f32.mrb[27].mxu1 }
 0x155   : > { %v3928_v23 = vld [vmem:[%s4261_s2] ss:$0 sm:$0xff]  ;;  %v3930_v24 = vpop.permute.xlu1 %2017  ;;  %v3932_v11 = vpop.permute.xlu0 %2014 }
 0x156   : > { %4281 = vst [vmem:[#allocation19_spill] sm:$0xff] %v3930_v24  ;;  %4282 = vst [vmem:[#allocation20_spill] sm:$0xff] %v3932_v11  ;;  %v1121_v28 = vadd.f32 %v3928_v23, %v3837_v1  ;;  %v1134_v44 = vadd.f32 %v3928_v23, %v3857_v27  ;;  %v1150_v55 = vadd.f32 %v3928_v23, %v3881_v51 }
 0x157   : > { %v1166_v61 = vadd.f32 %v3928_v23, %v3905_v45 }
 0x159   : > { %v3917_v34 = vpop.f32.mrb[28].mxu0  ;;  %v3919_v30 = vpop.f32.mrb[28].mxu1 }
 0x15a   : > { %4279 = vst [vmem:[#allocation17_spill] sm:$0xff] %v3919_v30  ;;  %v1175_v20 = vpop.f32.mrb[29].mxu0  ;;  %v1367_v52 = vpop.f32.mrb[29].mxu1  ;;  %v1126_v30 = vadd.f32 %v3928_v23, %v3845_v17 }
 0x15b   : > { %v3921_v32 = vpop.f32.mrb[30].mxu0  ;;  %v3923_v53 = vpop.f32.mrb[30].mxu1  ;;  %v1118_v52 = vadd.f32 %v3928_v23, %v3833_v8 }
 0x15c   : > { %4280 = vst [vmem:[#allocation18_spill] sm:$0xff] %v3923_v53  ;;  %v1178_v54 = vpop.f32.mrb[31].mxu0  ;;  %v1370_v46 = vpop.f32.mrb[31].mxu1  ;;  %v1177_v62 = vadd.f32 %v3928_v23, %v3921_v32 }
 0x15d   : > { %v1129_v46 = vadd.f32 %v3928_v23, %v3849_v21  ;;  %v3951_v1 = vpop.permute.xlu1 %2023 }
 0x161   : > { %v3938_v20 = vpop.f32.mrb[32].mxu0  ;;  %v3144_v54 = vpop.f32.mrb[32].mxu1 }
 0x162   : > { %v1415_v53 = vadd.f32 %v3144_v54, %v1126_v30  ;;  %v1183_v42 = vpop.f32.mrb[33].mxu0  ;;  %v1406_v38 = vpop.f32.mrb[33].mxu1  ;;  %v1142_v30 = vadd.f32 %v3928_v23, %v3869_v37  ;;  %v1137_v54 = vadd.f32 %v3928_v23, %v3861_v31  ;;  %v1182_v2 = vadd.f32 %v3928_v23, %v3938_v20 }
 0x163   : > { %v1407_v12 = vadd.f32 %v1406_v38, %v1118_v52  ;;  %v3944_v22 = vpop.f32.mrb[34].mxu0  ;;  %v3145_v17 = vpop.f32.mrb[34].mxu1 }
 0x164   : > { %v1663_v9 = vmax.f32 %v1415_v53, 0.0  ;;  %v1418_v18 = vadd.f32 %v3145_v17, %v1129_v46  ;;  %v1186_v8 = vpop.f32.mrb[35].mxu0  ;;  %v1409_v11 = vpop.f32.mrb[35].mxu1 }
 0x165   : > { %v1661_v24 = vmax.f32 %v1407_v12, 0.0  ;;  %v1410_v33 = vadd.f32 %v1409_v11, %v1121_v28  ;;  %v3953_v38 = vpop.permute.xlu0 %2020 }
 0x166   : > { %v1664_v21 = vmax.f32 %v1418_v18, 0.0  ;;  %v2175_v53 = vsel %vm2111_vm0, %v1663_v9, 0.0  ;;  %v1145_v9 = vadd.f32 %v3928_v23, %v3873_v41  ;;  %vm2126_vm0 = vcmp.eq.s32.totalorder %v3829_v6, 1 }
 0x167   : > { %v1662_v42 = vmax.f32 %v1410_v33, 0.0  ;;  %v2173_v49 = vsel %vm2109_vm2, %v1661_v24, 0.0  ;;  %vm2128_vm2 = vcmp.eq.s32.totalorder %v3841_v15, 1 }
 0x168   : > { %v2176_v43 = vsel %vm2112_vm3, %v1664_v21, 0.0  ;;  %vm2127_vm3 = vcmp.eq.s32.totalorder %v3843_v16, 1 }
 0x169   : > { %v2921_v50 = vpack.c.bf16 %v2176_v43, %v2175_v53  ;;  %v2174_v12 = vsel %vm2110_vm4, %v1662_v42, 0.0  ;;  %v3964_v18 = vpop.f32.mrb[36].mxu0  ;;  %v3148_v28 = vpop.f32.mrb[36].mxu1  ;;  %vm2125_vm4 = vcmp.eq.s32.totalorder %v3831_v7, 1 }
 0x16a   : > { %v2916_v37 = vpack.c.bf16 %v2174_v12, %v2173_v49  ;;  %v1431_v11 = vadd.f32 %v3148_v28, %v1142_v30  ;;  %v1191_v33 = vpop.f32.mrb[37].mxu0  ;;  %v1422_v52 = vpop.f32.mrb[37].mxu1  ;;  %v1158_v49 = vadd.f32 %v3928_v23, %v3893_v19  ;;  %v1153_v19 = vadd.f32 %v3928_v23, %v3885_v59 }
 0x16b   : > { %3073 = vst [vmem:[%s3960_s19 + $0x8] sm:$0xff] %v2921_v50   ;;  %v1423_v46 = vadd.f32 %v1422_v52, %v1134_v44  ;;  %v3971_v27 = vpop.f32.mrb[38].mxu0  ;;  %v3149_v24 = vpop.f32.mrb[38].mxu1 }
 0x16c   : > { %2917 = vst [vmem:[%s3960_s19] sm:$0xff] %v2916_v37   ;;  %v1667_v17 = vmax.f32 %v1431_v11, 0.0  ;;  %v1434_v8 = vadd.f32 %v3149_v24, %v1145_v9  ;;  %v1194_v21 = vpop.f32.mrb[39].mxu0  ;;  %v1425_v42 = vpop.f32.mrb[39].mxu1  ;;  %v1161_v37 = vadd.f32 %v3928_v23, %v3897_v29 }
 0x16d   : > { %v1665_v53 = vmax.f32 %v1423_v46, 0.0  ;;  %v1426_v43 = vadd.f32 %v1425_v42, %v1137_v54  ;;  %v3978_v30 = vpop.permute.xlu1 %2029  ;;  %v3980_v44 = vpop.permute.xlu0 %2026 }
 0x16e   : > { %v1668_v41 = vmax.f32 %v1434_v8, 0.0  ;;  %v2179_v50 = vsel %vm2115_vm7, %v1667_v17, 0.0  ;;  %vm2131_vm7 = vcmp.eq.s32.totalorder %v3867_v36, 1 }
 0x16f   : > { %v1666_v31 = vmax.f32 %v1426_v43, 0.0  ;;  %v2177_v57 = vsel %vm2113_vm8, %v1665_v53, 0.0  ;;  %vm2129_vm8 = vcmp.eq.s32.totalorder %v3855_v26, 1 }
 0x170   : > { %v2180_v12 = vsel %vm2116_vm6, %v1668_v41, 0.0  ;;  %vm2132_vm6 = vcmp.eq.s32.totalorder %v3865_v35, 1 }
 0x171   : > { %v2931_v28 = vpack.c.bf16 %v2180_v12, %v2179_v50  ;;  %v2178_v58 = vsel %vm2114_vm5, %v1666_v31, 0.0  ;;  %v3986_v9 = vpop.f32.mrb[40].mxu0  ;;  %v3152_v56 = vpop.f32.mrb[40].mxu1  ;;  %vm2130_vm5 = vcmp.eq.s32.totalorder %v3853_v25, 1 }
 0x172   : > { %v2926_v11 = vpack.c.bf16 %v2178_v58, %v2177_v57  ;;  %v1447_v33 = vadd.f32 %v3152_v56, %v1158_v49  ;;  %v1199_v52 = vpop.f32.mrb[41].mxu0  ;;  %v1438_v54 = vpop.f32.mrb[41].mxu1  ;;  %v1174_v49 = vadd.f32 %v3928_v23, %v3917_v34  ;;  %v1169_v34 = vadd.f32 %v3928_v23, %v3909_v10 }
 0x173   : > { %3075 = vst [vmem:[%s3960_s19 + $0x18] sm:$0xff] %v2931_v28   ;;  %v1439_v46 = vadd.f32 %v1438_v54, %v1150_v55  ;;  %v3993_v51 = vpop.f32.mrb[42].mxu0  ;;  %v3153_v24 = vpop.f32.mrb[42].mxu1 }
 0x174   : > { %3074 = vst [vmem:[%s3960_s19 + $0x10] sm:$0xff] %v2926_v11   ;;  %v1671_v17 = vmax.f32 %v1447_v33, 0.0  ;;  %v1450_v8 = vadd.f32 %v3153_v24, %v1161_v37  ;;  %v1202_v21 = vpop.f32.mrb[43].mxu0  ;;  %v1441_v42 = vpop.f32.mrb[43].mxu1 }
 0x175   : > { %v1669_v53 = vmax.f32 %v1439_v46, 0.0  ;;  %v1442_v43 = vadd.f32 %v1441_v42, %v1153_v19  ;;  %v4000_v41 = vpop.permute.xlu1 %2035  ;;  %v4002_v31 = vpop.permute.xlu0 %2032 }
 0x176   : > { %v1672_v29 = vmax.f32 %v1450_v8, 0.0  ;;  %v2183_v50 = vsel %vm2119_vm11, %v1671_v17, 0.0  ;;  %vm2134_vm11 = vcmp.eq.s32.totalorder %v3877_v47, 1 }
 0x177   : > { %v1670_v59 = vmax.f32 %v1442_v43, 0.0  ;;  %v2181_v63 = vsel %vm2117_vm12, %v1669_v53, 0.0  ;;  %v1190_v53 = vadd.f32 %v3928_v23, %v3964_v18  ;;  %v1185_v18 = vadd.f32 %v3928_v23, %v3944_v22 }
 0x178   : > { %v2184_v12 = vsel %vm2120_vm10, %v1672_v29, 0.0  ;;  %vm2135_vm10 = vcmp.eq.s32.totalorder %v3891_v14, 1  ;;  %vm2133_vm12 = vcmp.eq.s32.totalorder %v3879_v48, 1 }
 0x179   : > { %v2941_v55 = vpack.c.bf16 %v2184_v12, %v2183_v50  ;;  %v2182_v0 = vsel %vm2118_vm9, %v1670_v59, 0.0  ;;  %v1205_v57 = vpop.f32.mrb[44].mxu0  ;;  %v3156_v28 = vpop.f32.mrb[44].mxu1  ;;  %v1193_v50 = vadd.f32 %v3928_v23, %v3971_v27  ;;  %vm2136_vm9 = vcmp.eq.s32.totalorder %v3889_v13, 1 }
 0x17a   : > { %v2936_v58 = vpack.c.bf16 %v2182_v0, %v2181_v63  ;;  %v1463_v56 = vadd.f32 %v3156_v28, %v1174_v49  ;;  %v1207_v37 = vpop.f32.mrb[45].mxu0  ;;  %v1454_v11 = vpop.f32.mrb[45].mxu1 }
 0x17b   : > { %3077 = vst [vmem:[%s3960_s19 + $0x28] sm:$0xff] %v2941_v55   ;;  %v1455_v33 = vadd.f32 %v1454_v11, %v1166_v61  ;;  %v1208_v52 = vpop.f32.mrb[46].mxu0  ;;  %v3157_v45 = vpop.f32.mrb[46].mxu1 }
 0x17c   : > { %3076 = vst [vmem:[%s3960_s19 + $0x20] sm:$0xff] %v2936_v58   ;;  %v1675_v54 = vmax.f32 %v1463_v56, 0.0  ;;  %v1466_v19 = vadd.f32 %v3157_v45, %v1177_v62  ;;  %v1210_v46 = vpop.f32.mrb[47].mxu0  ;;  %v1457_v24 = vpop.f32.mrb[47].mxu1  ;;  %v1209_v7 = vadd.f32 %v3928_v23, %v1208_v52 }
 0x17d   : > { %v1673_v17 = vmax.f32 %v1455_v33, 0.0  ;;  %v1458_v8 = vadd.f32 %v1457_v24, %v1169_v34  ;;  %v4018_v10 = vpop.permute.xlu1 %2041  ;;  %v4020_v42 = vpop.permute.xlu0 %2038  ;;  %v1198_v24 = vadd.f32 %v3928_v23, %v3986_v9 }
 0x17e   : > { %v1676_v21 = vmax.f32 %v1466_v19, 0.0  ;;  %v2187_v43 = vsel %vm2123_vm15, %v1675_v54, 0.0  ;;  %v1206_v54 = vadd.f32 %v3928_v23, %v1205_v57  ;;  %v1201_v57 = vadd.f32 %v3928_v23, %v3993_v51 }
 0x17f   : > { %v1674_v32 = vmax.f32 %v1458_v8, 0.0  ;;  %v2185_v4 = vsel %vm2121_vm1, %v1673_v17, 0.0  ;;  %vm2140_vm15 = vcmp.eq.s32.totalorder %v3913_v60, 1 }
 0x180   : > { %v2188_v29 = vsel %vm2124_vm14, %v1676_v21, 0.0  ;;  %vm2137_vm14 = vcmp.eq.s32.totalorder %v3903_v40, 1 }
 0x181   : > { %v2951_v59 = vpack.c.bf16 %v2188_v29, %v2187_v43  ;;  %v2186_v5 = vsel %vm2122_vm13, %v1674_v32, 0.0  ;;  %v4026_v49 = vpop.f32.mrb[48].mxu0  ;;  %v3160_v3 = vpop.f32.mrb[48].mxu1  ;;  %vm2138_vm13 = vcmp.eq.s32.totalorder %v3901_v39, 1 }
 0x182   : > { %v2946_v12 = vpack.c.bf16 %v2186_v5, %v2185_v4  ;;  %v1479_v61 = vadd.f32 %v3160_v3, %v1190_v53  ;;  %v1215_v63 = vpop.f32.mrb[49].mxu0  ;;  %v1470_v55 = vpop.f32.mrb[49].mxu1 }
 0x183   : > { %3079 = vst [vmem:[%s3960_s19 + $0x38] sm:$0xff] %v2951_v59   ;;  %v1471_v0 = vadd.f32 %v1470_v55, %v1182_v2  ;;  %v4033_v20 = vpop.f32.mrb[50].mxu0  ;;  %v3161_v28 = vpop.f32.mrb[50].mxu1 }
 0x184   : > { %3078 = vst [vmem:[%s3960_s19 + $0x30] sm:$0xff] %v2946_v12   ;;  %v1679_v62 = vmax.f32 %v1479_v61, 0.0  ;;  %v1482_v58 = vadd.f32 %v3161_v28, %v1193_v50  ;;  %v1218_v56 = vpop.f32.mrb[51].mxu0  ;;  %v1473_v37 = vpop.f32.mrb[51].mxu1  ;;  %v1214_v28 = vadd.f32 %v3928_v23, %v4026_v49 }
 0x185   : > { %v1677_v11 = vmax.f32 %v1471_v0, 0.0  ;;  %v1474_v34 = vadd.f32 %v1473_v37, %v1185_v18  ;;  %v4040_v33 = vpop.permute.xlu1 %2047  ;;  %v4042_v45 = vpop.permute.xlu0 %2044 }
 0x186   : > { %v1680_v27 = vmax.f32 %v1482_v58, 0.0  ;;  %v2191_v19 = vsel %vm2127_vm3, %v1679_v62, 0.0  ;;  %vm2144_vm3 = vcmp.eq.s32.totalorder %v3951_v1, 1 }
 0x187   : > { %v1678_v22 = vmax.f32 %v1474_v34, 0.0  ;;  %v2189_v6 = vsel %vm2125_vm4, %v1677_v11, 0.0  ;;  %vm2143_vm4 = vcmp.eq.s32.totalorder %v3953_v38, 1 }
 0x188   : > { %v2192_v46 = vsel %vm2128_vm2, %v1680_v27, 0.0  ;;  %v1217_v27 = vadd.f32 %v3928_v23, %v4033_v20 }
 0x189   : > { %v2961_v15 = vpack.c.bf16 %v2192_v46, %v2191_v19  ;;  %v2190_v17 = vsel %vm2126_vm0, %v1678_v22, 0.0  ;;  %v1221_v16 = vpop.f32.mrb[52].mxu0  ;;  %v3164_v8 = vpop.f32.mrb[52].mxu1 }
 0x18a   : > { %v2956_v21 = vpack.c.bf16 %v2190_v17, %v2189_v6  ;;  %v1495_v32 = vadd.f32 %v3164_v8, %v1206_v54  ;;  %v1223_v53 = vpop.f32.mrb[53].mxu0  ;;  %v1486_v43 = vpop.f32.mrb[53].mxu1  ;;  %v1222_v55 = vadd.f32 %v3928_v23, %v1221_v16 }
 0x18b   : > { %3081 = vst [vmem:[%s3960_s19 + $0x48] sm:$0xff] %v2961_v15   ;;  %v1487_v29 = vadd.f32 %v1486_v43, %v1198_v24  ;;  %v1224_v2 = vpop.f32.mrb[54].mxu0  ;;  %v3165_v4 = vpop.f32.mrb[54].mxu1 }
 0x18c   : > { %3080 = vst [vmem:[%s3960_s19 + $0x40] sm:$0xff] %v2956_v21   ;;  %v1683_v9 = vmax.f32 %v1495_v32, 0.0  ;;  %v1498_v59 = vadd.f32 %v3165_v4, %v1209_v7  ;;  %v1226_v5 = vpop.f32.mrb[55].mxu0  ;;  %v1489_v3 = vpop.f32.mrb[55].mxu1  ;;  %v1225_v26 = vadd.f32 %v3928_v23, %v1224_v2 }
 0x18d   : > { %v1681_v50 = vmax.f32 %v1487_v29, 0.0  ;;  %v1490_v12 = vadd.f32 %v1489_v3, %v1201_v57  ;;  %v4056_v51 = vpop.permute.xlu1 %2053  ;;  %v4058_v63 = vpop.permute.xlu0 %2050 }
 0x18e   : > { %v1684_v61 = vmax.f32 %v1498_v59, 0.0  ;;  %v2195_v18 = vsel %vm2131_vm7, %v1683_v9, 0.0  ;;  %vm2148_vm7 = vcmp.eq.s32.totalorder %v4000_v41, 1 }
 0x18f   : > { %v1682_v52 = vmax.f32 %v1490_v12, 0.0  ;;  %v2193_v25 = vsel %vm2129_vm8, %v1681_v50, 0.0  ;;  %vm2147_vm8 = vcmp.eq.s32.totalorder %v4002_v31, 1 }
 0x190   : > { %v2196_v0 = vsel %vm2132_vm6, %v1684_v61, 0.0  ;;  %vm2145_vm6 = vcmp.eq.s32.totalorder %v3980_v44, 1 }
 0x191   : > { %v2971_v35 = vpack.c.bf16 %v2196_v0, %v2195_v18  ;;  %v2194_v62 = vsel %vm2130_vm5, %v1682_v52, 0.0  ;;  %v1229_v36 = vpop.f32.mrb[56].mxu0  ;;  %v3168_v58 = vpop.f32.mrb[56].mxu1  ;;  %vm2146_vm5 = vcmp.eq.s32.totalorder %v3978_v30, 1 }
 0x192   : > { %v2966_v56 = vpack.c.bf16 %v2194_v62, %v2193_v25  ;;  %v1511_v37 = vadd.f32 %v3168_v58, %v1222_v55  ;;  %v1231_v11 = vpop.f32.mrb[57].mxu0  ;;  %v1502_v34 = vpop.f32.mrb[57].mxu1  ;;  %v1230_v53 = vadd.f32 %v3928_v23, %v1229_v36  ;;  %v4283_v58 = vld [vmem:[#allocation16_spill] sm:$0xff] }
 0x193   : > { %3083 = vst [vmem:[%s3960_s19 + $0x58] sm:$0xff] %v2971_v35   ;;  %v1503_v22 = vadd.f32 %v1502_v34, %v1214_v28  ;;  %v1232_v54 = vpop.f32.mrb[58].mxu0  ;;  %v3169_v19 = vpop.f32.mrb[58].mxu1  ;;  %vm2139_vm1 = vcmp.eq.s32.totalorder %v4283_v58, 1 }
 0x194   : > { %3082 = vst [vmem:[%s3960_s19 + $0x50] sm:$0xff] %v2966_v56   ;;  %v1687_v49 = vmax.f32 %v1511_v37, 0.0  ;;  %v1514_v46 = vadd.f32 %v3169_v19, %v1225_v26  ;;  %v1234_v24 = vpop.f32.mrb[59].mxu0  ;;  %v1505_v6 = vpop.f32.mrb[59].mxu1  ;;  %v1233_v9 = vadd.f32 %v3928_v23, %v1232_v54 }
 0x195   : > { %v1685_v15 = vmax.f32 %v1503_v22, 0.0  ;;  %v1506_v17 = vadd.f32 %v1505_v6, %v1217_v27  ;;  %v4072_v20 = vpop.permute.xlu1 %2059  ;;  %v4074_v7 = vpop.permute.xlu0 %2056 }
 0x196   : > { %v1688_v16 = vmax.f32 %v1514_v46, 0.0  ;;  %v2199_v21 = vsel %vm2135_vm10, %v1687_v49, 0.0  ;;  %vm2149_vm10 = vcmp.eq.s32.totalorder %v4020_v42, 1 }
 0x197   : > { %v1686_v8 = vmax.f32 %v1506_v17, 0.0  ;;  %v2197_v43 = vsel %vm2133_vm12, %v1685_v15, 0.0 }
 0x198   : > { %v2200_v32 = vsel %vm2136_vm9, %v1688_v16, 0.0  ;;  %vm2150_vm9 = vcmp.eq.s32.totalorder %v4018_v10, 1 }
 0x199   : > { %v2981_v57 = vpack.c.bf16 %v2200_v32, %v2199_v21  ;;  %v2198_v13 = vsel %vm2134_vm11, %v1686_v8, 0.0  ;;  %v1237_v29 = vpop.f32.mrb[60].mxu0  ;;  %v3172_v14 = vpop.f32.mrb[60].mxu1 }
 0x19a   : > { %v2976_v2 = vpack.c.bf16 %v2198_v13, %v2197_v43  ;;  %v1238_v47 = vadd.f32 %v3928_v23, %v1237_v29  ;;  %v1239_v4 = vpop.f32.mrb[61].mxu0  ;;  %v1518_v48 = vpop.f32.mrb[61].mxu1  ;;  %v4285_v43 = vld [vmem:[#allocation20_spill] sm:$0xff] }
 0x19b   : > { %3085 = vst [vmem:[%s3960_s19 + $0x68] sm:$0xff] %v2981_v57   ;;  %v1519_v59 = vadd.f32 %v1518_v48, %v1230_v53  ;;  %v1240_v5 = vpop.f32.mrb[62].mxu0  ;;  %v3173_v3 = vpop.f32.mrb[62].mxu1  ;;  %v4284_v53 = vld [vmem:[#allocation19_spill] sm:$0xff]  ;;  %vm2141_vm2 = vcmp.eq.s32.totalorder %v4285_v43, 1 }
 0x19c   : > { %3084 = vst [vmem:[%s3960_s19 + $0x60] sm:$0xff] %v2976_v2   ;;  %v1527_v50 = vadd.f32 %v3172_v14, %v1238_v47  ;;  %v1241_v12 = vadd.f32 %v3928_v23, %v1240_v5  ;;  %v1242_v61 = vpop.f32.mrb[63].mxu0  ;;  %v1521_v52 = vpop.f32.mrb[63].mxu1  ;;  %vm2142_vm0 = vcmp.eq.s32.totalorder %v4284_v53, 1 }
 0x19d   : > { %v1689_v55 = vmax.f32 %v1519_v59, 0.0  ;;  %v1522_v18 = vadd.f32 %v1521_v52, %v1233_v9  ;;  %v4084_v35 = vpop.permute.xlu1 %2065  ;;  %v4086_v62 = vpop.permute.xlu0 %2062 }
 0x19e   : > { %v1691_v0 = vmax.f32 %v1527_v50, 0.0  ;;  %v1530_v28 = vadd.f32 %v3173_v3, %v1241_v12  ;;  %vm2158_vm11 = vcmp.eq.s32.totalorder %v4084_v35, 1  ;;  %vm2157_vm12 = vcmp.eq.s32.totalorder %v4086_v62, 1 }
 0x19f   : > { %v1690_v25 = vmax.f32 %v1522_v18, 0.0  ;;  %v2201_v26 = vsel %vm2137_vm14, %v1689_v55, 0.0 }
 0x1a0   : > { %v1692_v36 = vmax.f32 %v1530_v28, 0.0  ;;  %v2203_v34 = vsel %vm2139_vm1, %v1691_v0, 0.0  ;;  %vm2151_vm1 = vcmp.eq.s32.totalorder %v4042_v45, 1 }
 0x1a1   : > { %v2202_v56 = vsel %vm2138_vm13, %v1690_v25, 0.0  ;;  %v1245_v37 = vpop.f32.mrb[64].mxu0  ;;  %v3176_v11 = vpop.f32.mrb[64].mxu1 }
 0x1a2   : > { %v2204_v27 = vsel %vm2140_vm15, %v1692_v36, 0.0  ;;  %v2986_v39 = vpack.c.bf16 %v2202_v56, %v2201_v26  ;;  %v1246_v40 = vadd.f32 %v3928_v23, %v1245_v37  ;;  %v1247_v22 = vpop.f32.mrb[65].mxu0  ;;  %v1534_v54 = vpop.f32.mrb[65].mxu1  ;;  %vm2152_vm15 = vcmp.eq.s32.totalorder %v4040_v33, 1 }
 0x1a3   : > { %v2991_v19 = vpack.c.bf16 %v2204_v27, %v2203_v34  ;;  %v1248_v49 = vpop.f32.mrb[66].mxu0  ;;  %v3177_v46 = vpop.f32.mrb[66].mxu1 }
 0x1a4   : > { %3086 = vst [vmem:[%s3960_s19 + $0x70] sm:$0xff] %v2986_v39   ;;  %v1535_v24 = vadd.f32 %v1534_v54, %v1246_v40  ;;  %v1249_v60 = vadd.f32 %v3928_v23, %v1248_v49  ;;  %v1250_v6 = vpop.f32.mrb[67].mxu0  ;;  %v1537_v15 = vpop.f32.mrb[67].mxu1 }
 0x1a5   : > { %3087 = vst [vmem:[%s3960_s19 + $0x78] sm:$0xff] %v2991_v19   ;;  %v4094_v8 = vpop.permute.xlu1 %2071  ;;  %v4096_v21 = vpop.permute.xlu0 %2068 }
 0x1a6   : > { %v1693_v17 = vmax.f32 %v1535_v24, 0.0  ;;  %v1538_v16 = vadd.f32 %v1537_v15, %v1249_v60  ;;  %vm2160_vm13 = vcmp.eq.s32.totalorder %v4094_v8, 1  ;;  %vm2159_vm14 = vcmp.eq.s32.totalorder %v4096_v21, 1 }
 0x1a8   : > { %v1694_v32 = vmax.f32 %v1538_v16, 0.0  ;;  %v2205_v29 = vsel %vm2141_vm2, %v1693_v17, 0.0 }
 0x1a9   : > { %v1253_v57 = vpop.f32.mrb[68].mxu0  ;;  %v3180_v13 = vpop.f32.mrb[68].mxu1 }
 0x1aa   : > { %v2206_v14 = vsel %vm2142_vm0, %v1694_v32, 0.0  ;;  %v1254_v2 = vadd.f32 %v3928_v23, %v1253_v57  ;;  %v1255_v47 = vpop.f32.mrb[69].mxu0  ;;  %v1550_v4 = vpop.f32.mrb[69].mxu1 }
 0x1ab   : > { %v2996_v48 = vpack.c.bf16 %v2206_v14, %v2205_v29  ;;  %v1256_v9 = vpop.f32.mrb[70].mxu0  ;;  %v3181_v59 = vpop.f32.mrb[70].mxu1 }
 0x1ac   : > { %v1543_v5 = vadd.f32 %v3176_v11, %v1254_v2  ;;  %v1257_v3 = vadd.f32 %v3928_v23, %v1256_v9  ;;  %v1258_v50 = vpop.f32.mrb[71].mxu0  ;;  %v1553_v12 = vpop.f32.mrb[71].mxu1 }
 0x1ad   : > { %3088 = vst [vmem:[%s3960_s19 + $0x80] sm:$0xff] %v2996_v48   ;;  %v4103_v55 = vpop.permute.xlu1 %2077  ;;  %v4105_v18 = vpop.permute.xlu0 %2074  ;;  %v4287_v50 = vld [vmem:[#allocation2_spill] sm:$0xff] }
 0x1ae   : > { %v1695_v61 = vmax.f32 %v1543_v5, 0.0  ;;  %v1546_v52 = vadd.f32 %v3177_v46, %v1257_v3  ;;  %vm2162_vm0 = vcmp.eq.s32.totalorder %v4103_v55, 1  ;;  %vm2161_vm2 = vcmp.eq.s32.totalorder %v4105_v18, 1  ;;  %v4297_v18 = vld [vmem:[#allocation11_spill] sm:$0xff] }
 0x1b0   : > { %v1696_v0 = vmax.f32 %v1546_v52, 0.0  ;;  %v2207_v36 = vsel %vm2143_vm4, %v1695_v61, 0.0 }
 0x1b1   : > { %v1261_v28 = vpop.f32.mrb[72].mxu0  ;;  %v4109_v25 = vpop.f32.mrb[72].mxu1 }
 0x1b2   : > { %v2208_v58 = vsel %vm2144_vm3, %v1696_v0, 0.0  ;;  %v1262_v26 = vadd.f32 %v3928_v23, %v1261_v28  ;;  %v1263_v56 = vpop.f32.mrb[73].mxu0  ;;  %v1566_v37 = vpop.f32.mrb[73].mxu1 }
 0x1b3   : > { %v3001_v11 = vpack.c.bf16 %v2208_v58, %v2207_v36  ;;  %v1264_v34 = vpop.f32.mrb[74].mxu0  ;;  %v4112_v27 = vpop.f32.mrb[74].mxu1  ;;  %v4289_v56 = vld [vmem:[#allocation3_spill] sm:$0xff] }
 0x1b4   : > { %v1551_v39 = vadd.f32 %v1550_v4, %v1262_v26  ;;  %v1265_v40 = vadd.f32 %v3928_v23, %v1264_v34  ;;  %v1266_v1 = vpop.f32.mrb[75].mxu0  ;;  %v1569_v22 = vpop.f32.mrb[75].mxu1  ;;  %v4286_v4 = vld [vmem:[#allocation4_spill] sm:$0xff] }
 0x1b5   : > { %3089 = vst [vmem:[%s3960_s19 + $0x88] sm:$0xff] %v3001_v11   ;;  %v4116_v19 = vpop.permute.xlu1 %2083  ;;  %v4118_v49 = vpop.permute.xlu0 %2080  ;;  %v1318_v48 = vadd.f32 %v3928_v23, %v4286_v4  ;;  %v1313_v11 = vadd.f32 %v3928_v23, %v4289_v56 }
 0x1b6   : > { %v1697_v38 = vmax.f32 %v1551_v39, 0.0  ;;  %v1554_v54 = vadd.f32 %v1553_v12, %v1265_v40  ;;  %v4288_v12 = vld [vmem:[#allocation5_spill] sm:$0xff]  ;;  %vm2164_vm3 = vcmp.eq.s32.totalorder %v4116_v19, 1  ;;  %vm2163_vm4 = vcmp.eq.s32.totalorder %v4118_v49, 1 }
 0x1b7   : > { %v1321_v61 = vadd.f32 %v3928_v23, %v4288_v12 }
 0x1b8   : > { %v1698_v46 = vmax.f32 %v1554_v54, 0.0  ;;  %v2209_v6 = vsel %vm2145_vm6, %v1697_v38, 0.0  ;;  %vm2153_vm6 = vcmp.eq.s32.totalorder %v4058_v63, 1 }
 0x1b9   : > { %v1269_v24 = vpop.f32.mrb[76].mxu0  ;;  %v4122_v60 = vpop.f32.mrb[76].mxu1 }
 0x1ba   : > { %v2210_v15 = vsel %vm2146_vm5, %v1698_v46, 0.0  ;;  %v1270_v17 = vadd.f32 %v3928_v23, %v1269_v24  ;;  %v1271_v16 = vpop.f32.mrb[77].mxu0  ;;  %v4125_v32 = vpop.f32.mrb[77].mxu1  ;;  %vm2154_vm5 = vcmp.eq.s32.totalorder %v4056_v51, 1 }
 0x1bb   : > { %v3006_v53 = vpack.c.bf16 %v2210_v15, %v2209_v6  ;;  %v1272_v43 = vpop.f32.mrb[78].mxu0  ;;  %v4127_v57 = vpop.f32.mrb[78].mxu1 }
 0x1bc   : > { %v1559_v29 = vadd.f32 %v3180_v13, %v1270_v17  ;;  %v1273_v30 = vadd.f32 %v3928_v23, %v1272_v43  ;;  %v1274_v14 = vpop.f32.mrb[79].mxu0  ;;  %v4130_v2 = vpop.f32.mrb[79].mxu1  ;;  %v1310_v13 = vadd.f32 %v3928_v23, %v4287_v50 }
 0x1bd   : > { %3090 = vst [vmem:[%s3960_s19 + $0x90] sm:$0xff] %v3006_v53   ;;  %v4136_v9 = vpop.permute.xlu1 %2089  ;;  %v4138_v5 = vpop.permute.xlu0 %2086 }
 0x1be   : > { %v1699_v44 = vmax.f32 %v1559_v29, 0.0  ;;  %v1562_v47 = vadd.f32 %v3181_v59, %v1273_v30  ;;  %v4290_v29 = vld [vmem:[#allocation6_spill] sm:$0xff]  ;;  %v4291_v30 = vld [vmem:[#allocation8_spill] sm:$0xff] }
 0x1bf   : > { %v1334_v14 = vadd.f32 %v3928_v23, %v4291_v30 }
 0x1c0   : > { %v1700_v3 = vmax.f32 %v1562_v47, 0.0  ;;  %v2211_v0 = vsel %vm2147_vm8, %v1699_v44, 0.0  ;;  %v4292_v47 = vld [vmem:[#allocation9_spill] sm:$0xff]  ;;  %vm2165_vm8 = vcmp.eq.s32.totalorder %v4138_v5, 1 }
 0x1c1   : > { %v1277_v59 = vpop.f32.mrb[80].mxu0  ;;  %v3192_v52 = vpop.f32.mrb[80].mxu1  ;;  %v1337_v4 = vadd.f32 %v3928_v23, %v4292_v47 }
 0x1c2   : > { %v2212_v28 = vsel %vm2148_vm7, %v1700_v3, 0.0  ;;  %v1278_v41 = vadd.f32 %v3928_v23, %v1277_v59  ;;  %v1607_v36 = vadd.f32 %v3192_v52, %v1318_v48  ;;  %v1279_v58 = vpop.f32.mrb[81].mxu0  ;;  %v1598_v26 = vpop.f32.mrb[81].mxu1  ;;  %vm2166_vm7 = vcmp.eq.s32.totalorder %v4136_v9, 1 }
 0x1c3   : > { %v3011_v34 = vpack.c.bf16 %v2212_v28, %v2211_v0  ;;  %v1599_v39 = vadd.f32 %v1598_v26, %v1310_v13  ;;  %v1280_v31 = vpop.f32.mrb[82].mxu0  ;;  %v3193_v40 = vpop.f32.mrb[82].mxu1  ;;  %v4293_v26 = vld [vmem:[#allocation7_spill] sm:$0xff] }
 0x1c4   : > { %v1567_v1 = vadd.f32 %v1566_v37, %v1278_v41  ;;  %v1711_v38 = vmax.f32 %v1607_v36, 0.0  ;;  %v1281_v54 = vadd.f32 %v3928_v23, %v1280_v31  ;;  %v1610_v46 = vadd.f32 %v3193_v40, %v1321_v61  ;;  %v1282_v24 = vpop.f32.mrb[83].mxu0  ;;  %v1601_v6 = vpop.f32.mrb[83].mxu1 }
 0x1c5   : > { %3091 = vst [vmem:[%s3960_s19 + $0x98] sm:$0xff] %v3011_v34   ;;  %v1709_v15 = vmax.f32 %v1599_v39, 0.0  ;;  %v1602_v17 = vadd.f32 %v1601_v6, %v1313_v11  ;;  %v1326_v37 = vadd.f32 %v3928_v23, %v4290_v29  ;;  %v4162_v48 = vpop.permute.xlu1 %2095  ;;  %v4164_v3 = vpop.permute.xlu0 %2092  ;;  %v1329_v62 = vadd.f32 %v3928_v23, %v4293_v26  ;;  %v4296_v29 = vld [vmem:[#allocation13_spill] sm:$0xff] }
 0x1c6   : > { %v1701_v16 = vmax.f32 %v1567_v1, 0.0  ;;  %v1570_v53 = vadd.f32 %v1569_v22, %v1281_v54  ;;  %v1712_v43 = vmax.f32 %v1610_v46, 0.0  ;;  %v2223_v8 = vsel %vm2159_vm14, %v1711_v38, 0.0 }
 0x1c7   : > { %v1710_v44 = vmax.f32 %v1602_v17, 0.0  ;;  %v2221_v21 = vsel %vm2157_vm12, %v1709_v15, 0.0 }
 0x1c8   : > { %v1702_v50 = vmax.f32 %v1570_v53, 0.0  ;;  %v2224_v22 = vsel %vm2160_vm13, %v1712_v43, 0.0  ;;  %v2213_v13 = vsel %vm2149_vm10, %v1701_v16, 0.0  ;;  %v4295_v16 = vld [vmem:[#allocation12_spill] sm:$0xff]  ;;  %vm2167_vm10 = vcmp.eq.s32.totalorder %v4164_v3, 1 }
 0x1c9   : > { %v3041_v12 = vpack.c.bf16 %v2224_v22, %v2223_v8  ;;  %v2222_v61 = vsel %vm2158_vm11, %v1710_v44, 0.0  ;;  %v1285_v59 = vpop.f32.mrb[84].mxu0  ;;  %v3196_v52 = vpop.f32.mrb[84].mxu1  ;;  %v1350_v53 = vadd.f32 %v3928_v23, %v4295_v16  ;;  %vm2156_vm11 = vcmp.eq.s32.totalorder %v4072_v20, 1 }
 0x1ca   : > { %v2214_v0 = vsel %vm2150_vm9, %v1702_v50, 0.0  ;;  %v3036_v28 = vpack.c.bf16 %v2222_v61, %v2221_v21  ;;  %v1286_v41 = vadd.f32 %v3928_v23, %v1285_v59  ;;  %v1623_v36 = vadd.f32 %v3196_v52, %v1334_v14  ;;  %v1287_v42 = vpop.f32.mrb[85].mxu0  ;;  %v1614_v58 = vpop.f32.mrb[85].mxu1 }
 0x1cb   : > { %v3016_v35 = vpack.c.bf16 %v2214_v0, %v2213_v13  ;;  %3097 = vst [vmem:[%s3960_s19 + $0xc8] sm:$0xff] %v3041_v12   ;;  %v1615_v56 = vadd.f32 %v1614_v58, %v1326_v37  ;;  %v1288_v11 = vpop.f32.mrb[86].mxu0  ;;  %v3197_v34 = vpop.f32.mrb[86].mxu1  ;;  %v1353_v37 = vadd.f32 %v3928_v23, %v4296_v29  ;;  %v1345_v52 = vadd.f32 %v3928_v23, %v4297_v18 }
 0x1cc   : > { %3096 = vst [vmem:[%s3960_s19 + $0xc0] sm:$0xff] %v3036_v28   ;;  %v1575_v10 = vadd.f32 %v4109_v25, %v1286_v41  ;;  %v1715_v39 = vmax.f32 %v1623_v36, 0.0  ;;  %v1289_v31 = vadd.f32 %v3928_v23, %v1288_v11  ;;  %v1626_v40 = vadd.f32 %v3197_v34, %v1337_v4  ;;  %v1290_v1 = vpop.f32.mrb[87].mxu0  ;;  %v1617_v38 = vpop.f32.mrb[87].mxu1  ;;  %v4294_v25 = vld [vmem:[#allocation10_spill] sm:$0xff] }
 0x1cd   : > { %3092 = vst [vmem:[%s3960_s19 + $0xa0] sm:$0xff] %v3016_v35   ;;  %v1713_v54 = vmax.f32 %v1615_v56, 0.0  ;;  %v1618_v46 = vadd.f32 %v1617_v38, %v1329_v62  ;;  %v1342_v17 = vadd.f32 %v3928_v23, %v4294_v25  ;;  %v4195_v30 = vpop.permute.xlu1 %2101  ;;  %v4197_v14 = vpop.permute.xlu0 %2098  ;;  %vm2168_vm9 = vcmp.eq.s32.totalorder %v4162_v48, 1  ;;  %v4300_v38 = vld [vmem:[#allocation18_spill] sm:$0xff] }
 0x1ce   : > { %v1703_v24 = vmax.f32 %v1575_v10, 0.0  ;;  %v1578_v6 = vadd.f32 %v4112_v27, %v1289_v31  ;;  %v1716_v15 = vmax.f32 %v1626_v40, 0.0  ;;  %v2227_v19 = vsel %vm2163_vm4, %v1715_v39, 0.0  ;;  %v4299_v31 = vld [vmem:[#allocation17_spill] sm:$0xff] }
 0x1cf   : > { %v1714_v43 = vmax.f32 %v1618_v46, 0.0  ;;  %v2225_v49 = vsel %vm2161_vm2, %v1713_v54, 0.0  ;;  %v1366_v40 = vadd.f32 %v3928_v23, %v4299_v31  ;;  %v1369_v54 = vadd.f32 %v3928_v23, %v4300_v38 }
 0x1d0   : > { %v1704_v44 = vmax.f32 %v1578_v6, 0.0  ;;  %v2228_v27 = vsel %vm2164_vm3, %v1716_v15, 0.0  ;;  %v2215_v47 = vsel %vm2151_vm1, %v1703_v24, 0.0  ;;  %vm2170_vm12 = vcmp.eq.s32.totalorder %v4195_v30, 1 }
 0x1d1   : > { %v3051_v4 = vpack.c.bf16 %v2228_v27, %v2227_v19  ;;  %v2226_v8 = vsel %vm2162_vm0, %v1714_v43, 0.0  ;;  %v1293_v50 = vpop.f32.mrb[88].mxu0  ;;  %v3200_v22 = vpop.f32.mrb[88].mxu1  ;;  %v4301_v27 = vld [vmem:[#allocation15_spill] sm:$0xff]  ;;  %vm2155_vm1 = vcmp.eq.s32.totalorder %v4074_v7, 1 }
 0x1d2   : > { %v2216_v13 = vsel %vm2152_vm15, %v1704_v44, 0.0  ;;  %v3046_v21 = vpack.c.bf16 %v2226_v8, %v2225_v49  ;;  %v1294_v12 = vadd.f32 %v3928_v23, %v1293_v50  ;;  %v1639_v61 = vadd.f32 %v3200_v22, %v1350_v53  ;;  %v1295_v45 = vpop.f32.mrb[89].mxu0  ;;  %v1630_v59 = vpop.f32.mrb[89].mxu1  ;;  %v3396_v50 = vld [vmem:[%s4261_s2] ss:$0 sm:$0xff] }
 0x1d3   : > { %v3021_v55 = vpack.c.bf16 %v2216_v13, %v2215_v47  ;;  %3099 = vst [vmem:[%s3960_s19 + $0xd8] sm:$0xff] %v3051_v4   ;;  %v1631_v0 = vadd.f32 %v1630_v59, %v1342_v17  ;;  %v1296_v28 = vpop.f32.mrb[90].mxu0  ;;  %v3201_v41 = vpop.f32.mrb[90].mxu1  ;;  %v1361_v5 = vadd.f32 %v3928_v23, %v4301_v27  ;;  %vm2169_vm15 = vcmp.eq.s32.totalorder %v4197_v14, 1 }
 0x1d4   : > { %3098 = vst [vmem:[%s3960_s19 + $0xd0] sm:$0xff] %v3046_v21   ;;  %v1583_v33 = vadd.f32 %v4125_v32, %v1294_v12  ;;  %v1719_v36 = vmax.f32 %v1639_v61, 0.0  ;;  %v1297_v42 = vadd.f32 %v3928_v23, %v1296_v28  ;;  %v1642_v58 = vadd.f32 %v3201_v41, %v1353_v37  ;;  %v1298_v26 = vpop.f32.mrb[91].mxu0  ;;  %v1633_v62 = vpop.f32.mrb[91].mxu1  ;;  %v4298_v32 = vld [vmem:[#allocation14_spill] sm:$0xff] }
 0x1d5   : > { %3093 = vst [vmem:[%s3960_s19 + $0xa8] sm:$0xff] %v3021_v55   ;;  %v1717_v35 = vmax.f32 %v1631_v0, 0.0  ;;  %v1634_v56 = vadd.f32 %v1633_v62, %v1345_v52  ;;  %v1358_v39 = vadd.f32 %v3928_v23, %v4298_v32  ;;  %v2108_v46 = vpop.permute.xlu1 %2107  ;;  %v2105_v24 = vpop.permute.xlu0 %2104 }
 0x1d6   : > { %v1705_v11 = vmax.f32 %v1583_v33, 0.0  ;;  %v1586_v34 = vadd.f32 %v4130_v2, %v1297_v42  ;;  %v1720_v10 = vmax.f32 %v1642_v58, 0.0  ;;  %v2231_v6 = vsel %vm2167_vm10, %v1719_v36, 0.0 }
 0x1d7   : > { %v1718_v1 = vmax.f32 %v1634_v56, 0.0  ;;  %v2229_v25 = vsel %vm2165_vm8, %v1717_v35, 0.0  ;;  %vm2172_vm13 = vcmp.eq.s32.totalorder %v2108_v46, 1  ;;  %vm2171_vm14 = vcmp.eq.s32.totalorder %v2105_v24, 1 }
 0x1d8   : > { %v1706_v48 = vmax.f32 %v1586_v34, 0.0  ;;  %v2232_v15 = vsel %vm2168_vm9, %v1720_v10, 0.0  ;;  %v2217_v2 = vsel %vm2153_vm6, %v1705_v11, 0.0 }
 0x1d9   : > { %v3061_v17 = vpack.c.bf16 %v2232_v15, %v2231_v6  ;;  %v2230_v3 = vsel %vm2166_vm7, %v1718_v1, 0.0  ;;  %v1301_v16 = vpop.f32.mrb[92].mxu0  ;;  %v3204_v53 = vpop.f32.mrb[92].mxu1 }
 0x1da   : > { %v2218_v43 = vsel %vm2154_vm5, %v1706_v48, 0.0  ;;  %v3056_v29 = vpack.c.bf16 %v2230_v3, %v2229_v25  ;;  %v1302_v37 = vadd.f32 %v3928_v23, %v1301_v16  ;;  %v1655_v19 = vadd.f32 %v3204_v53, %v1366_v40  ;;  %v1303_v44 = vpop.f32.mrb[93].mxu0  ;;  %v1646_v63 = vpop.f32.mrb[93].mxu1 }
 0x1db   : > { %v3026_v47 = vpack.c.bf16 %v2218_v43, %v2217_v2  ;;  %3101 = vst [vmem:[%s3960_s19 + $0xe8] sm:$0xff] %v3061_v17   ;;  %v1647_v9 = vadd.f32 %v1646_v63, %v1358_v39  ;;  %v1304_v49 = vpop.f32.mrb[94].mxu0  ;;  %v3205_v4 = vpop.f32.mrb[94].mxu1 }
 0x1dc   : > { %3100 = vst [vmem:[%s3960_s19 + $0xe0] sm:$0xff] %v3056_v29   ;;  %v1591_v8 = vadd.f32 %v4122_v60, %v1302_v37  ;;  %v1723_v51 = vmax.f32 %v1655_v19, 0.0  ;;  %v1305_v22 = vadd.f32 %v3396_v50, %v1304_v49  ;;  %v1658_v13 = vadd.f32 %v3205_v4, %v1369_v54  ;;  %v1306_v21 = vpop.f32.mrb[95].mxu0  ;;  %v1649_v12 = vpop.f32.mrb[95].mxu1 }
 0x1dd   : > { %3094 = vst [vmem:[%s3960_s19 + $0xb0] sm:$0xff] %v3026_v47   ;;  %v1721_v61 = vmax.f32 %v1647_v9, 0.0  ;;  %v1650_v23 = vadd.f32 %v1649_v12, %v1361_v5 }
 0x1de   : > { %v1707_v45 = vmax.f32 %v1591_v8, 0.0  ;;  %v1594_v59 = vadd.f32 %v4127_v57, %v1305_v22  ;;  %v1724_v18 = vmax.f32 %v1658_v13, 0.0  ;;  %v2235_v52 = vsel %vm2171_vm14, %v1723_v51, 0.0 }
 0x1df   : > { %v1722_v60 = vmax.f32 %v1650_v23, 0.0  ;;  %v2233_v28 = vsel %vm2169_vm15, %v1721_v61, 0.0 }
 0x1e0   : > { %v1708_v55 = vmax.f32 %v1594_v59, 0.0  ;;  %v2236_v0 = vsel %vm2172_vm13, %v1724_v18, 0.0  ;;  %v2219_v57 = vsel %vm2155_vm1, %v1707_v45, 0.0 }
 0x1e1   : > { %v3071_v41 = vpack.c.bf16 %v2236_v0, %v2235_v52  ;;  %v2234_v33 = vsel %vm2170_vm12, %v1722_v60, 0.0 }
 0x1e2   : > { %v2220_v30 = vsel %vm2156_vm11, %v1708_v55, 0.0  ;;  %v3066_v36 = vpack.c.bf16 %v2234_v33, %v2233_v28 }
 0x1e3   : > { %v3031_v42 = vpack.c.bf16 %v2220_v30, %v2219_v57  ;;  %3103 = vst [vmem:[%s3960_s19 + $0xf8] sm:$0xff] %v3071_v41  }
 0x1e4   : > { %3102 = vst [vmem:[%s3960_s19 + $0xf0] sm:$0xff] %v3066_v36  }
 0x1e5   : > { %3095 = vst [vmem:[%s3960_s19 + $0xb8] sm:$0xff] %v3031_v42  }
 0x1e6 PF: > { %s14_s15 = sadd.s32 1, %s3403_s15  }
 0x1e7   : > { %p11_p4 = scmp.ge.s32.totalorder %s14_s15, 6  }
 0x1e9   :  { %13 = sbr.rel (!%p11_p4) target bundleno = 1 (0x1), region = 69 }

// kernel: net_ptq_forward.8
= control target key start
LH: loop header
LB: loop body
LE: loop exit
PB: predicated region body
PF: predicated region fallthrough
CT: control target
= control target key end

     0   :  { %v1832_v0 = vmov 0   ;;  %s2492_s1 = inlined_call_operand.vmem [shape: bf16[256,128], index: 1, kind: input, shape index: {}]   ;;  %s2493_s3 = inlined_call_operand.vmem [shape: f32[400,1], index: 3, kind: input, shape index: {}]   ;;  %s2494_s0 = inlined_call_operand.vmem [shape: bf16[400,256], index: 0, kind: input, shape index: {}]   ;;  %s2495_s2 = inlined_call_operand.vmem [shape: f32[1,128], index: 2, kind: input, shape index: {}]   ;;  %s2496_s4 = inlined_call_operand.vmem [shape: bf16[400,128], index: 4, kind: output, shape index: {}]  }
   0x1   :  { %453 = vmatprep.subr.bf16.mxu0 %v1832_v0  ;;  %1706 = vmatprep.subr.bf16.mxu1 %v1832_v0  ;;  %v1741_v1 = vld [vmem:[%s2492_s1] sm:$0xff]   ;;  %v1742_v2 = vld [vmem:[%s2492_s1 + $0x8] sm:$0xff]   ;;  %v1743_v3 = vld [vmem:[%s2492_s1 + $0x10] sm:$0xff]  }
   0x2   :  { %1740 = vset.pattern.permute.xlu1 %v1832_v0  ;;  %1739 = vset.pattern.permute.xlu0 %v1832_v0  ;;  %v1744_v4 = vld [vmem:[%s2492_s1 + $0x18] sm:$0xff]   ;;  %v1745_v5 = vld [vmem:[%s2492_s1 + $0x20] sm:$0xff]   ;;  %v738_v6 = vld [vmem:[%s2493_s3 + $0x10] sm:$0xff] }
   0x3   :  { %454 = vmatpush1.bf16.msra.mxu0 %v1741_v1  ;;  %1722 = vmatpush1.bf16.msra.mxu1 %v1741_v1  ;;  %v736_v7 = vld [vmem:[%s2493_s3] sm:$0xff]  ;;  %vm788_vm0 = vcmp.gt.f32.partialorder %v738_v6, 0.5  ;;  %v739_v8 = vld [vmem:[%s2493_s3 + $0x18] sm:$0xff]  ;;  %v737_v11 = vld [vmem:[%s2493_s3 + $0x8] sm:$0xff] }
   0x4   :  { %455 = vmatprep.subr.bf16.mxu0 %v1832_v0  ;;  %1707 = vmatprep.subr.bf16.mxu1 %v1832_v0  ;;  %vm786_vm1 = vcmp.gt.f32.partialorder %v736_v7, 0.5  ;;  %v838_v9 = vsel %vm788_vm0, 1, %v1832_v0  ;;  %vm789_vm2 = vcmp.gt.f32.partialorder %v739_v8, 0.5  ;;  %vm787_vm3 = vcmp.gt.f32.partialorder %v737_v11, 0.5  ;;  %v1746_v12 = vld [vmem:[%s2492_s1 + $0x28] sm:$0xff]   ;;  %v740_v18 = vld [vmem:[%s2493_s3 + $0x20] sm:$0xff] }
   0x5   :  { %v836_v10 = vsel %vm786_vm1, 1, %v1832_v0  ;;  %893 = vperm.xlu1 %1740, %v838_v9   ;;  %v839_v13 = vsel %vm789_vm2, 1, %v1832_v0  ;;  %v837_v14 = vsel %vm787_vm3, 1, %v1832_v0  ;;  %v1759_v15 = vld [vmem:[%s2494_s0 + $0x4] ss:$8 sps:$4 sm:$0xff]   ;;  %vm790_vm5 = vcmp.gt.f32.partialorder %v740_v18, 0.5 }
   0x6   :  { %887 = vperm.xlu0 %1739, %v836_v10   ;;  %485 = vmatprep.mubr.bf16.mxu0 %v1759_v15  ;;  %v1762_v16 = vld [vmem:[%s2494_s0 + $0xd4] ss:$8 sps:$4 sm:$0xff]   ;;  %v741_v17 = vld [vmem:[%s2493_s3 + $0x28] sm:$0xff]  ;;  %v840_v23 = vsel %vm790_vm5, 1, %v1832_v0  ;;  %v744_v25 = vld [vmem:[%s2493_s3 + $0x40] sm:$0xff] }
   0x7   :  { %456 = vmatpush1.bf16.msra.mxu0 %v1742_v2  ;;  %1723 = vmatpush1.bf16.msra.mxu1 %v1742_v2  ;;  %vm791_vm4 = vcmp.gt.f32.partialorder %v741_v17, 0.5  ;;  %v743_v19 = vld [vmem:[%s2493_s3 + $0x38] sm:$0xff]  ;;  %v742_v20 = vld [vmem:[%s2493_s3 + $0x30] sm:$0xff]  ;;  %v745_v24 = vld [vmem:[%s2493_s3 + $0x48] sm:$0xff]  ;;  %vm794_vm9 = vcmp.gt.f32.partialorder %v744_v25, 0.5 }
   0x8   :  { %457 = vmatprep.subr.bf16.mxu0 %v1832_v0  ;;  %1708 = vmatprep.subr.bf16.mxu1 %v1832_v0  ;;  %v1747_v21 = vld [vmem:[%s2492_s1 + $0x30] sm:$0xff]   ;;  %v841_v22 = vsel %vm791_vm4, 1, %v1832_v0  ;;  %vm793_vm6 = vcmp.gt.f32.partialorder %v743_v19, 0.5  ;;  %vm792_vm7 = vcmp.gt.f32.partialorder %v742_v20, 0.5  ;;  %v1748_v26 = vld [vmem:[%s2492_s1 + $0x38] sm:$0xff]   ;;  %vm795_vm8 = vcmp.gt.f32.partialorder %v745_v24, 0.5 }
   0x9   :  { %896 = vperm.xlu1 %1740, %v839_v13   ;;  %589 = vmatprep.mubr.bf16.mxu1 %v1762_v16  ;;  %v843_v27 = vsel %vm793_vm6, 1, %v1832_v0  ;;  %v842_v28 = vsel %vm792_vm7, 1, %v1832_v0  ;;  %v747_v29 = vld [vmem:[%s2493_s3 + $0x58] sm:$0xff]  ;;  %v746_v30 = vld [vmem:[%s2493_s3 + $0x50] sm:$0xff]  ;;  %v1749_v31 = vld [vmem:[%s2492_s1 + $0x40] sm:$0xff]   ;;  %v845_v32 = vsel %vm795_vm8, 1, %v1832_v0 }
   0xa   :  { %890 = vperm.xlu0 %1739, %v837_v14   ;;  %v844_v33 = vsel %vm794_vm9, 1, %v1832_v0  ;;  %vm797_vm10 = vcmp.gt.f32.partialorder %v747_v29, 0.5  ;;  %vm796_vm11 = vcmp.gt.f32.partialorder %v746_v30, 0.5  ;;  %v749_v34 = vld [vmem:[%s2493_s3 + $0x68] sm:$0xff]  ;;  %v748_v35 = vld [vmem:[%s2493_s3 + $0x60] sm:$0xff]  ;;  %v751_v39 = vld [vmem:[%s2493_s3 + $0x78] sm:$0xff] }
   0xb   :  { %458 = vmatpush1.bf16.msra.mxu0 %v1743_v3  ;;  %1724 = vmatpush1.bf16.msra.mxu1 %v1743_v3  ;;  %v1750_v36 = vld [vmem:[%s2492_s1 + $0x48] sm:$0xff]   ;;  %v847_v37 = vsel %vm797_vm10, 1, %v1832_v0  ;;  %v846_v38 = vsel %vm796_vm11, 1, %v1832_v0  ;;  %vm799_vm12 = vcmp.gt.f32.partialorder %v749_v34, 0.5  ;;  %vm798_vm13 = vcmp.gt.f32.partialorder %v748_v35, 0.5  ;;  %v750_v40 = vld [vmem:[%s2493_s3 + $0x70] sm:$0xff] }
   0xc   :  { %459 = vmatprep.subr.bf16.mxu0 %v1832_v0  ;;  %1709 = vmatprep.subr.bf16.mxu1 %v1832_v0  ;;  %v1751_v41 = vld [vmem:[%s2492_s1 + $0x50] sm:$0xff]   ;;  %v849_v42 = vsel %vm799_vm12, 1, %v1832_v0  ;;  %v848_v43 = vsel %vm798_vm13, 1, %v1832_v0  ;;  %vm801_vm14 = vcmp.gt.f32.partialorder %v751_v39, 0.5  ;;  %vm800_vm15 = vcmp.gt.f32.partialorder %v750_v40, 0.5  ;;  %v753_v44 = vld [vmem:[%s2493_s3 + $0x88] sm:$0xff] }
   0xd   :  { %902 = vperm.xlu1 %1740, %v841_v22   ;;  %v752_v45 = vld [vmem:[%s2493_s3 + $0x80] sm:$0xff]  ;;  %v1752_v46 = vld [vmem:[%s2492_s1 + $0x58] sm:$0xff]   ;;  %v851_v47 = vsel %vm801_vm14, 1, %v1832_v0  ;;  %v850_v48 = vsel %vm800_vm15, 1, %v1832_v0  ;;  %vm803_vm0 = vcmp.gt.f32.partialorder %v753_v44, 0.5  ;;  %v754_v50 = vld [vmem:[%s2493_s3 + $0x90] sm:$0xff] }
   0xe   :  { %899 = vperm.xlu0 %1739, %v840_v23   ;;  %vm802_vm1 = vcmp.gt.f32.partialorder %v752_v45, 0.5  ;;  %v755_v49 = vld [vmem:[%s2493_s3 + $0x98] sm:$0xff]  ;;  %v1753_v51 = vld [vmem:[%s2492_s1 + $0x60] sm:$0xff]   ;;  %v853_v52 = vsel %vm803_vm0, 1, %v1832_v0  ;;  %vm804_vm3 = vcmp.gt.f32.partialorder %v754_v50, 0.5  ;;  %v757_v54 = vld [vmem:[%s2493_s3 + $0xa8] sm:$0xff] }
   0xf   :  { %460 = vmatpush1.bf16.msra.mxu0 %v1744_v4  ;;  %1725 = vmatpush1.bf16.msra.mxu1 %v1744_v4  ;;  %v852_v53 = vsel %vm802_vm1, 1, %v1832_v0  ;;  %vm805_vm2 = vcmp.gt.f32.partialorder %v755_v49, 0.5  ;;  %v756_v55 = vld [vmem:[%s2493_s3 + $0xa0] sm:$0xff]  ;;  %v1754_v56 = vld [vmem:[%s2492_s1 + $0x68] sm:$0xff]   ;;  %v854_v58 = vsel %vm804_vm3, 1, %v1832_v0  ;;  %vm807_vm4 = vcmp.gt.f32.partialorder %v757_v54, 0.5 }
  0x10   :  { %461 = vmatprep.subr.bf16.mxu0 %v1832_v0  ;;  %1710 = vmatprep.subr.bf16.mxu1 %v1832_v0  ;;  %v855_v57 = vsel %vm805_vm2, 1, %v1832_v0  ;;  %vm806_vm5 = vcmp.gt.f32.partialorder %v756_v55, 0.5  ;;  %v759_v59 = vld [vmem:[%s2493_s3 + $0xb8] sm:$0xff]  ;;  %v758_v60 = vld [vmem:[%s2493_s3 + $0xb0] sm:$0xff]  ;;  %v857_v62 = vsel %vm807_vm4, 1, %v1832_v0  ;;  %v761_v2 = vld [vmem:[%s2493_s3 + $0xc8] sm:$0xff] }
  0x11   :  { %908 = vperm.xlu1 %1740, %v843_v27   ;;  %v1755_v61 = vld [vmem:[%s2492_s1 + $0x70] sm:$0xff]   ;;  %v856_v63 = vsel %vm806_vm5, 1, %v1832_v0  ;;  %vm809_vm6 = vcmp.gt.f32.partialorder %v759_v59, 0.5  ;;  %vm808_vm7 = vcmp.gt.f32.partialorder %v758_v60, 0.5  ;;  %v1756_v1 = vld [vmem:[%s2492_s1 + $0x78] sm:$0xff]   ;;  %vm811_vm8 = vcmp.gt.f32.partialorder %v761_v2, 0.5 }
  0x12   :  { %905 = vperm.xlu0 %1739, %v842_v28   ;;  %v859_v3 = vsel %vm809_vm6, 1, %v1832_v0  ;;  %v858_v4 = vsel %vm808_vm7, 1, %v1832_v0  ;;  %v1757_v6 = vld [vmem:[%s2494_s0] ss:$8 sps:$4 sm:$0xff]   ;;  %v1760_v7 = vld [vmem:[%s2494_s0 + $0xd0] ss:$8 sps:$4 sm:$0xff]  }
  0x13   :  { %462 = vmatpush1.bf16.msra.mxu0 %v1745_v5  ;;  %1726 = vmatpush1.bf16.msra.mxu1 %v1745_v5  ;;  %v760_v5 = vld [vmem:[%s2493_s3 + $0xc0] sm:$0xff]  ;;  %v1763_v8 = vld [vmem:[%s2494_s0 + $0x14] ss:$8 sps:$4 sm:$0xff]   ;;  %v765_v14 = vld [vmem:[%s2493_s3 + $0xe8] sm:$0xff] }
  0x14   :  { %463 = vmatprep.subr.bf16.mxu0 %v1832_v0  ;;  %1711 = vmatprep.subr.bf16.mxu1 %v1832_v0  ;;  %v1765_v9 = vld [vmem:[%s2494_s0 + $0xe4] ss:$8 sps:$4 sm:$0xff]   ;;  %vm810_vm9 = vcmp.gt.f32.partialorder %v760_v5, 0.5  ;;  %v763_v10 = vld [vmem:[%s2493_s3 + $0xd8] sm:$0xff]  ;;  %v762_v11 = vld [vmem:[%s2493_s3 + $0xd0] sm:$0xff]  ;;  %vm815_vm12 = vcmp.gt.f32.partialorder %v765_v14, 0.5 }
  0x15   :  { %914 = vperm.xlu1 %1740, %v845_v32   ;;  %v860_v13 = vsel %vm810_vm9, 1, %v1832_v0  ;;  %vm813_vm10 = vcmp.gt.f32.partialorder %v763_v10, 0.5  ;;  %vm812_vm11 = vcmp.gt.f32.partialorder %v762_v11, 0.5  ;;  %v764_v15 = vld [vmem:[%s2493_s3 + $0xe0] sm:$0xff]  ;;  %v1767_v16 = vld [vmem:[%s2494_s0 + $0x10] ss:$8 sps:$4 sm:$0xff]  }
  0x16   :  { %911 = vperm.xlu0 %1739, %v844_v33   ;;  %v1768_v17 = vld [vmem:[%s2494_s0 + $0xe0] ss:$8 sps:$4 sm:$0xff]   ;;  %v1769_v18 = vld [vmem:[%s2494_s0 + $0x24] ss:$8 sps:$4 sm:$0xff]   ;;  %v863_v19 = vsel %vm813_vm10, 1, %v1832_v0  ;;  %v862_v20 = vsel %vm812_vm11, 1, %v1832_v0 }
  0x17   :  { %464 = vmatpush1.bf16.msra.mxu0 %v1746_v12  ;;  %1727 = vmatpush1.bf16.msra.mxu1 %v1746_v12  ;;  %v861_v12 = vsel %vm811_vm8, 1, %v1832_v0  ;;  %vm814_vm13 = vcmp.gt.f32.partialorder %v764_v15, 0.5  ;;  %v767_v22 = vld [vmem:[%s2493_s3 + $0xf8] sm:$0xff]  ;;  %v766_v23 = vld [vmem:[%s2493_s3 + $0xf0] sm:$0xff]  ;;  %v865_v24 = vsel %vm815_vm12, 1, %v1832_v0  ;;  %v768_v27 = vld [vmem:[%s2493_s3 + $0x100] sm:$0xff] }
  0x18   :  { %465 = vmatprep.subr.bf16.mxu0 %v1832_v0  ;;  %1712 = vmatprep.subr.bf16.mxu1 %v1832_v0  ;;  %v864_v25 = vsel %vm814_vm13, 1, %v1832_v0  ;;  %vm817_vm14 = vcmp.gt.f32.partialorder %v767_v22, 0.5  ;;  %vm816_vm15 = vcmp.gt.f32.partialorder %v766_v23, 0.5  ;;  %v1773_v28 = vld [vmem:[%s2494_s0 + $0x20] ss:$8 sps:$4 sm:$0xff]   ;;  %vm818_vm1 = vcmp.gt.f32.partialorder %v768_v27, 0.5 }
  0x19   :  { %920 = vperm.xlu1 %1740, %v847_v37   ;;  %v867_v29 = vsel %vm817_vm14, 1, %v1832_v0  ;;  %v866_v30 = vsel %vm816_vm15, 1, %v1832_v0  ;;  %v1775_v32 = vld [vmem:[%s2494_s0 + $0x34] ss:$8 sps:$4 sm:$0xff]   ;;  %v1777_v33 = vld [vmem:[%s2494_s0 + $0x104] ss:$8 sps:$4 sm:$0xff]  }
  0x1a   :  { %917 = vperm.xlu0 %1739, %v846_v38   ;;  %v771_v34 = vld [vmem:[%s2493_s3 + $0x118] sm:$0xff]  ;;  %v770_v35 = vld [vmem:[%s2493_s3 + $0x110] sm:$0xff]  ;;  %v868_v37 = vsel %vm818_vm1, 1, %v1832_v0  ;;  %v773_v38 = vld [vmem:[%s2493_s3 + $0x128] sm:$0xff] }
  0x1b   :  { %466 = vmatpush1.bf16.msra.mxu0 %v1747_v21  ;;  %1728 = vmatpush1.bf16.msra.mxu1 %v1747_v21  ;;  %v1771_v21 = vld [vmem:[%s2494_s0 + $0xf4] ss:$8 sps:$4 sm:$0xff]   ;;  %vm821_vm2 = vcmp.gt.f32.partialorder %v771_v34, 0.5  ;;  %vm820_vm3 = vcmp.gt.f32.partialorder %v770_v35, 0.5  ;;  %v772_v39 = vld [vmem:[%s2493_s3 + $0x120] sm:$0xff]  ;;  %vm823_vm4 = vcmp.gt.f32.partialorder %v773_v38, 0.5 }
  0x1c   :  { %467 = vmatprep.subr.bf16.mxu0 %v1832_v0  ;;  %1713 = vmatprep.subr.bf16.mxu1 %v1832_v0  ;;  %v1779_v40 = vld [vmem:[%s2494_s0 + $0x30] ss:$8 sps:$4 sm:$0xff]   ;;  %v1781_v44 = vld [vmem:[%s2494_s0 + $0x44] ss:$8 sps:$4 sm:$0xff]   ;;  %vm822_vm5 = vcmp.gt.f32.partialorder %v772_v39, 0.5 }
  0x1d   :  { %926 = vperm.xlu1 %1740, %v849_v42   ;;  %v870_v42 = vsel %vm820_vm3, 1, %v1832_v0  ;;  %v1783_v45 = vld [vmem:[%s2494_s0 + $0x114] ss:$8 sps:$4 sm:$0xff]   ;;  %v872_v49 = vsel %vm822_vm5, 1, %v1832_v0  ;;  %v777_v50 = vld [vmem:[%s2493_s3 + $0x148] sm:$0xff] }
  0x1e   :  { %923 = vperm.xlu0 %1739, %v848_v43   ;;  %v1780_v43 = vld [vmem:[%s2494_s0 + $0x100] ss:$8 sps:$4 sm:$0xff]   ;;  %v1786_v55 = vld [vmem:[%s2494_s0 + $0x110] ss:$8 sps:$4 sm:$0xff]   ;;  %vm827_vm8 = vcmp.gt.f32.partialorder %v777_v50, 0.5 }
  0x1f   :  { %468 = vmatpush1.bf16.msra.mxu0 %v1748_v26  ;;  %1729 = vmatpush1.bf16.msra.mxu1 %v1748_v26  ;;  %v769_v26 = vld [vmem:[%s2493_s3 + $0x108] sm:$0xff]  ;;  %v778_v59 = vld [vmem:[%s2493_s3 + $0x150] sm:$0xff]  ;;  %v877_v60 = vsel %vm827_vm8, 1, %v1832_v0 }
  0x20   :  { %469 = vmatprep.subr.bf16.mxu0 %v1832_v0  ;;  %1714 = vmatprep.subr.bf16.mxu1 %v1832_v0  ;;  %vm819_vm0 = vcmp.gt.f32.partialorder %v769_v26, 0.5  ;;  %vm828_vm11 = vcmp.gt.f32.partialorder %v778_v59, 0.5  ;;  %v1793_v5 = vld [vmem:[%s2494_s0 + $0x64] ss:$8 sps:$4 sm:$0xff]   ;;  %v1797_v15 = vld [vmem:[%s2494_s0 + $0x60] ss:$8 sps:$4 sm:$0xff]  }
  0x21   :  { %932 = vperm.xlu1 %1740, %v851_v47   ;;  %v774_v47 = vld [vmem:[%s2493_s3 + $0x130] sm:$0xff]  ;;  %v785_v11 = vld [vmem:[%s2493_s3 + $0x188] sm:$0xff] }
  0x22   :  { %929 = vperm.xlu0 %1739, %v850_v48   ;;  %v873_v48 = vsel %vm823_vm4, 1, %v1832_v0  ;;  %vm824_vm7 = vcmp.gt.f32.partialorder %v774_v47, 0.5  ;;  %v1804_v22 = vld [vmem:[%s2494_s0 + $0x140] ss:$8 sps:$4 sm:$0xff]   ;;  %v1805_v23 = vld [vmem:[%s2494_s0 + $0x84] ss:$8 sps:$4 sm:$0xff]  }
  0x23   :  { %470 = vmatpush1.bf16.msra.mxu0 %v1749_v31  ;;  %1730 = vmatpush1.bf16.msra.mxu1 %v1749_v31  ;;  %v1774_v31 = vld [vmem:[%s2494_s0 + $0xf0] ss:$8 sps:$4 sm:$0xff]   ;;  %v874_v54 = vsel %vm824_vm7, 1, %v1832_v0  ;;  %v1811_v26 = vld [vmem:[%s2494_s0 + $0x94] ss:$8 sps:$4 sm:$0xff]  }
  0x24   :  { %471 = vmatprep.subr.bf16.mxu0 %v1832_v0  ;;  %1715 = vmatprep.subr.bf16.mxu1 %v1832_v0  ;;  %v1813_v27 = vld [vmem:[%s2494_s0 + $0x164] ss:$8 sps:$4 sm:$0xff]   ;;  %v1823_v34 = vld [vmem:[%s2494_s0 + $0xb4] ss:$8 sps:$4 sm:$0xff]   ;;  %v1831_v39 = vld [vmem:[%s2494_s0 + $0xc0] ss:$8 sps:$4 sm:$0xff]  }
  0x25   :  { %938 = vperm.xlu1 %1740, %v853_v52   ;;  %v1785_v52 = vld [vmem:[%s2494_s0 + $0x40] ss:$8 sps:$4 sm:$0xff]   ;;  %v1825_v35 = vld [vmem:[%s2494_s0 + $0x184] ss:$8 sps:$4 sm:$0xff]  }
  0x26   :  { %935 = vperm.xlu0 %1739, %v852_v53   ;;  %v1829_v38 = vld [vmem:[%s2494_s0 + $0xc4] ss:$8 sps:$4 sm:$0xff]  }
  0x27   :  { %472 = vmatpush1.bf16.msra.mxu0 %v1750_v36  ;;  %1731 = vmatpush1.bf16.msra.mxu1 %v1750_v36  ;;  %v869_v36 = vsel %vm819_vm0, 1, %v1832_v0  ;;  %vm835_vm0 = vcmp.gt.f32.partialorder %v785_v11, 0.5 }
  0x28   :  { %473 = vmatprep.subr.bf16.mxu0 %v1832_v0  ;;  %1716 = vmatprep.subr.bf16.mxu1 %v1832_v0 }
  0x29   :  { %944 = vperm.xlu1 %1740, %v855_v57   ;;  %v1789_v57 = vld [vmem:[%s2494_s0 + $0x124] ss:$8 sps:$4 sm:$0xff]  }
  0x2a   :  { %941 = vperm.xlu0 %1739, %v854_v58   ;;  %v779_v58 = vld [vmem:[%s2493_s3 + $0x158] sm:$0xff] }
  0x2b   :  { %474 = vmatpush1.bf16.msra.mxu0 %v1751_v41  ;;  %1732 = vmatpush1.bf16.msra.mxu1 %v1751_v41  ;;  %v871_v41 = vsel %vm821_vm2, 1, %v1832_v0  ;;  %vm829_vm10 = vcmp.gt.f32.partialorder %v779_v58, 0.5 }
  0x2c   :  { %475 = vmatprep.subr.bf16.mxu0 %v1832_v0  ;;  %1717 = vmatprep.subr.bf16.mxu1 %v1832_v0  ;;  %v879_v2 = vsel %vm829_vm10, 1, %v1832_v0 }
  0x2d   :  { %950 = vperm.xlu1 %1740, %v857_v62   ;;  %v781_v62 = vld [vmem:[%s2493_s3 + $0x168] sm:$0xff] }
  0x2e   :  { %947 = vperm.xlu0 %1739, %v856_v63   ;;  %v780_v63 = vld [vmem:[%s2493_s3 + $0x160] sm:$0xff]  ;;  %vm831_vm12 = vcmp.gt.f32.partialorder %v781_v62, 0.5 }
  0x2f   :  { %476 = vmatpush1.bf16.msra.mxu0 %v1752_v46  ;;  %1733 = vmatpush1.bf16.msra.mxu1 %v1752_v46  ;;  %v775_v46 = vld [vmem:[%s2493_s3 + $0x138] sm:$0xff]  ;;  %vm830_vm13 = vcmp.gt.f32.partialorder %v780_v63, 0.5 }
  0x30   :  { %477 = vmatprep.subr.bf16.mxu0 %v1832_v0  ;;  %1718 = vmatprep.subr.bf16.mxu1 %v1832_v0  ;;  %vm825_vm6 = vcmp.gt.f32.partialorder %v775_v46, 0.5  ;;  %v880_v10 = vsel %vm830_vm13, 1, %v1832_v0 }
  0x31   :  { %956 = vperm.xlu1 %1740, %v859_v3   ;;  %v875_v53 = vsel %vm825_vm6, 1, %v1832_v0  ;;  %v878_v3 = vsel %vm828_vm11, 1, %v1832_v0 }
  0x32   :  { %953 = vperm.xlu0 %1739, %v858_v4   ;;  %v1792_v4 = vld [vmem:[%s2494_s0 + $0x120] ss:$8 sps:$4 sm:$0xff]  }
  0x33   :  { %478 = vmatpush1.bf16.msra.mxu0 %v1753_v51  ;;  %1734 = vmatpush1.bf16.msra.mxu1 %v1753_v51  ;;  %v776_v51 = vld [vmem:[%s2493_s3 + $0x140] sm:$0xff] }
  0x34   :  { %479 = vmatprep.subr.bf16.mxu0 %v1832_v0  ;;  %1719 = vmatprep.subr.bf16.mxu1 %v1832_v0  ;;  %vm826_vm9 = vcmp.gt.f32.partialorder %v776_v51, 0.5 }
  0x35   :  { %962 = vperm.xlu1 %1740, %v861_v12   ;;  %v784_v12 = vld [vmem:[%s2493_s3 + $0x180] sm:$0xff] }
  0x36   :  { %959 = vperm.xlu0 %1739, %v860_v13   ;;  %vm834_vm1 = vcmp.gt.f32.partialorder %v784_v12, 0.5 }
  0x37   :  { %480 = vmatpush1.bf16.msra.mxu0 %v1754_v56  ;;  %1735 = vmatpush1.bf16.msra.mxu1 %v1754_v56  ;;  %v1787_v56 = vld [vmem:[%s2494_s0 + $0x54] ss:$8 sps:$4 sm:$0xff]  }
  0x38   :  { %481 = vmatprep.subr.bf16.mxu0 %v1832_v0  ;;  %1720 = vmatprep.subr.bf16.mxu1 %v1832_v0 }
  0x39   :  { %968 = vperm.xlu1 %1740, %v863_v19   ;;  %v885_v19 = vsel %vm835_vm0, 1, %v1832_v0 }
  0x3a   :  { %965 = vperm.xlu0 %1739, %v862_v20   ;;  %v884_v20 = vsel %vm834_vm1, 1, %v1832_v0 }
  0x3b   :  { %482 = vmatpush1.bf16.msra.mxu0 %v1755_v61  ;;  %1736 = vmatpush1.bf16.msra.mxu1 %v1755_v61  ;;  %v876_v61 = vsel %vm826_vm9, 1, %v1832_v0 }
  0x3c   :  { %483 = vmatprep.subr.bf16.mxu0 %v1832_v0  ;;  %1721 = vmatprep.subr.bf16.mxu1 %v1832_v0 }
  0x3d   :  { %974 = vperm.xlu1 %1740, %v865_v24   ;;  %v1809_v24 = vld [vmem:[%s2494_s0 + $0x80] ss:$8 sps:$4 sm:$0xff]  }
  0x3e   :  { %971 = vperm.xlu0 %1739, %v864_v25   ;;  %v1810_v25 = vld [vmem:[%s2494_s0 + $0x150] ss:$8 sps:$4 sm:$0xff]  }
  0x3f   :  { %484 = vmatpush1.bf16.msra.mxu0 %v1756_v1  ;;  %1737 = vmatpush1.bf16.msra.mxu1 %v1756_v1  ;;  %v1791_v1 = vld [vmem:[%s2494_s0 + $0x50] ss:$8 sps:$4 sm:$0xff]  }
  0x41   :  { %980 = vperm.xlu1 %1740, %v867_v29   ;;  %v1816_v29 = vld [vmem:[%s2494_s0 + $0x160] ss:$8 sps:$4 sm:$0xff]  }
  0x42   :  { %486 = vmatmul.mubr.bf16.vlgmr.msra.gmra.mrb[0].mxu0 %v1757_v6  ;;  %590 = vmatmul.mubr.bf16.vlgmr.msra.gmra.mrb[0].mxu1 %v1760_v7  ;;  %v1795_v6 = vld [vmem:[%s2494_s0 + $0x134] ss:$8 sps:$4 sm:$0xff]  }
  0x43   :  { %493 = vmatprep.mubr.bf16.mxu0 %v1763_v8  ;;  %597 = vmatprep.mubr.bf16.mxu1 %v1765_v9  ;;  %v783_v7 = vld [vmem:[%s2493_s3 + $0x178] sm:$0xff]  ;;  %v782_v8 = vld [vmem:[%s2493_s3 + $0x170] sm:$0xff]  ;;  %v881_v9 = vsel %vm831_vm12, 1, %v1832_v0 }
  0x44   :  { %977 = vperm.xlu0 %1739, %v866_v30   ;;  %vm833_vm14 = vcmp.gt.f32.partialorder %v783_v7, 0.5  ;;  %vm832_vm15 = vcmp.gt.f32.partialorder %v782_v8, 0.5  ;;  %v1817_v30 = vld [vmem:[%s2494_s0 + $0xa4] ss:$8 sps:$4 sm:$0xff]  }
  0x45   :  { %986 = vperm.xlu1 %1740, %v869_v36   ;;  %v883_v13 = vsel %vm833_vm14, 1, %v1832_v0  ;;  %v882_v14 = vsel %vm832_vm15, 1, %v1832_v0  ;;  %v1807_v0 = vld [vmem:[%s2494_s0 + $0x154] ss:$8 sps:$4 sm:$0xff]   ;;  %v1827_v36 = vld [vmem:[%s2494_s0 + $0xb0] ss:$8 sps:$4 sm:$0xff]  }
  0x48   :  { %983 = vperm.xlu0 %1739, %v868_v37   ;;  %v1828_v37 = vld [vmem:[%s2494_s0 + $0x180] ss:$8 sps:$4 sm:$0xff]  }
  0x49   :  { %992 = vperm.xlu1 %1740, %v871_v41  }
  0x4a   :  { %494 = vmatmul.mubr.bf16.gmra.mrb[4].mxu0 %v1767_v16  ;;  %598 = vmatmul.mubr.bf16.gmra.mrb[4].mxu1 %v1768_v17  ;;  %v1798_v16 = vld [vmem:[%s2494_s0 + $0x130] ss:$8 sps:$4 sm:$0xff]   ;;  %v1799_v17 = vld [vmem:[%s2494_s0 + $0x74] ss:$8 sps:$4 sm:$0xff]  }
  0x4b   :  { %501 = vmatprep.mubr.bf16.mxu0 %v1769_v18  ;;  %605 = vmatprep.mubr.bf16.mxu1 %v1771_v21  ;;  %v1801_v18 = vld [vmem:[%s2494_s0 + $0x144] ss:$8 sps:$4 sm:$0xff]   ;;  %v1803_v21 = vld [vmem:[%s2494_s0 + $0x70] ss:$8 sps:$4 sm:$0xff]  }
  0x4c   :  { %989 = vperm.xlu0 %1739, %v870_v42  }
  0x4d   :  { %998 = vperm.xlu1 %1740, %v873_v48  }
  0x50   :  { %995 = vperm.xlu0 %1739, %v872_v49  }
  0x51   :  { %1004 = vperm.xlu1 %1740, %v875_v53  }
  0x52   :  { %502 = vmatmul.mubr.bf16.gmra.mrb[8].mxu0 %v1773_v28  ;;  %606 = vmatmul.mubr.bf16.gmra.mrb[8].mxu1 %v1774_v31  ;;  %v1815_v28 = vld [vmem:[%s2494_s0 + $0x90] ss:$8 sps:$4 sm:$0xff]   ;;  %v1819_v31 = vld [vmem:[%s2494_s0 + $0x174] ss:$8 sps:$4 sm:$0xff]  }
  0x53   :  { %509 = vmatprep.mubr.bf16.mxu0 %v1775_v32  ;;  %613 = vmatprep.mubr.bf16.mxu1 %v1777_v33  ;;  %v1821_v32 = vld [vmem:[%s2494_s0 + $0xa0] ss:$8 sps:$4 sm:$0xff]   ;;  %v1822_v33 = vld [vmem:[%s2494_s0 + $0x170] ss:$8 sps:$4 sm:$0xff]  }
  0x54   :  { %1001 = vperm.xlu0 %1739, %v874_v54  }
  0x55   :  { %1010 = vperm.xlu1 %1740, %v877_v60  }
  0x58   :  { %1007 = vperm.xlu0 %1739, %v876_v61  }
  0x59   :  { %1016 = vperm.xlu1 %1740, %v879_v2  }
  0x5a   :  { %510 = vmatmul.mubr.bf16.gmra.mrb[12].mxu0 %v1779_v40  ;;  %614 = vmatmul.mubr.bf16.gmra.mrb[12].mxu1 %v1780_v43 }
  0x5b   :  { %517 = vmatprep.mubr.bf16.mxu0 %v1781_v44  ;;  %621 = vmatprep.mubr.bf16.mxu1 %v1783_v45 }
  0x5c   :  { %1013 = vperm.xlu0 %1739, %v878_v3   ;;  %v2341_v3 = vld [vmem:[%s2495_s2] ss:$0 sm:$0xff] }
  0x5d   :  { %1022 = vperm.xlu1 %1740, %v881_v9  }
  0x60   :  { %1019 = vperm.xlu0 %1739, %v880_v10  }
  0x61   :  { %1028 = vperm.xlu1 %1740, %v883_v13  }
  0x62   :  { %518 = vmatmul.mubr.bf16.gmra.mrb[16].mxu0 %v1785_v52  ;;  %622 = vmatmul.mubr.bf16.gmra.mrb[16].mxu1 %v1786_v55 }
  0x63   :  { %525 = vmatprep.mubr.bf16.mxu0 %v1787_v56  ;;  %629 = vmatprep.mubr.bf16.mxu1 %v1789_v57 }
  0x64   :  { %1025 = vperm.xlu0 %1739, %v882_v14  }
  0x65   :  { %1034 = vperm.xlu1 %1740, %v885_v19  }
  0x68   :  { %1031 = vperm.xlu0 %1739, %v884_v20  }
  0x6a   :  { %526 = vmatmul.mubr.bf16.gmra.mrb[20].mxu0 %v1791_v1  ;;  %630 = vmatmul.mubr.bf16.gmra.mrb[20].mxu1 %v1792_v4 }
  0x6b   :  { %533 = vmatprep.mubr.bf16.mxu0 %v1793_v5  ;;  %637 = vmatprep.mubr.bf16.mxu1 %v1795_v6 }
  0x72   :  { %534 = vmatmul.mubr.bf16.gmra.mrb[24].mxu0 %v1797_v15  ;;  %638 = vmatmul.mubr.bf16.gmra.mrb[24].mxu1 %v1798_v16 }
  0x73   :  { %541 = vmatprep.mubr.bf16.mxu0 %v1799_v17  ;;  %645 = vmatprep.mubr.bf16.mxu1 %v1801_v18 }
  0x7a   :  { %542 = vmatmul.mubr.bf16.gmra.mrb[28].mxu0 %v1803_v21  ;;  %646 = vmatmul.mubr.bf16.gmra.mrb[28].mxu1 %v1804_v22 }
  0x7b   :  { %549 = vmatprep.mubr.bf16.mxu0 %v1805_v23  ;;  %653 = vmatprep.mubr.bf16.mxu1 %v1807_v0 }
  0x82   :  { %550 = vmatmul.mubr.bf16.gmra.mrb[32].mxu0 %v1809_v24  ;;  %654 = vmatmul.mubr.bf16.gmra.mrb[32].mxu1 %v1810_v25 }
  0x83   :  { %557 = vmatprep.mubr.bf16.mxu0 %v1811_v26  ;;  %661 = vmatprep.mubr.bf16.mxu1 %v1813_v27 }
  0x84   :  { %v2290_v40 = vpop.permute.xlu1 %893 }
  0x85   :  { %v888_v41 = vpop.permute.xlu0 %887  ;;  %vm1038_vm6 = vcmp.eq.s32.totalorder %v2290_v40, 1 }
  0x86   :  { %vm1036_vm3 = vcmp.eq.s32.totalorder %v888_v41, 1 }
  0x88   :  { %v2292_v42 = vpop.permute.xlu1 %896 }
  0x89   :  { %v891_v43 = vpop.permute.xlu0 %890  ;;  %vm1039_vm7 = vcmp.eq.s32.totalorder %v2292_v42, 1 }
  0x8a   :  { %558 = vmatmul.mubr.bf16.gmra.mrb[36].mxu0 %v1815_v28  ;;  %662 = vmatmul.mubr.bf16.gmra.mrb[36].mxu1 %v1816_v29  ;;  %vm1037_vm4 = vcmp.eq.s32.totalorder %v891_v43, 1 }
  0x8b   :  { %565 = vmatprep.mubr.bf16.mxu0 %v1817_v30  ;;  %669 = vmatprep.mubr.bf16.mxu1 %v1819_v31 }
  0x8c   :  { %v2294_v44 = vpop.permute.xlu1 %902 }
  0x8d   :  { %v2296_v45 = vpop.permute.xlu0 %899  ;;  %vm1041_vm10 = vcmp.eq.s32.totalorder %v2294_v44, 1 }
  0x8e   :  { %vm1040_vm11 = vcmp.eq.s32.totalorder %v2296_v45, 1 }
  0x90   :  { %v2298_v46 = vpop.permute.xlu1 %908 }
  0x91   :  { %v2300_v47 = vpop.permute.xlu0 %905  ;;  %vm1043_vm15 = vcmp.eq.s32.totalorder %v2298_v46, 1 }
  0x92   :  { %566 = vmatmul.mubr.bf16.gmra.mrb[40].mxu0 %v1821_v32  ;;  %670 = vmatmul.mubr.bf16.gmra.mrb[40].mxu1 %v1822_v33  ;;  %vm1042_vm14 = vcmp.eq.s32.totalorder %v2300_v47, 1 }
  0x93   :  { %573 = vmatprep.mubr.bf16.mxu0 %v1823_v34  ;;  %677 = vmatprep.mubr.bf16.mxu1 %v1825_v35 }
  0x94   :  { %v2302_v48 = vpop.permute.xlu1 %914 }
  0x95   :  { %v2304_v49 = vpop.permute.xlu0 %911 }
  0x98   :  { %v2306_v50 = vpop.permute.xlu1 %920 }
  0x99   :  { %v2308_v51 = vpop.permute.xlu0 %917 }
  0x9a   :  { %574 = vmatmul.mubr.bf16.gmra.mrb[44].mxu0 %v1827_v36  ;;  %678 = vmatmul.mubr.bf16.gmra.mrb[44].mxu1 %v1828_v37 }
  0x9b   :  { %581 = vmatprep.mubr.bf16.mxu0 %v1829_v38 }
  0x9c   :  { %v2310_v52 = vpop.permute.xlu1 %926 }
  0x9d   :  { %v2312_v53 = vpop.permute.xlu0 %923 }
  0xa0   :  { %v2314_v54 = vpop.permute.xlu1 %932 }
  0xa1   :  { %v2316_v55 = vpop.permute.xlu0 %929 }
  0xa2   :  { %582 = vmatmul.mubr.bf16.gmra.mrb[48].mxu0 %v1831_v39 }
  0xa4   :  { %v2318_v56 = vpop.permute.xlu1 %938 }
  0xa5   :  { %v2320_v57 = vpop.permute.xlu0 %935 }
  0xa8   :  { %v2322_v58 = vpop.permute.xlu1 %944 }
  0xa9   :  { %v2324_v59 = vpop.permute.xlu0 %941 }
  0xac   :  { %v2326_v60 = vpop.permute.xlu1 %950 }
  0xad   :  { %v2328_v61 = vpop.permute.xlu0 %947 }
  0xb0   :  { %v2330_v62 = vpop.permute.xlu1 %956 }
  0xb1   :  { %v2332_v63 = vpop.permute.xlu0 %953 }
  0xb4   :  { %v2334_v1 = vpop.permute.xlu1 %962 }
  0xb5   :  { %v2336_v2 = vpop.permute.xlu0 %959 }
  0xb8   :  { %v969_v4 = vpop.permute.xlu1 %968 }
  0xb9   :  { %v966_v5 = vpop.permute.xlu0 %965  ;;  %vm1063_vm5 = vcmp.eq.s32.totalorder %v969_v4, 1 }
  0xba   :  { %vm1062_vm2 = vcmp.eq.s32.totalorder %v966_v5, 1 }
  0xbc   :  { %v975_v23 = vpop.permute.xlu1 %974 }
  0xbd   :  { %v972_v0 = vpop.permute.xlu0 %971  ;;  %vm1065_vm8 = vcmp.eq.s32.totalorder %v975_v23, 1 }
  0xbe   :  { %vm1064_vm9 = vcmp.eq.s32.totalorder %v972_v0, 1 }
 0x115   :  { %v487_v6 = vpop.f32.mrb[0].mxu0  ;;  %v591_v7 = vpop.f32.mrb[0].mxu1 }
 0x116   :  { %v488_v8 = vadd.f32 %v2341_v3, %v487_v6  ;;  %v592_v9 = vadd.f32 %v2341_v3, %v591_v7  ;;  %v489_v10 = vpop.f32.mrb[1].mxu0  ;;  %v593_v11 = vpop.f32.mrb[1].mxu1 }
 0x117   :  { %v490_v12 = vpop.f32.mrb[2].mxu0  ;;  %v594_v13 = vpop.f32.mrb[2].mxu1 }
 0x118   :  { %v686_v14 = vmax.f32 %v488_v8, 0.0  ;;  %v712_v15 = vmax.f32 %v592_v9, 0.0  ;;  %v491_v16 = vadd.f32 %v2341_v3, %v490_v12  ;;  %v595_v17 = vadd.f32 %v2341_v3, %v594_v13  ;;  %v492_v18 = vpop.f32.mrb[3].mxu0  ;;  %v596_v19 = vpop.f32.mrb[3].mxu1 }
 0x119   :  { %v981_v7 = vpop.permute.xlu1 %980  ;;  %v978_v8 = vpop.permute.xlu0 %977 }
 0x11a   :  { %v1112_v20 = vsel %vm1062_vm2, %v712_v15, 0.0  ;;  %v687_v21 = vmax.f32 %v491_v16, 0.0  ;;  %v713_v22 = vmax.f32 %v595_v17, 0.0  ;;  %v1086_v24 = vsel %vm1036_vm3, %v686_v14, 0.0 }
 0x11b   :  { %vm1067_vm12 = vcmp.eq.s32.totalorder %v981_v7, 1  ;;  %vm1066_vm13 = vcmp.eq.s32.totalorder %v978_v8, 1  ;;  %vm1044_vm2 = vcmp.eq.s32.totalorder %v2304_v49, 1  ;;  %vm1045_vm3 = vcmp.eq.s32.totalorder %v2302_v48, 1 }
 0x11c   :  { %v1087_v25 = vsel %vm1037_vm4, %v687_v21, 0.0  ;;  %v1113_v26 = vsel %vm1063_vm5, %v713_v22, 0.0 }
 0x11d   :  { %v1560_v27 = vpack.c.bf16 %v1087_v25, %v1086_v24  ;;  %v1625_v28 = vpack.c.bf16 %v1113_v26, %v1112_v20  ;;  %v495_v29 = vpop.f32.mrb[4].mxu0  ;;  %v599_v30 = vpop.f32.mrb[4].mxu1 }
 0x11e   :  { %v496_v31 = vadd.f32 %v2341_v3, %v495_v29  ;;  %v600_v32 = vadd.f32 %v2341_v3, %v599_v30  ;;  %v497_v33 = vpop.f32.mrb[5].mxu0  ;;  %v601_v34 = vpop.f32.mrb[5].mxu1 }
 0x11f   :  { %1561 = vst [vmem:[%s2496_s4] sm:$0xff] %v1560_v27   ;;  %1694 = vst [vmem:[%s2496_s4 + $0x68] sm:$0xff] %v1625_v28   ;;  %v498_v35 = vpop.f32.mrb[6].mxu0  ;;  %v602_v36 = vpop.f32.mrb[6].mxu1 }
 0x120   :  { %v688_v37 = vmax.f32 %v496_v31, 0.0  ;;  %v714_v38 = vmax.f32 %v600_v32, 0.0  ;;  %v499_v39 = vadd.f32 %v2341_v3, %v498_v35  ;;  %v603_v41 = vadd.f32 %v2341_v3, %v602_v36  ;;  %v500_v43 = vpop.f32.mrb[7].mxu0  ;;  %v604_v4 = vpop.f32.mrb[7].mxu1 }
 0x121   :  { %v987_v28 = vpop.permute.xlu1 %986  ;;  %v984_v29 = vpop.permute.xlu0 %983 }
 0x122   :  { %v689_v5 = vmax.f32 %v499_v39, 0.0  ;;  %v715_v6 = vmax.f32 %v603_v41, 0.0  ;;  %v1088_v9 = vsel %vm1038_vm6, %v688_v37, 0.0  ;;  %v1114_v10 = vsel %vm1064_vm9, %v714_v38, 0.0 }
 0x123   :  { %vm1069_vm0 = vcmp.eq.s32.totalorder %v987_v28, 1  ;;  %vm1068_vm1 = vcmp.eq.s32.totalorder %v984_v29, 1  ;;  %vm1046_vm6 = vcmp.eq.s32.totalorder %v2308_v51, 1 }
 0x124   :  { %v1089_v11 = vsel %vm1039_vm7, %v689_v5, 0.0  ;;  %v1115_v12 = vsel %vm1065_vm8, %v715_v6, 0.0  ;;  %vm1047_vm7 = vcmp.eq.s32.totalorder %v2306_v50, 1 }
 0x125   :  { %v1565_v13 = vpack.c.bf16 %v1089_v11, %v1088_v9  ;;  %v1630_v14 = vpack.c.bf16 %v1115_v12, %v1114_v10  ;;  %v503_v15 = vpop.f32.mrb[8].mxu0  ;;  %v607_v16 = vpop.f32.mrb[8].mxu1 }
 0x126   :  { %v504_v17 = vadd.f32 %v2341_v3, %v503_v15  ;;  %v608_v18 = vadd.f32 %v2341_v3, %v607_v16  ;;  %v505_v19 = vpop.f32.mrb[9].mxu0  ;;  %v609_v40 = vpop.f32.mrb[9].mxu1 }
 0x127   :  { %1682 = vst [vmem:[%s2496_s4 + $0x8] sm:$0xff] %v1565_v13   ;;  %1695 = vst [vmem:[%s2496_s4 + $0x70] sm:$0xff] %v1630_v14   ;;  %v506_v42 = vpop.f32.mrb[10].mxu0  ;;  %v610_v20 = vpop.f32.mrb[10].mxu1 }
 0x128   :  { %v690_v21 = vmax.f32 %v504_v17, 0.0  ;;  %v716_v22 = vmax.f32 %v608_v18, 0.0  ;;  %v507_v23 = vadd.f32 %v2341_v3, %v506_v42  ;;  %v611_v0 = vadd.f32 %v2341_v3, %v610_v20  ;;  %v508_v24 = vpop.f32.mrb[11].mxu0  ;;  %v612_v25 = vpop.f32.mrb[11].mxu1 }
 0x129   :  { %v993_v13 = vpop.permute.xlu1 %992  ;;  %v990_v14 = vpop.permute.xlu0 %989 }
 0x12a   :  { %v691_v26 = vmax.f32 %v507_v23, 0.0  ;;  %v717_v27 = vmax.f32 %v611_v0, 0.0  ;;  %v1090_v30 = vsel %vm1040_vm11, %v690_v21, 0.0  ;;  %v1116_v31 = vsel %vm1066_vm13, %v716_v22, 0.0 }
 0x12b   :  { %vm1071_vm4 = vcmp.eq.s32.totalorder %v993_v13, 1  ;;  %vm1070_vm5 = vcmp.eq.s32.totalorder %v990_v14, 1  ;;  %vm1049_vm11 = vcmp.eq.s32.totalorder %v2310_v52, 1 }
 0x12c   :  { %v1091_v32 = vsel %vm1041_vm10, %v691_v26, 0.0  ;;  %v1117_v33 = vsel %vm1067_vm12, %v717_v27, 0.0  ;;  %vm1048_vm10 = vcmp.eq.s32.totalorder %v2312_v53, 1 }
 0x12d   :  { %v1570_v34 = vpack.c.bf16 %v1091_v32, %v1090_v30  ;;  %v1635_v35 = vpack.c.bf16 %v1117_v33, %v1116_v31  ;;  %v511_v36 = vpop.f32.mrb[12].mxu0  ;;  %v615_v37 = vpop.f32.mrb[12].mxu1 }
 0x12e   :  { %v512_v38 = vadd.f32 %v2341_v3, %v511_v36  ;;  %v616_v39 = vadd.f32 %v2341_v3, %v615_v37  ;;  %v513_v41 = vpop.f32.mrb[13].mxu0  ;;  %v617_v44 = vpop.f32.mrb[13].mxu1 }
 0x12f   :  { %1683 = vst [vmem:[%s2496_s4 + $0x10] sm:$0xff] %v1570_v34   ;;  %1696 = vst [vmem:[%s2496_s4 + $0x78] sm:$0xff] %v1635_v35   ;;  %v514_v45 = vpop.f32.mrb[14].mxu0  ;;  %v618_v43 = vpop.f32.mrb[14].mxu1 }
 0x130   :  { %v692_v4 = vmax.f32 %v512_v38, 0.0  ;;  %v718_v5 = vmax.f32 %v616_v39, 0.0  ;;  %v515_v6 = vadd.f32 %v2341_v3, %v514_v45  ;;  %v619_v7 = vadd.f32 %v2341_v3, %v618_v43  ;;  %v516_v8 = vpop.f32.mrb[15].mxu0  ;;  %v620_v9 = vpop.f32.mrb[15].mxu1 }
 0x131   :  { %v999_v32 = vpop.permute.xlu1 %998  ;;  %v996_v33 = vpop.permute.xlu0 %995 }
 0x132   :  { %v1092_v10 = vsel %vm1042_vm14, %v692_v4, 0.0  ;;  %v693_v11 = vmax.f32 %v515_v6, 0.0  ;;  %v719_v12 = vmax.f32 %v619_v7, 0.0  ;;  %v1118_v15 = vsel %vm1068_vm1, %v718_v5, 0.0 }
 0x133   :  { %vm1073_vm8 = vcmp.eq.s32.totalorder %v999_v32, 1  ;;  %vm1072_vm9 = vcmp.eq.s32.totalorder %v996_v33, 1  ;;  %vm1050_vm14 = vcmp.eq.s32.totalorder %v2316_v55, 1 }
 0x134   :  { %v1093_v16 = vsel %vm1043_vm15, %v693_v11, 0.0  ;;  %v1119_v17 = vsel %vm1069_vm0, %v719_v12, 0.0  ;;  %vm1051_vm15 = vcmp.eq.s32.totalorder %v2314_v54, 1 }
 0x135   :  { %v1575_v18 = vpack.c.bf16 %v1093_v16, %v1092_v10  ;;  %v1640_v19 = vpack.c.bf16 %v1119_v17, %v1118_v15  ;;  %v519_v40 = vpop.f32.mrb[16].mxu0  ;;  %v623_v42 = vpop.f32.mrb[16].mxu1 }
 0x136   :  { %v520_v20 = vadd.f32 %v2341_v3, %v519_v40  ;;  %v624_v47 = vadd.f32 %v2341_v3, %v623_v42  ;;  %v521_v21 = vpop.f32.mrb[17].mxu0  ;;  %v625_v22 = vpop.f32.mrb[17].mxu1 }
 0x137   :  { %1684 = vst [vmem:[%s2496_s4 + $0x18] sm:$0xff] %v1575_v18   ;;  %1697 = vst [vmem:[%s2496_s4 + $0x80] sm:$0xff] %v1640_v19   ;;  %v522_v46 = vpop.f32.mrb[18].mxu0  ;;  %v626_v23 = vpop.f32.mrb[18].mxu1 }
 0x138   :  { %v694_v0 = vmax.f32 %v520_v20, 0.0  ;;  %v720_v24 = vmax.f32 %v624_v47, 0.0  ;;  %v523_v25 = vadd.f32 %v2341_v3, %v522_v46  ;;  %v627_v26 = vadd.f32 %v2341_v3, %v626_v23  ;;  %v524_v27 = vpop.f32.mrb[19].mxu0  ;;  %v628_v28 = vpop.f32.mrb[19].mxu1 }
 0x139   :  { %v1005_v14 = vpop.permute.xlu1 %1004  ;;  %v1002_v15 = vpop.permute.xlu0 %1001 }
 0x13a   :  { %v1094_v29 = vsel %vm1044_vm2, %v694_v0, 0.0  ;;  %v695_v30 = vmax.f32 %v523_v25, 0.0  ;;  %v721_v31 = vmax.f32 %v627_v26, 0.0  ;;  %v1120_v34 = vsel %vm1070_vm5, %v720_v24, 0.0 }
 0x13b   :  { %vm1075_vm12 = vcmp.eq.s32.totalorder %v1005_v14, 1  ;;  %vm1074_vm13 = vcmp.eq.s32.totalorder %v1002_v15, 1  ;;  %vm1052_vm2 = vcmp.eq.s32.totalorder %v2320_v57, 1 }
 0x13c   :  { %v1095_v35 = vsel %vm1045_vm3, %v695_v30, 0.0  ;;  %v1121_v36 = vsel %vm1071_vm4, %v721_v31, 0.0  ;;  %vm1053_vm3 = vcmp.eq.s32.totalorder %v2318_v56, 1 }
 0x13d   :  { %v1580_v37 = vpack.c.bf16 %v1095_v35, %v1094_v29  ;;  %v1645_v38 = vpack.c.bf16 %v1121_v36, %v1120_v34  ;;  %v527_v39 = vpop.f32.mrb[20].mxu0  ;;  %v631_v41 = vpop.f32.mrb[20].mxu1 }
 0x13e   :  { %v528_v44 = vadd.f32 %v2341_v3, %v527_v39  ;;  %v632_v49 = vadd.f32 %v2341_v3, %v631_v41  ;;  %v529_v45 = vpop.f32.mrb[21].mxu0  ;;  %v633_v43 = vpop.f32.mrb[21].mxu1 }
 0x13f   :  { %1685 = vst [vmem:[%s2496_s4 + $0x20] sm:$0xff] %v1580_v37   ;;  %1698 = vst [vmem:[%s2496_s4 + $0x88] sm:$0xff] %v1645_v38   ;;  %v530_v48 = vpop.f32.mrb[22].mxu0  ;;  %v634_v4 = vpop.f32.mrb[22].mxu1 }
 0x140   :  { %v696_v5 = vmax.f32 %v528_v44, 0.0  ;;  %v722_v6 = vmax.f32 %v632_v49, 0.0  ;;  %v531_v7 = vadd.f32 %v2341_v3, %v530_v48  ;;  %v635_v8 = vadd.f32 %v2341_v3, %v634_v4  ;;  %v532_v9 = vpop.f32.mrb[23].mxu0  ;;  %v636_v10 = vpop.f32.mrb[23].mxu1 }
 0x141   :  { %v1011_v31 = vpop.permute.xlu1 %1010  ;;  %v1008_v32 = vpop.permute.xlu0 %1007 }
 0x142   :  { %v1096_v11 = vsel %vm1046_vm6, %v696_v5, 0.0  ;;  %v697_v12 = vmax.f32 %v531_v7, 0.0  ;;  %v723_v13 = vmax.f32 %v635_v8, 0.0  ;;  %v1122_v16 = vsel %vm1072_vm9, %v722_v6, 0.0 }
 0x143   :  { %vm1077_vm0 = vcmp.eq.s32.totalorder %v1011_v31, 1  ;;  %vm1076_vm1 = vcmp.eq.s32.totalorder %v1008_v32, 1  ;;  %vm1054_vm6 = vcmp.eq.s32.totalorder %v2324_v59, 1 }
 0x144   :  { %v1097_v17 = vsel %vm1047_vm7, %v697_v12, 0.0  ;;  %v1123_v18 = vsel %vm1073_vm8, %v723_v13, 0.0  ;;  %vm1055_vm7 = vcmp.eq.s32.totalorder %v2322_v58, 1 }
 0x145   :  { %v1585_v19 = vpack.c.bf16 %v1097_v17, %v1096_v11  ;;  %v1650_v40 = vpack.c.bf16 %v1123_v18, %v1122_v16  ;;  %v535_v42 = vpop.f32.mrb[24].mxu0  ;;  %v639_v20 = vpop.f32.mrb[24].mxu1 }
 0x146   :  { %v536_v47 = vadd.f32 %v2341_v3, %v535_v42  ;;  %v640_v51 = vadd.f32 %v2341_v3, %v639_v20  ;;  %v537_v21 = vpop.f32.mrb[25].mxu0  ;;  %v641_v22 = vpop.f32.mrb[25].mxu1 }
 0x147   :  { %1686 = vst [vmem:[%s2496_s4 + $0x28] sm:$0xff] %v1585_v19   ;;  %1699 = vst [vmem:[%s2496_s4 + $0x90] sm:$0xff] %v1650_v40   ;;  %v538_v50 = vpop.f32.mrb[26].mxu0  ;;  %v642_v46 = vpop.f32.mrb[26].mxu1 }
 0x148   :  { %v698_v23 = vmax.f32 %v536_v47, 0.0  ;;  %v724_v0 = vmax.f32 %v640_v51, 0.0  ;;  %v539_v24 = vadd.f32 %v2341_v3, %v538_v50  ;;  %v643_v25 = vadd.f32 %v2341_v3, %v642_v46  ;;  %v540_v26 = vpop.f32.mrb[27].mxu0  ;;  %v644_v27 = vpop.f32.mrb[27].mxu1 }
 0x149   :  { %v1017_v11 = vpop.permute.xlu1 %1016  ;;  %v1014_v12 = vpop.permute.xlu0 %1013 }
 0x14a   :  { %v1098_v28 = vsel %vm1048_vm10, %v698_v23, 0.0  ;;  %v699_v29 = vmax.f32 %v539_v24, 0.0  ;;  %v725_v30 = vmax.f32 %v643_v25, 0.0  ;;  %v1124_v33 = vsel %vm1074_vm13, %v724_v0, 0.0 }
 0x14b   :  { %vm1079_vm4 = vcmp.eq.s32.totalorder %v1017_v11, 1  ;;  %vm1078_vm5 = vcmp.eq.s32.totalorder %v1014_v12, 1  ;;  %vm1056_vm10 = vcmp.eq.s32.totalorder %v2328_v61, 1 }
 0x14c   :  { %v1099_v34 = vsel %vm1049_vm11, %v699_v29, 0.0  ;;  %v1125_v35 = vsel %vm1075_vm12, %v725_v30, 0.0  ;;  %vm1057_vm11 = vcmp.eq.s32.totalorder %v2326_v60, 1 }
 0x14d   :  { %v1590_v36 = vpack.c.bf16 %v1099_v34, %v1098_v28  ;;  %v1655_v37 = vpack.c.bf16 %v1125_v35, %v1124_v33  ;;  %v543_v38 = vpop.f32.mrb[28].mxu0  ;;  %v647_v39 = vpop.f32.mrb[28].mxu1 }
 0x14e   :  { %v544_v41 = vadd.f32 %v2341_v3, %v543_v38  ;;  %v648_v53 = vadd.f32 %v2341_v3, %v647_v39  ;;  %v545_v44 = vpop.f32.mrb[29].mxu0  ;;  %v649_v49 = vpop.f32.mrb[29].mxu1 }
 0x14f   :  { %1687 = vst [vmem:[%s2496_s4 + $0x30] sm:$0xff] %v1590_v36   ;;  %1700 = vst [vmem:[%s2496_s4 + $0x98] sm:$0xff] %v1655_v37   ;;  %v546_v52 = vpop.f32.mrb[30].mxu0  ;;  %v650_v45 = vpop.f32.mrb[30].mxu1 }
 0x150   :  { %v700_v43 = vmax.f32 %v544_v41, 0.0  ;;  %v726_v48 = vmax.f32 %v648_v53, 0.0  ;;  %v547_v4 = vadd.f32 %v2341_v3, %v546_v52  ;;  %v651_v5 = vadd.f32 %v2341_v3, %v650_v45  ;;  %v548_v6 = vpop.f32.mrb[31].mxu0  ;;  %v652_v7 = vpop.f32.mrb[31].mxu1 }
 0x151   :  { %v1023_v26 = vpop.permute.xlu1 %1022  ;;  %v1020_v27 = vpop.permute.xlu0 %1019 }
 0x152   :  { %v1100_v8 = vsel %vm1050_vm14, %v700_v43, 0.0  ;;  %v701_v9 = vmax.f32 %v547_v4, 0.0  ;;  %v727_v10 = vmax.f32 %v651_v5, 0.0  ;;  %v1126_v13 = vsel %vm1076_vm1, %v726_v48, 0.0 }
 0x153   :  { %vm1081_vm8 = vcmp.eq.s32.totalorder %v1023_v26, 1  ;;  %vm1080_vm9 = vcmp.eq.s32.totalorder %v1020_v27, 1  ;;  %vm1058_vm14 = vcmp.eq.s32.totalorder %v2332_v63, 1 }
 0x154   :  { %v1101_v14 = vsel %vm1051_vm15, %v701_v9, 0.0  ;;  %v1127_v15 = vsel %vm1077_vm0, %v727_v10, 0.0  ;;  %vm1059_vm15 = vcmp.eq.s32.totalorder %v2330_v62, 1 }
 0x155   :  { %v1595_v16 = vpack.c.bf16 %v1101_v14, %v1100_v8  ;;  %v1660_v17 = vpack.c.bf16 %v1127_v15, %v1126_v13  ;;  %v551_v18 = vpop.f32.mrb[32].mxu0  ;;  %v655_v19 = vpop.f32.mrb[32].mxu1 }
 0x156   :  { %v552_v40 = vadd.f32 %v2341_v3, %v551_v18  ;;  %v656_v55 = vadd.f32 %v2341_v3, %v655_v19  ;;  %v553_v42 = vpop.f32.mrb[33].mxu0  ;;  %v657_v20 = vpop.f32.mrb[33].mxu1 }
 0x157   :  { %1688 = vst [vmem:[%s2496_s4 + $0x38] sm:$0xff] %v1595_v16   ;;  %1701 = vst [vmem:[%s2496_s4 + $0xa0] sm:$0xff] %v1660_v17   ;;  %v554_v54 = vpop.f32.mrb[34].mxu0  ;;  %v658_v47 = vpop.f32.mrb[34].mxu1 }
 0x158   :  { %v702_v51 = vmax.f32 %v552_v40, 0.0  ;;  %v728_v21 = vmax.f32 %v656_v55, 0.0  ;;  %v555_v22 = vadd.f32 %v2341_v3, %v554_v54  ;;  %v659_v50 = vadd.f32 %v2341_v3, %v658_v47  ;;  %v556_v46 = vpop.f32.mrb[35].mxu0  ;;  %v660_v23 = vpop.f32.mrb[35].mxu1 }
 0x159   :  { %v1029_v4 = vpop.permute.xlu1 %1028  ;;  %v1026_v5 = vpop.permute.xlu0 %1025 }
 0x15a   :  { %v1102_v0 = vsel %vm1052_vm2, %v702_v51, 0.0  ;;  %v703_v24 = vmax.f32 %v555_v22, 0.0  ;;  %v729_v25 = vmax.f32 %v659_v50, 0.0  ;;  %v1128_v28 = vsel %vm1078_vm5, %v728_v21, 0.0 }
 0x15b   :  { %vm1083_vm12 = vcmp.eq.s32.totalorder %v1029_v4, 1  ;;  %vm1082_vm13 = vcmp.eq.s32.totalorder %v1026_v5, 1  ;;  %vm1060_vm2 = vcmp.eq.s32.totalorder %v2336_v2, 1 }
 0x15c   :  { %v1103_v29 = vsel %vm1053_vm3, %v703_v24, 0.0  ;;  %v1129_v30 = vsel %vm1079_vm4, %v729_v25, 0.0  ;;  %vm1061_vm3 = vcmp.eq.s32.totalorder %v2334_v1, 1 }
 0x15d   :  { %v1600_v31 = vpack.c.bf16 %v1103_v29, %v1102_v0  ;;  %v1665_v32 = vpack.c.bf16 %v1129_v30, %v1128_v28  ;;  %v559_v33 = vpop.f32.mrb[36].mxu0  ;;  %v663_v34 = vpop.f32.mrb[36].mxu1 }
 0x15e   :  { %v560_v35 = vadd.f32 %v2341_v3, %v559_v33  ;;  %v664_v57 = vadd.f32 %v2341_v3, %v663_v34  ;;  %v561_v36 = vpop.f32.mrb[37].mxu0  ;;  %v665_v37 = vpop.f32.mrb[37].mxu1 }
 0x15f   :  { %1689 = vst [vmem:[%s2496_s4 + $0x40] sm:$0xff] %v1600_v31   ;;  %1702 = vst [vmem:[%s2496_s4 + $0xa8] sm:$0xff] %v1665_v32   ;;  %v562_v56 = vpop.f32.mrb[38].mxu0  ;;  %v666_v38 = vpop.f32.mrb[38].mxu1 }
 0x160   :  { %v704_v39 = vmax.f32 %v560_v35, 0.0  ;;  %v730_v41 = vmax.f32 %v664_v57, 0.0  ;;  %v563_v53 = vadd.f32 %v2341_v3, %v562_v56  ;;  %v667_v44 = vadd.f32 %v2341_v3, %v666_v38  ;;  %v564_v49 = vpop.f32.mrb[39].mxu0  ;;  %v668_v52 = vpop.f32.mrb[39].mxu1 }
 0x161   :  { %v1035_v51 = vpop.permute.xlu1 %1034  ;;  %v1032_v21 = vpop.permute.xlu0 %1031 }
 0x162   :  { %v1104_v45 = vsel %vm1054_vm6, %v704_v39, 0.0  ;;  %v705_v43 = vmax.f32 %v563_v53, 0.0  ;;  %v731_v48 = vmax.f32 %v667_v44, 0.0  ;;  %v1130_v6 = vsel %vm1080_vm9, %v730_v41, 0.0 }
 0x163   :  { %vm1085_vm0 = vcmp.eq.s32.totalorder %v1035_v51, 1  ;;  %vm1084_vm1 = vcmp.eq.s32.totalorder %v1032_v21, 1 }
 0x164   :  { %v1105_v7 = vsel %vm1055_vm7, %v705_v43, 0.0  ;;  %v1131_v8 = vsel %vm1081_vm8, %v731_v48, 0.0 }
 0x165   :  { %v1605_v9 = vpack.c.bf16 %v1105_v7, %v1104_v45  ;;  %v1670_v10 = vpack.c.bf16 %v1131_v8, %v1130_v6  ;;  %v567_v11 = vpop.f32.mrb[40].mxu0  ;;  %v671_v12 = vpop.f32.mrb[40].mxu1 }
 0x166   :  { %v568_v13 = vadd.f32 %v2341_v3, %v567_v11  ;;  %v672_v59 = vadd.f32 %v2341_v3, %v671_v12  ;;  %v569_v14 = vpop.f32.mrb[41].mxu0  ;;  %v673_v15 = vpop.f32.mrb[41].mxu1 }
 0x167   :  { %1690 = vst [vmem:[%s2496_s4 + $0x48] sm:$0xff] %v1605_v9   ;;  %1703 = vst [vmem:[%s2496_s4 + $0xb0] sm:$0xff] %v1670_v10   ;;  %v570_v58 = vpop.f32.mrb[42].mxu0  ;;  %v674_v16 = vpop.f32.mrb[42].mxu1 }
 0x168   :  { %v706_v17 = vmax.f32 %v568_v13, 0.0  ;;  %v732_v18 = vmax.f32 %v672_v59, 0.0  ;;  %v571_v19 = vadd.f32 %v2341_v3, %v570_v58  ;;  %v675_v40 = vadd.f32 %v2341_v3, %v674_v16  ;;  %v572_v55 = vpop.f32.mrb[43].mxu0  ;;  %v676_v42 = vpop.f32.mrb[43].mxu1 }
 0x16a   :  { %v1106_v20 = vsel %vm1056_vm10, %v706_v17, 0.0  ;;  %v707_v54 = vmax.f32 %v571_v19, 0.0  ;;  %v733_v47 = vmax.f32 %v675_v40, 0.0  ;;  %v1132_v22 = vsel %vm1082_vm13, %v732_v18, 0.0 }
 0x16c   :  { %v1107_v50 = vsel %vm1057_vm11, %v707_v54, 0.0  ;;  %v1133_v46 = vsel %vm1083_vm12, %v733_v47, 0.0 }
 0x16d   :  { %v1610_v23 = vpack.c.bf16 %v1107_v50, %v1106_v20  ;;  %v1675_v0 = vpack.c.bf16 %v1133_v46, %v1132_v22  ;;  %v575_v24 = vpop.f32.mrb[44].mxu0  ;;  %v679_v25 = vpop.f32.mrb[44].mxu1 }
 0x16e   :  { %v576_v26 = vadd.f32 %v2341_v3, %v575_v24  ;;  %v680_v61 = vadd.f32 %v2341_v3, %v679_v25  ;;  %v577_v27 = vpop.f32.mrb[45].mxu0  ;;  %v681_v28 = vpop.f32.mrb[45].mxu1 }
 0x16f   :  { %1691 = vst [vmem:[%s2496_s4 + $0x50] sm:$0xff] %v1610_v23   ;;  %1704 = vst [vmem:[%s2496_s4 + $0xb8] sm:$0xff] %v1675_v0   ;;  %v578_v60 = vpop.f32.mrb[46].mxu0  ;;  %v682_v29 = vpop.f32.mrb[46].mxu1 }
 0x170   :  { %v708_v30 = vmax.f32 %v576_v26, 0.0  ;;  %v734_v31 = vmax.f32 %v680_v61, 0.0  ;;  %v579_v32 = vadd.f32 %v2341_v3, %v578_v60  ;;  %v683_v33 = vadd.f32 %v2341_v3, %v682_v29  ;;  %v580_v34 = vpop.f32.mrb[47].mxu0  ;;  %v684_v35 = vpop.f32.mrb[47].mxu1 }
 0x172   :  { %v1108_v57 = vsel %vm1058_vm14, %v708_v30, 0.0  ;;  %v709_v36 = vmax.f32 %v579_v32, 0.0  ;;  %v735_v37 = vmax.f32 %v683_v33, 0.0  ;;  %v1134_v56 = vsel %vm1084_vm1, %v734_v31, 0.0 }
 0x174   :  { %v1109_v38 = vsel %vm1059_vm15, %v709_v36, 0.0  ;;  %v1135_v39 = vsel %vm1085_vm0, %v735_v37, 0.0 }
 0x175   :  { %v1615_v41 = vpack.c.bf16 %v1109_v38, %v1108_v57  ;;  %v1680_v53 = vpack.c.bf16 %v1135_v39, %v1134_v56  ;;  %v583_v44 = vpop.f32.mrb[48].mxu0 }
 0x176   :  { %v584_v49 = vadd.f32 %v2341_v3, %v583_v44  ;;  %v585_v52 = vpop.f32.mrb[49].mxu0 }
 0x177   :  { %1692 = vst [vmem:[%s2496_s4 + $0x58] sm:$0xff] %v1615_v41   ;;  %1705 = vst [vmem:[%s2496_s4 + $0xc0] sm:$0xff] %v1680_v53   ;;  %v586_v62 = vpop.f32.mrb[50].mxu0 }
 0x178   :  { %v710_v63 = vmax.f32 %v584_v49, 0.0  ;;  %v587_v45 = vadd.f32 %v2341_v3, %v586_v62  ;;  %v588_v43 = vpop.f32.mrb[51].mxu0 }
 0x17a   :  { %v1110_v48 = vsel %vm1060_vm2, %v710_v63, 0.0  ;;  %v711_v4 = vmax.f32 %v587_v45, 0.0 }
 0x17c   :  { %v1111_v5 = vsel %vm1061_vm3, %v711_v4, 0.0 }
 0x17d   :  { %v1620_v6 = vpack.c.bf16 %v1111_v5, %v1110_v48 }
 0x17f   :  { %1693 = vst [vmem:[%s2496_s4 + $0x60] sm:$0xff] %v1620_v6  }

// kernel: net_ptq_forward.9
= control target key start
LH: loop header
LB: loop body
LE: loop exit
PB: predicated region body
PF: predicated region fallthrough
CT: control target
= control target key end

     0   :  { %v740_v1 = vmov 0   ;;  %s972_s1 = inlined_call_operand.vmem [shape: bf16[256,128], index: 1, kind: input, shape index: {}]   ;;  %s973_s0 = inlined_call_operand.vmem [shape: bf16[112,256], index: 0, kind: input, shape index: {}]   ;;  %s974_s3 = inlined_call_operand.vmem [shape: f32[112,1], index: 3, kind: input, shape index: {}]   ;;  %s975_s2 = inlined_call_operand.vmem [shape: f32[1,128], index: 2, kind: input, shape index: {}]   ;;  %s976_s4 = inlined_call_operand.vmem [shape: bf16[112,128], index: 4, kind: output, shape index: {}]  }
   0x1   :  { %v703_v0 = vld [vmem:[%s972_s1 + $0x40] sm:$0xff]   ;;  %702 = vset.pattern.permute.xlu1 %v740_v1  ;;  %701 = vset.pattern.permute.xlu0 %v740_v1  ;;  %v705_v3 = vld [vmem:[%s972_s1 + $0x48] sm:$0xff]   ;;  %v707_v5 = vld [vmem:[%s972_s1 + $0x50] sm:$0xff]  }
   0x2   :  { %v704_v2 = vld [vmem:[%s972_s1] sm:$0xff]   ;;  %626 = vmatprep.subr.bf16.mxu0 %v703_v0  ;;  %684 = vmatprep.subr.bf16.mxu1 %v703_v0  ;;  %v706_v4 = vld [vmem:[%s972_s1 + $0x8] sm:$0xff]   ;;  %v708_v6 = vld [vmem:[%s972_s1 + $0x10] sm:$0xff]  }
   0x3   :  { %627 = vmatpush3.bf16.msra.mxu0 %v704_v2  ;;  %692 = vmatpush3.bf16.msra.mxu1 %v704_v2  ;;  %v709_v7 = vld [vmem:[%s972_s1 + $0x58] sm:$0xff]   ;;  %v711_v9 = vld [vmem:[%s972_s1 + $0x60] sm:$0xff]   ;;  %v713_v11 = vld [vmem:[%s972_s1 + $0x68] sm:$0xff]  }
   0x4   :  { %628 = vmatprep.subr.bf16.mxu0 %v705_v3  ;;  %685 = vmatprep.subr.bf16.mxu1 %v705_v3  ;;  %v710_v8 = vld [vmem:[%s972_s1 + $0x18] sm:$0xff]   ;;  %v712_v10 = vld [vmem:[%s972_s1 + $0x20] sm:$0xff]   ;;  %v714_v14 = vld [vmem:[%s972_s1 + $0x28] sm:$0xff]  }
   0x5   :  { %v721_v12 = vld [vmem:[%s973_s0 + $0x4] ss:$8 sps:$4 sm:$0xff]   ;;  %v715_v15 = vld [vmem:[%s972_s1 + $0x70] sm:$0xff]   ;;  %v717_v17 = vld [vmem:[%s972_s1 + $0x78] sm:$0xff]  }
   0x6   :  { %v724_v13 = vld [vmem:[%s973_s0 + $0x44] ss:$8 sps:$4 sm:$0xff]   ;;  %269 = vmatprep.mubr.bf16.mxu0 %v721_v12  ;;  %v716_v16 = vld [vmem:[%s972_s1 + $0x30] sm:$0xff]   ;;  %v343_v20 = vld [vmem:[%s974_s3 + $0x18] sm:$0xff] }
   0x7   :  { %629 = vmatpush3.bf16.msra.mxu0 %v706_v4  ;;  %693 = vmatpush3.bf16.msra.mxu1 %v706_v4  ;;  %v342_v18 = vld [vmem:[%s974_s3 + $0x10] sm:$0xff]  ;;  %v340_v19 = vld [vmem:[%s974_s3] sm:$0xff]  ;;  %v341_v21 = vld [vmem:[%s974_s3 + $0x8] sm:$0xff]  ;;  %vm357_vm2 = vcmp.gt.f32.partialorder %v343_v20, 0.5 }
   0x8   :  { %630 = vmatprep.subr.bf16.mxu0 %v707_v5  ;;  %686 = vmatprep.subr.bf16.mxu1 %v707_v5  ;;  %vm356_vm0 = vcmp.gt.f32.partialorder %v342_v18, 0.5  ;;  %vm354_vm1 = vcmp.gt.f32.partialorder %v340_v19, 0.5  ;;  %v718_v22 = vld [vmem:[%s972_s1 + $0x38] sm:$0xff]   ;;  %vm355_vm3 = vcmp.gt.f32.partialorder %v341_v21, 0.5  ;;  %v345_v25 = vld [vmem:[%s974_s3 + $0x28] sm:$0xff]  ;;  %v344_v26 = vld [vmem:[%s974_s3 + $0x20] sm:$0xff] }
   0x9   :  { %301 = vmatprep.mubr.bf16.mxu1 %v724_v13  ;;  %v370_v23 = vsel %vm356_vm0, 1, %v740_v1  ;;  %v368_v24 = vsel %vm354_vm1, 1, %v740_v1  ;;  %v719_v27 = vld [vmem:[%s973_s0] ss:$8 sps:$4 sm:$0xff]   ;;  %v371_v29 = vsel %vm357_vm2, 1, %v740_v1  ;;  %v369_v30 = vsel %vm355_vm3, 1, %v740_v1 }
   0xa   :  { %389 = vperm.xlu1 %702, %v370_v23   ;;  %383 = vperm.xlu0 %701, %v368_v24   ;;  %v722_v28 = vld [vmem:[%s973_s0 + $0x40] ss:$8 sps:$4 sm:$0xff]   ;;  %v725_v31 = vld [vmem:[%s973_s0 + $0x14] ss:$8 sps:$4 sm:$0xff]   ;;  %vm359_vm4 = vcmp.gt.f32.partialorder %v345_v25, 0.5  ;;  %vm358_vm5 = vcmp.gt.f32.partialorder %v344_v26, 0.5 }
   0xb   :  { %631 = vmatpush3.bf16.msra.mxu0 %v708_v6  ;;  %694 = vmatpush3.bf16.msra.mxu1 %v708_v6  ;;  %v727_v32 = vld [vmem:[%s973_s0 + $0x54] ss:$8 sps:$4 sm:$0xff]   ;;  %v373_v35 = vsel %vm359_vm4, 1, %v740_v1  ;;  %v372_v36 = vsel %vm358_vm5, 1, %v740_v1  ;;  %v349_v37 = vld [vmem:[%s974_s3 + $0x48] sm:$0xff]  ;;  %v348_v38 = vld [vmem:[%s974_s3 + $0x40] sm:$0xff] }
   0xc   :  { %632 = vmatprep.subr.bf16.mxu0 %v709_v7  ;;  %687 = vmatprep.subr.bf16.mxu1 %v709_v7  ;;  %v347_v33 = vld [vmem:[%s974_s3 + $0x38] sm:$0xff]  ;;  %v346_v34 = vld [vmem:[%s974_s3 + $0x30] sm:$0xff]  ;;  %v731_v43 = vld [vmem:[%s973_s0 + $0x24] ss:$8 sps:$4 sm:$0xff]   ;;  %vm363_vm8 = vcmp.gt.f32.partialorder %v349_v37, 0.5  ;;  %vm362_vm9 = vcmp.gt.f32.partialorder %v348_v38, 0.5 }
   0xd   :  { %vm361_vm6 = vcmp.gt.f32.partialorder %v347_v33, 0.5  ;;  %vm360_vm7 = vcmp.gt.f32.partialorder %v346_v34, 0.5  ;;  %v729_v39 = vld [vmem:[%s973_s0 + $0x10] ss:$8 sps:$4 sm:$0xff]   ;;  %v733_v44 = vld [vmem:[%s973_s0 + $0x64] ss:$8 sps:$4 sm:$0xff]  }
   0xe   :  { %392 = vperm.xlu1 %702, %v371_v29   ;;  %386 = vperm.xlu0 %701, %v369_v30   ;;  %v730_v40 = vld [vmem:[%s973_s0 + $0x50] ss:$8 sps:$4 sm:$0xff]   ;;  %v375_v41 = vsel %vm361_vm6, 1, %v740_v1  ;;  %v374_v42 = vsel %vm360_vm7, 1, %v740_v1  ;;  %v377_v47 = vsel %vm363_vm8, 1, %v740_v1  ;;  %v376_v48 = vsel %vm362_vm9, 1, %v740_v1 }
   0xf   :  { %633 = vmatpush3.bf16.msra.mxu0 %v710_v8  ;;  %695 = vmatpush3.bf16.msra.mxu1 %v710_v8  ;;  %v351_v45 = vld [vmem:[%s974_s3 + $0x58] sm:$0xff]  ;;  %v350_v46 = vld [vmem:[%s974_s3 + $0x50] sm:$0xff]  ;;  %v353_v49 = vld [vmem:[%s974_s3 + $0x68] sm:$0xff] }
  0x10   :  { %634 = vmatprep.subr.bf16.mxu0 %v711_v9  ;;  %688 = vmatprep.subr.bf16.mxu1 %v711_v9  ;;  %vm365_vm10 = vcmp.gt.f32.partialorder %v351_v45, 0.5  ;;  %vm364_vm11 = vcmp.gt.f32.partialorder %v350_v46, 0.5  ;;  %v352_v50 = vld [vmem:[%s974_s3 + $0x60] sm:$0xff]  ;;  %v737_v55 = vld [vmem:[%s973_s0 + $0x34] ss:$8 sps:$4 sm:$0xff]   ;;  %vm367_vm12 = vcmp.gt.f32.partialorder %v353_v49, 0.5 }
  0x11   :  { %v735_v51 = vld [vmem:[%s973_s0 + $0x20] ss:$8 sps:$4 sm:$0xff]   ;;  %v379_v53 = vsel %vm365_vm10, 1, %v740_v1  ;;  %v378_v54 = vsel %vm364_vm11, 1, %v740_v1  ;;  %vm366_vm13 = vcmp.gt.f32.partialorder %v352_v50, 0.5  ;;  %v381_v56 = vsel %vm367_vm12, 1, %v740_v1 }
  0x12   :  { %398 = vperm.xlu1 %702, %v373_v35   ;;  %395 = vperm.xlu0 %701, %v372_v36   ;;  %v736_v52 = vld [vmem:[%s973_s0 + $0x60] ss:$8 sps:$4 sm:$0xff]   ;;  %v380_v57 = vsel %vm366_vm13, 1, %v740_v1  ;;  %v739_v58 = vld [vmem:[%s973_s0 + $0x30] ss:$8 sps:$4 sm:$0xff]  }
  0x13   :  { %635 = vmatpush3.bf16.msra.mxu0 %v712_v10  ;;  %696 = vmatpush3.bf16.msra.mxu1 %v712_v10  ;;  %v929_v5 = vld [vmem:[%s975_s2] ss:$0 sm:$0xff] }
  0x14   :  { %636 = vmatprep.subr.bf16.mxu0 %v713_v11  ;;  %689 = vmatprep.subr.bf16.mxu1 %v713_v11 }
  0x16   :  { %404 = vperm.xlu1 %702, %v375_v41   ;;  %401 = vperm.xlu0 %701, %v374_v42  }
  0x17   :  { %637 = vmatpush3.bf16.msra.mxu0 %v714_v14  ;;  %697 = vmatpush3.bf16.msra.mxu1 %v714_v14 }
  0x18   :  { %638 = vmatprep.subr.bf16.mxu0 %v715_v15  ;;  %690 = vmatprep.subr.bf16.mxu1 %v715_v15 }
  0x1a   :  { %410 = vperm.xlu1 %702, %v377_v47   ;;  %407 = vperm.xlu0 %701, %v376_v48  }
  0x1b   :  { %639 = vmatpush3.bf16.msra.mxu0 %v716_v16  ;;  %698 = vmatpush3.bf16.msra.mxu1 %v716_v16 }
  0x1c   :  { %640 = vmatprep.subr.bf16.mxu0 %v717_v17  ;;  %691 = vmatprep.subr.bf16.mxu1 %v717_v17 }
  0x1e   :  { %416 = vperm.xlu1 %702, %v379_v53   ;;  %413 = vperm.xlu0 %701, %v378_v54  }
  0x1f   :  { %641 = vmatpush3.bf16.msra.mxu0 %v718_v22  ;;  %699 = vmatpush3.bf16.msra.mxu1 %v718_v22 }
  0x22   :  { %270 = vmatmul.mubr.bf16.vlgmr.msra.gmra.mrb[0].mxu0 %v719_v27  ;;  %302 = vmatmul.mubr.bf16.vlgmr.msra.gmra.mrb[0].mxu1 %v722_v28 }
  0x23   :  { %277 = vmatprep.mubr.bf16.mxu0 %v725_v31  ;;  %309 = vmatprep.mubr.bf16.mxu1 %v727_v32 }
  0x24   :  { %422 = vperm.xlu1 %702, %v381_v56   ;;  %419 = vperm.xlu0 %701, %v380_v57  }
  0x2a   :  { %278 = vmatmul.mubr.bf16.gmra.mrb[4].mxu0 %v729_v39  ;;  %310 = vmatmul.mubr.bf16.gmra.mrb[4].mxu1 %v730_v40 }
  0x2b   :  { %285 = vmatprep.mubr.bf16.mxu0 %v731_v43  ;;  %317 = vmatprep.mubr.bf16.mxu1 %v733_v44 }
  0x32   :  { %286 = vmatmul.mubr.bf16.gmra.mrb[8].mxu0 %v735_v51  ;;  %318 = vmatmul.mubr.bf16.gmra.mrb[8].mxu1 %v736_v52 }
  0x33   :  { %293 = vmatprep.mubr.bf16.mxu0 %v737_v55 }
  0x3a   :  { %294 = vmatmul.mubr.bf16.gmra.mrb[12].mxu0 %v739_v58 }
  0x89   :  { %v384_v59 = vpop.permute.xlu0 %383  ;;  %v914_v60 = vpop.permute.xlu1 %389 }
  0x8a   :  { %vm424_vm14 = vcmp.eq.s32.totalorder %v384_v59, 1  ;;  %vm426_vm2 = vcmp.eq.s32.totalorder %v914_v60, 1 }
  0x8d   :  { %v387_v61 = vpop.permute.xlu0 %386  ;;  %v916_v62 = vpop.permute.xlu1 %392 }
  0x8e   :  { %vm425_vm0 = vcmp.eq.s32.totalorder %v387_v61, 1  ;;  %vm427_vm4 = vcmp.eq.s32.totalorder %v916_v62, 1 }
  0x91   :  { %v918_v63 = vpop.permute.xlu0 %395  ;;  %v920_v0 = vpop.permute.xlu1 %398 }
  0x92   :  { %vm428_vm6 = vcmp.eq.s32.totalorder %v918_v63, 1  ;;  %vm429_vm7 = vcmp.eq.s32.totalorder %v920_v0, 1 }
  0x95   :  { %v922_v2 = vpop.permute.xlu0 %401  ;;  %v924_v1 = vpop.permute.xlu1 %404 }
  0x96   :  { %vm431_vm10 = vcmp.eq.s32.totalorder %v924_v1, 1  ;;  %vm430_vm11 = vcmp.eq.s32.totalorder %v922_v2, 1 }
  0x99   :  { %v408_v14 = vpop.permute.xlu0 %407  ;;  %v411_v19 = vpop.permute.xlu1 %410 }
  0x9a   :  { %vm432_vm15 = vcmp.eq.s32.totalorder %v408_v14, 1  ;;  %vm433_vm1 = vcmp.eq.s32.totalorder %v411_v19, 1 }
  0x9d   :  { %v417_v50 = vpop.permute.xlu1 %416  ;;  %v414_v51 = vpop.permute.xlu0 %413 }
  0x9e   :  { %vm434_vm3 = vcmp.eq.s32.totalorder %v414_v51, 1  ;;  %vm435_vm5 = vcmp.eq.s32.totalorder %v417_v50, 1 }
  0xf5   :  { %v642_v3 = vpop.f32.mrb[0].mxu0  ;;  %v666_v4 = vpop.f32.mrb[0].mxu1 }
  0xf6   :  { %v643_v6 = vpop.f32.mrb[1].mxu0  ;;  %v667_v7 = vpop.f32.mrb[1].mxu1 }
  0xf7   :  { %v644_v8 = vadd.f32 %v643_v6, %v642_v3  ;;  %v668_v9 = vadd.f32 %v667_v7, %v666_v4  ;;  %v645_v10 = vpop.f32.mrb[2].mxu0  ;;  %v669_v11 = vpop.f32.mrb[2].mxu1 }
  0xf8   :  { %v646_v12 = vpop.f32.mrb[3].mxu0  ;;  %v670_v13 = vpop.f32.mrb[3].mxu1 }
  0xf9   :  { %v272_v15 = vadd.f32 %v644_v8, %v929_v5  ;;  %v304_v16 = vadd.f32 %v668_v9, %v929_v5  ;;  %v647_v17 = vadd.f32 %v646_v12, %v645_v10  ;;  %v671_v18 = vadd.f32 %v670_v13, %v669_v11 }
  0xfb   :  { %v326_v20 = vmax.f32 %v272_v15, 0.0  ;;  %v334_v21 = vmax.f32 %v304_v16, 0.0  ;;  %v275_v22 = vadd.f32 %v647_v17, %v929_v5  ;;  %v307_v23 = vadd.f32 %v671_v18, %v929_v5  ;;  %v423_v15 = vpop.permute.xlu1 %422  ;;  %v420_v16 = vpop.permute.xlu0 %419 }
  0xfc   :  { %vm437_vm8 = vcmp.eq.s32.totalorder %v423_v15, 1  ;;  %vm436_vm9 = vcmp.eq.s32.totalorder %v420_v16, 1 }
  0xfd   :  { %v446_v24 = vsel %vm432_vm15, %v334_v21, 0.0  ;;  %v327_v25 = vmax.f32 %v275_v22, 0.0  ;;  %v335_v26 = vmax.f32 %v307_v23, 0.0  ;;  %v648_v27 = vpop.f32.mrb[4].mxu0  ;;  %v672_v28 = vpop.f32.mrb[4].mxu1  ;;  %v438_v29 = vsel %vm424_vm14, %v326_v20, 0.0 }
  0xfe   :  { %v649_v30 = vpop.f32.mrb[5].mxu0  ;;  %v673_v31 = vpop.f32.mrb[5].mxu1 }
  0xff   :  { %v439_v32 = vsel %vm425_vm0, %v327_v25, 0.0  ;;  %v447_v33 = vsel %vm433_vm1, %v335_v26, 0.0  ;;  %v650_v34 = vadd.f32 %v649_v30, %v648_v27  ;;  %v674_v35 = vadd.f32 %v673_v31, %v672_v28  ;;  %v651_v36 = vpop.f32.mrb[6].mxu0  ;;  %v675_v37 = vpop.f32.mrb[6].mxu1 }
 0x100   :  { %v588_v38 = vpack.c.bf16 %v439_v32, %v438_v29  ;;  %v608_v39 = vpack.c.bf16 %v447_v33, %v446_v24  ;;  %v652_v40 = vpop.f32.mrb[7].mxu0  ;;  %v676_v41 = vpop.f32.mrb[7].mxu1 }
 0x101   :  { %v280_v42 = vadd.f32 %v650_v34, %v929_v5  ;;  %v312_v43 = vadd.f32 %v674_v35, %v929_v5  ;;  %v653_v44 = vadd.f32 %v652_v40, %v651_v36  ;;  %v677_v45 = vadd.f32 %v676_v41, %v675_v37 }
 0x102   :  { %589 = vst [vmem:[%s976_s4] sm:$0xff] %v588_v38   ;;  %623 = vst [vmem:[%s976_s4 + $0x20] sm:$0xff] %v608_v39  }
 0x103   :  { %v328_v46 = vmax.f32 %v280_v42, 0.0  ;;  %v336_v47 = vmax.f32 %v312_v43, 0.0  ;;  %v283_v48 = vadd.f32 %v653_v44, %v929_v5  ;;  %v315_v49 = vadd.f32 %v677_v45, %v929_v5 }
 0x105   :  { %v329_v52 = vmax.f32 %v283_v48, 0.0  ;;  %v337_v53 = vmax.f32 %v315_v49, 0.0  ;;  %v654_v54 = vpop.f32.mrb[8].mxu0  ;;  %v678_v55 = vpop.f32.mrb[8].mxu1  ;;  %v440_v56 = vsel %vm426_vm2, %v328_v46, 0.0  ;;  %v448_v57 = vsel %vm434_vm3, %v336_v47, 0.0 }
 0x106   :  { %v655_v58 = vpop.f32.mrb[9].mxu0  ;;  %v679_v59 = vpop.f32.mrb[9].mxu1 }
 0x107   :  { %v441_v61 = vsel %vm427_vm4, %v329_v52, 0.0  ;;  %v449_v3 = vsel %vm435_vm5, %v337_v53, 0.0  ;;  %v656_v4 = vadd.f32 %v655_v58, %v654_v54  ;;  %v680_v6 = vadd.f32 %v679_v59, %v678_v55  ;;  %v657_v7 = vpop.f32.mrb[10].mxu0  ;;  %v681_v8 = vpop.f32.mrb[10].mxu1 }
 0x108   :  { %v593_v9 = vpack.c.bf16 %v441_v61, %v440_v56  ;;  %v613_v60 = vpack.c.bf16 %v449_v3, %v448_v57  ;;  %v658_v10 = vpop.f32.mrb[11].mxu0  ;;  %v682_v11 = vpop.f32.mrb[11].mxu1 }
 0x109   :  { %v288_v12 = vadd.f32 %v656_v4, %v929_v5  ;;  %v320_v13 = vadd.f32 %v680_v6, %v929_v5  ;;  %v659_v62 = vadd.f32 %v658_v10, %v657_v7  ;;  %v683_v14 = vadd.f32 %v682_v11, %v681_v8 }
 0x10a   :  { %620 = vst [vmem:[%s976_s4 + $0x8] sm:$0xff] %v593_v9   ;;  %624 = vst [vmem:[%s976_s4 + $0x28] sm:$0xff] %v613_v60  }
 0x10b   :  { %v330_v17 = vmax.f32 %v288_v12, 0.0  ;;  %v338_v18 = vmax.f32 %v320_v13, 0.0  ;;  %v291_v19 = vadd.f32 %v659_v62, %v929_v5  ;;  %v323_v20 = vadd.f32 %v683_v14, %v929_v5 }
 0x10d   :  { %v331_v21 = vmax.f32 %v291_v19, 0.0  ;;  %v339_v22 = vmax.f32 %v323_v20, 0.0  ;;  %v660_v23 = vpop.f32.mrb[12].mxu0  ;;  %v442_v24 = vsel %vm428_vm6, %v330_v17, 0.0  ;;  %v450_v26 = vsel %vm436_vm9, %v338_v18, 0.0 }
 0x10e   :  { %v661_v25 = vpop.f32.mrb[13].mxu0 }
 0x10f   :  { %v443_v27 = vsel %vm429_vm7, %v331_v21, 0.0  ;;  %v451_v28 = vsel %vm437_vm8, %v339_v22, 0.0  ;;  %v662_v29 = vadd.f32 %v661_v25, %v660_v23  ;;  %v663_v30 = vpop.f32.mrb[14].mxu0 }
 0x110   :  { %v598_v31 = vpack.c.bf16 %v443_v27, %v442_v24  ;;  %v618_v32 = vpack.c.bf16 %v451_v28, %v450_v26  ;;  %v664_v33 = vpop.f32.mrb[15].mxu0 }
 0x111   :  { %v296_v34 = vadd.f32 %v662_v29, %v929_v5  ;;  %v665_v63 = vadd.f32 %v664_v33, %v663_v30 }
 0x112   :  { %621 = vst [vmem:[%s976_s4 + $0x10] sm:$0xff] %v598_v31   ;;  %625 = vst [vmem:[%s976_s4 + $0x30] sm:$0xff] %v618_v32  }
 0x113   :  { %v332_v0 = vmax.f32 %v296_v34, 0.0  ;;  %v299_v35 = vadd.f32 %v665_v63, %v929_v5 }
 0x115   :  { %v333_v36 = vmax.f32 %v299_v35, 0.0  ;;  %v444_v37 = vsel %vm430_vm11, %v332_v0, 0.0 }
 0x117   :  { %v445_v38 = vsel %vm431_vm10, %v333_v36, 0.0 }
 0x118   :  { %v603_v39 = vpack.c.bf16 %v445_v38, %v444_v37 }
 0x11a   :  { %622 = vst [vmem:[%s976_s4 + $0x18] sm:$0xff] %v603_v39  }

// kernel: net_ptq_forward.10
= control target key start
LH: loop header
LB: loop body
LE: loop exit
PB: predicated region body
PF: predicated region fallthrough
CT: control target
= control target key end

     0   :  { %v784_v1 = vmov 0   ;;  %vm375_vm0 = vcmask 523264   ;;  %s977_s1 = inlined_call_operand.vmem [shape: bf16[576,128], index: 1, kind: input, shape index: {}]   ;;  %s978_s0 = inlined_call_operand.vmem [shape: bf16[32,576], index: 0, kind: input, shape index: {}]   ;;  %s979_s3 = inlined_call_operand.vmem [shape: f32[32,1], index: 3, kind: input, shape index: {}]   ;;  %s980_s2 = inlined_call_operand.vmem [shape: f32[1,128], index: 2, kind: input, shape index: {}]   ;;  %s981_s4 = inlined_call_operand.vmem [shape: bf16[32,128], index: 4, kind: output, shape index: {}]  }
   0x1   :  { %v734_v0 = vld [vmem:[%s977_s1 + $0x40] sm:$0xff]   ;;  %733 = vset.pattern.permute.xlu1 %v784_v1  ;;  %732 = vset.pattern.permute.xlu0 %v784_v1  ;;  %v738_v5 = vld [vmem:[%s977_s1 + $0x48] sm:$0xff]   ;;  %v742_v9 = vld [vmem:[%s977_s1 + $0x50] sm:$0xff]  }
   0x2   :  { %v735_v2 = vld [vmem:[%s977_s1] sm:$0xff]   ;;  %657 = vmatprep.subr.bf16.mxu0 %v734_v0  ;;  %v739_v6 = vld [vmem:[%s977_s1 + $0x8] sm:$0xff]   ;;  %v743_v10 = vld [vmem:[%s977_s1 + $0x10] sm:$0xff]  }
   0x3   :  { %v736_v3 = vld [vmem:[%s977_s1 + $0xc0] sm:$0xff]   ;;  %658 = vmatpush3.bf16.msra.mxu0 %v735_v2  ;;  %v740_v7 = vld [vmem:[%s977_s1 + $0xc8] sm:$0xff]   ;;  %v744_v11 = vld [vmem:[%s977_s1 + $0xd0] sm:$0xff]  }
   0x4   :  { %v737_v4 = vld [vmem:[%s977_s1 + $0x80] sm:$0xff]   ;;  %685 = vmatprep.subr.bf16.mxu1 %v736_v3  ;;  %659 = vmatprep.subr.bf16.mxu0 %v738_v5  ;;  %v741_v8 = vld [vmem:[%s977_s1 + $0x88] sm:$0xff]   ;;  %v745_v12 = vld [vmem:[%s977_s1 + $0x90] sm:$0xff]  }
   0x5   :  { %686 = vmatpush3.bf16.msra.mxu1 %v737_v4  ;;  %v746_v13 = vld [vmem:[%s977_s1 + $0x58] sm:$0xff]   ;;  %v750_v17 = vld [vmem:[%s977_s1 + $0x60] sm:$0xff]   ;;  %v754_v21 = vld [vmem:[%s977_s1 + $0x68] sm:$0xff]  }
   0x6   :  { %687 = vmatprep.subr.bf16.mxu1 %v740_v7  ;;  %v747_v14 = vld [vmem:[%s977_s1 + $0x18] sm:$0xff]   ;;  %v751_v18 = vld [vmem:[%s977_s1 + $0x20] sm:$0xff]   ;;  %v755_v22 = vld [vmem:[%s977_s1 + $0x28] sm:$0xff]  }
   0x7   :  { %660 = vmatpush3.bf16.msra.mxu0 %v739_v6  ;;  %v748_v15 = vld [vmem:[%s977_s1 + $0xd8] sm:$0xff]   ;;  %v752_v19 = vld [vmem:[%s977_s1 + $0xe0] sm:$0xff]   ;;  %v756_v23 = vld [vmem:[%s977_s1 + $0xe8] sm:$0xff]  }
   0x8   :  { %661 = vmatprep.subr.bf16.mxu0 %v742_v9  ;;  %v749_v16 = vld [vmem:[%s977_s1 + $0x98] sm:$0xff]   ;;  %v753_v20 = vld [vmem:[%s977_s1 + $0xa0] sm:$0xff]   ;;  %v757_v24 = vld [vmem:[%s977_s1 + $0xa8] sm:$0xff]  }
   0x9   :  { %688 = vmatpush3.bf16.msra.mxu1 %v741_v8  ;;  %v758_v25 = vld [vmem:[%s977_s1 + $0x70] sm:$0xff]   ;;  %v762_v29 = vld [vmem:[%s977_s1 + $0x78] sm:$0xff]   ;;  %v769_v35 = vld [vmem:[%s977_s1 + $0x100] sm:$0xff]  }
   0xa   :  { %689 = vmatprep.subr.bf16.mxu1 %v744_v11  ;;  %v759_v26 = vld [vmem:[%s977_s1 + $0x30] sm:$0xff]   ;;  %v763_v30 = vld [vmem:[%s977_s1 + $0x38] sm:$0xff]   ;;  %v772_v37 = vld [vmem:[%s978_s0 + $0xc] ss:$20 sps:$4 sm:$0xff]  }
   0xb   :  { %662 = vmatpush3.bf16.msra.mxu0 %v743_v10  ;;  %v760_v27 = vld [vmem:[%s977_s1 + $0xf0] sm:$0xff]   ;;  %v764_v31 = vld [vmem:[%s977_s1 + $0xf8] sm:$0xff]   ;;  %v773_v38 = vld [vmem:[%s977_s1 + $0x108] sm:$0xff]   ;;  %463 = vmatprep.mubr.bf16.mxu1 %v772_v37 }
   0xc   :  { %663 = vmatprep.subr.bf16.mxu0 %v746_v13  ;;  %v761_v28 = vld [vmem:[%s977_s1 + $0xb0] sm:$0xff]   ;;  %v767_v33 = vld [vmem:[%s978_s0 + $0x4] ss:$20 sps:$4 sm:$0xff]   ;;  %v770_v36 = vld [vmem:[%s978_s0 + $0x8] ss:$20 sps:$4 sm:$0xff]  }
   0xd   :  { %690 = vmatpush3.bf16.msra.mxu1 %v745_v12  ;;  %v765_v32 = vld [vmem:[%s978_s0] ss:$20 sps:$4 sm:$0xff]   ;;  %v768_v34 = vld [vmem:[%s977_s1 + $0xb8] sm:$0xff]   ;;  %414 = vmatprep.mubr.bf16.mxu0 %v767_v33  ;;  %v780_v43 = vld [vmem:[%s978_s0 + $0x30] ss:$20 sps:$4 sm:$0xff]  }
   0xe   :  { %691 = vmatprep.subr.bf16.mxu1 %v748_v15  ;;  %v774_v39 = vld [vmem:[%s978_s0 + $0x2c] ss:$20 sps:$4 sm:$0xff]   ;;  %v776_v40 = vld [vmem:[%s978_s0 + $0x28] ss:$20 sps:$4 sm:$0xff]   ;;  %v777_v41 = vld [vmem:[%s977_s1 + $0x110] sm:$0xff]  }
   0xf   :  { %664 = vmatpush3.bf16.msra.mxu0 %v747_v14  ;;  %v778_v42 = vld [vmem:[%s978_s0 + $0x34] ss:$20 sps:$4 sm:$0xff]   ;;  %v781_v44 = vld [vmem:[%s977_s1 + $0x118] sm:$0xff]   ;;  %v782_v45 = vld [vmem:[%s978_s0 + $0x10] ss:$20 sps:$4 sm:$0xff]  }
  0x10   :  { %665 = vmatprep.subr.bf16.mxu0 %v750_v17  ;;  %v535_v46 = vld [vmem:[%s979_s3 + $0x10] sm:$0xff]  ;;  %v533_v47 = vld [vmem:[%s979_s3] sm:$0xff]  ;;  %v536_v48 = vld [vmem:[%s979_s3 + $0x18] sm:$0xff] }
  0x11   :  { %692 = vmatpush3.bf16.msra.mxu1 %v749_v16  ;;  %vm539_vm1 = vcmp.gt.f32.partialorder %v535_v46, 0.5  ;;  %vm537_vm2 = vcmp.gt.f32.partialorder %v533_v47, 0.5  ;;  %v534_v49 = vld [vmem:[%s979_s3 + $0x8] sm:$0xff]  ;;  %vm540_vm3 = vcmp.gt.f32.partialorder %v536_v48, 0.5  ;;  %v589_v56 = vld [vmem:[%s980_s2] ss:$0 sm:$0xff] }
  0x12   :  { %693 = vmatprep.subr.bf16.mxu1 %v752_v19  ;;  %v543_v50 = vsel %vm539_vm1, 1, %v784_v1  ;;  %v541_v51 = vsel %vm537_vm2, 1, %v784_v1  ;;  %vm538_vm4 = vcmp.gt.f32.partialorder %v534_v49, 0.5  ;;  %v783_v52 = vld [vmem:[%s978_s0 + $0x38] ss:$20 sps:$4 sm:$0xff]   ;;  %v544_v53 = vsel %vm540_vm3, 1, %v784_v1 }
  0x13   :  { %666 = vmatpush3.bf16.msra.mxu0 %v751_v18  ;;  %552 = vperm.xlu1 %733, %v543_v50   ;;  %v542_v54 = vsel %vm538_vm4, 1, %v784_v1 }
  0x14   :  { %667 = vmatprep.subr.bf16.mxu0 %v754_v21  ;;  %546 = vperm.xlu0 %732, %v541_v51  }
  0x15   :  { %694 = vmatpush3.bf16.msra.mxu1 %v753_v20 }
  0x16   :  { %695 = vmatprep.subr.bf16.mxu1 %v756_v23 }
  0x17   :  { %668 = vmatpush3.bf16.msra.mxu0 %v755_v22  ;;  %555 = vperm.xlu1 %733, %v544_v53  }
  0x18   :  { %669 = vmatprep.subr.bf16.mxu0 %v758_v25  ;;  %549 = vperm.xlu0 %732, %v542_v54  }
  0x19   :  { %696 = vmatpush3.bf16.msra.mxu1 %v757_v24 }
  0x1a   :  { %697 = vmatprep.subr.bf16.mxu1 %v760_v27 }
  0x1b   :  { %670 = vmatpush3.bf16.msra.mxu0 %v759_v26 }
  0x1c   :  { %671 = vmatprep.subr.bf16.mxu0 %v762_v29 }
  0x1d   :  { %698 = vmatpush3.bf16.msra.mxu1 %v761_v28 }
  0x1e   :  { %699 = vmatprep.subr.bf16.mxu1 %v764_v31 }
  0x1f   :  { %672 = vmatpush3.bf16.msra.mxu0 %v763_v30 }
  0x20   :  { %719 = vmatprep.subr.bf16.mxu0 %v769_v35 }
  0x21   :  { %700 = vmatpush3.bf16.msra.mxu1 %v768_v34 }
  0x22   :  { %415 = vmatmul.mubr.bf16.vlgmr.msra.gmra.mrb[0].mxu0 %v765_v32 }
  0x23   :  { %720 = vmatpush3.bf16.msra.mxu0 %v769_v35  ;;  %422 = vmatprep.mubr.bf16.mxu0 %v774_v39 }
  0x24   :  { %464 = vmatmul.mubr.bf16.vlgmr.msra.gmra.mrb[0].mxu1 %v770_v36  ;;  %721 = vmatprep.subr.bf16.mxu0 %v773_v38 }
  0x25   :  { %471 = vmatprep.mubr.bf16.mxu1 %v778_v42 }
  0x27   :  { %722 = vmatpush3.bf16.msra.mxu0 %v773_v38 }
  0x28   :  { %723 = vmatprep.subr.bf16.mxu0 %v777_v41 }
  0x2a   :  { %423 = vmatmul.mubr.bf16.gmra.mrb[4].mxu0 %v776_v40 }
  0x2b   :  { %727 = vmatprep.mubr.msk.bf16.mxu0 %vm375_vm0, %v782_v45  ;;  %724 = vmatpush3.bf16.msra.mxu0 %v777_v41 }
  0x2c   :  { %472 = vmatmul.mubr.bf16.gmra.mrb[4].mxu1 %v780_v43  ;;  %725 = vmatprep.subr.bf16.mxu0 %v781_v44 }
  0x2f   :  { %726 = vmatpush3.bf16.msra.mxu0 %v781_v44 }
  0x32   :  { %728 = vmatmul.mubr.msk.bf16.vlgmr.msra.gmra.mrb[8].mxu0 %vm375_vm0, %v783_v52 }
  0x92   :  { %v553_v21 = vpop.permute.xlu1 %552 }
  0x93   :  { %v547_v23 = vpop.permute.xlu0 %546  ;;  %vm559_vm5 = vcmp.eq.s32.totalorder %v553_v21, 1 }
  0x94   :  { %vm557_vm7 = vcmp.eq.s32.totalorder %v547_v23, 1 }
  0x96   :  { %v556_v33 = vpop.permute.xlu1 %555 }
  0x97   :  { %v550_v36 = vpop.permute.xlu0 %549  ;;  %vm560_vm6 = vcmp.eq.s32.totalorder %v556_v33, 1 }
  0x98   :  { %vm558_vm8 = vcmp.eq.s32.totalorder %v550_v36, 1 }
  0xf5   :  { %v673_v55 = vpop.f32.mrb[0].mxu0 }
  0xf6   :  { %v674_v57 = vpop.f32.mrb[1].mxu0 }
  0xf7   :  { %v675_v58 = vadd.f32 %v674_v57, %v673_v55  ;;  %v676_v59 = vpop.f32.mrb[2].mxu0  ;;  %v701_v60 = vpop.f32.mrb[0].mxu1 }
  0xf8   :  { %v677_v61 = vpop.f32.mrb[3].mxu0  ;;  %v702_v0 = vpop.f32.mrb[1].mxu1 }
  0xf9   :  { %v417_v62 = vadd.f32 %v675_v58, %v589_v56  ;;  %v678_v63 = vadd.f32 %v677_v61, %v676_v59  ;;  %v703_v2 = vadd.f32 %v702_v0, %v701_v60  ;;  %v704_v1 = vpop.f32.mrb[2].mxu1 }
  0xfa   :  { %v705_v4 = vpop.f32.mrb[3].mxu1 }
  0xfb   :  { %v420_v3 = vadd.f32 %v678_v63, %v589_v56  ;;  %v706_v5 = vadd.f32 %v705_v4, %v704_v1  ;;  %v466_v6 = vadd.f32 %v703_v2, %v417_v62 }
  0xfd   :  { %v679_v7 = vpop.f32.mrb[4].mxu0  ;;  %v469_v9 = vadd.f32 %v706_v5, %v420_v3 }
  0xfe   :  { %v680_v8 = vpop.f32.mrb[5].mxu0 }
  0xff   :  { %v681_v10 = vadd.f32 %v680_v8, %v679_v7  ;;  %v682_v11 = vpop.f32.mrb[6].mxu0  ;;  %v707_v12 = vpop.f32.mrb[4].mxu1 }
 0x100   :  { %v683_v13 = vpop.f32.mrb[7].mxu0  ;;  %v708_v16 = vpop.f32.mrb[5].mxu1 }
 0x101   :  { %v425_v14 = vadd.f32 %v681_v10, %v589_v56  ;;  %v684_v15 = vadd.f32 %v683_v13, %v682_v11  ;;  %v709_v17 = vadd.f32 %v708_v16, %v707_v12  ;;  %v710_v18 = vpop.f32.mrb[6].mxu1 }
 0x102   :  { %v711_v20 = vpop.f32.mrb[7].mxu1 }
 0x103   :  { %v428_v19 = vadd.f32 %v684_v15, %v589_v56  ;;  %v712_v22 = vadd.f32 %v711_v20, %v710_v18  ;;  %v474_v24 = vadd.f32 %v709_v17, %v425_v14 }
 0x105   :  { %v729_v25 = vpop.f32.mrb[8].mxu0  ;;  %v477_v26 = vadd.f32 %v712_v22, %v428_v19 }
 0x106   :  { %v523_v27 = vadd.f32 %v729_v25, %v474_v24  ;;  %v514_v28 = vpop.f32.mrb[9].mxu0 }
 0x107   :  { %v515_v29 = vadd.f32 %v514_v28, %v466_v6  ;;  %v730_v30 = vpop.f32.mrb[10].mxu0 }
 0x108   :  { %v531_v31 = vmax.f32 %v523_v27, 0.0  ;;  %v526_v32 = vadd.f32 %v730_v30, %v477_v26  ;;  %v517_v34 = vpop.f32.mrb[11].mxu0 }
 0x109   :  { %v529_v35 = vmax.f32 %v515_v29, 0.0  ;;  %v518_v37 = vadd.f32 %v517_v34, %v469_v9 }
 0x10a   :  { %v532_v38 = vmax.f32 %v526_v32, 0.0  ;;  %v563_v40 = vsel %vm559_vm5, %v531_v31, 0.0 }
 0x10b   :  { %v530_v39 = vmax.f32 %v518_v37, 0.0  ;;  %v561_v42 = vsel %vm557_vm7, %v529_v35, 0.0 }
 0x10c   :  { %v564_v41 = vsel %vm560_vm6, %v532_v38, 0.0 }
 0x10d   :  { %v654_v43 = vpack.c.bf16 %v564_v41, %v563_v40  ;;  %v562_v44 = vsel %vm558_vm8, %v530_v39, 0.0 }
 0x10e   :  { %v649_v45 = vpack.c.bf16 %v562_v44, %v561_v42 }
 0x10f   :  { %656 = vst [vmem:[%s981_s4 + $0x8] sm:$0xff] %v654_v43  }
 0x110   :  { %650 = vst [vmem:[%s981_s4] sm:$0xff] %v649_v45  }

// kernel: net_ptq_forward.11
= control target key start
LH: loop header
LB: loop body
LE: loop exit
PB: predicated region body
PF: predicated region fallthrough
CT: control target
= control target key end

     0   :  { %v1033_v1 = vmov 0   ;;  %s1297_s1 = inlined_call_operand.vmem [shape: bf16[1024,128], index: 1, kind: input, shape index: {}]   ;;  %s1298_s0 = inlined_call_operand.vmem [shape: bf16[16,1024], index: 0, kind: input, shape index: {}]   ;;  %s1299_s3 = inlined_call_operand.vmem [shape: f32[16,1], index: 3, kind: input, shape index: {}]   ;;  %s1300_s2 = inlined_call_operand.vmem [shape: f32[1,128], index: 2, kind: input, shape index: {}]   ;;  %s1301_s4 = inlined_call_operand.vmem [shape: f32[16,128], index: 4, kind: output, shape index: {}]  }
   0x1   :  { %v961_v0 = vld [vmem:[%s1297_s1 + $0x40] sm:$0xff]   ;;  %960 = vset.pattern.permute.xlu0 %v1033_v1  ;;  %v965_v5 = vld [vmem:[%s1297_s1 + $0x48] sm:$0xff]   ;;  %v969_v9 = vld [vmem:[%s1297_s1 + $0x50] sm:$0xff]  }
   0x2   :  { %v962_v2 = vld [vmem:[%s1297_s1 + $0xc0] sm:$0xff]   ;;  %871 = vmatprep.subr.bf16.mxu0 %v961_v0  ;;  %v966_v6 = vld [vmem:[%s1297_s1 + $0xc8] sm:$0xff]   ;;  %v970_v10 = vld [vmem:[%s1297_s1 + $0xd0] sm:$0xff]  }
   0x3   :  { %v963_v3 = vld [vmem:[%s1297_s1] sm:$0xff]   ;;  %893 = vmatprep.subr.bf16.mxu1 %v962_v2  ;;  %v967_v7 = vld [vmem:[%s1297_s1 + $0x8] sm:$0xff]   ;;  %v971_v11 = vld [vmem:[%s1297_s1 + $0x10] sm:$0xff]  }
   0x4   :  { %v964_v4 = vld [vmem:[%s1297_s1 + $0x80] sm:$0xff]   ;;  %872 = vmatpush3.bf16.msra.mxu0 %v963_v3  ;;  %v968_v8 = vld [vmem:[%s1297_s1 + $0x88] sm:$0xff]   ;;  %v972_v12 = vld [vmem:[%s1297_s1 + $0x90] sm:$0xff]  }
   0x5   :  { %894 = vmatpush3.bf16.msra.mxu1 %v964_v4  ;;  %873 = vmatprep.subr.bf16.mxu0 %v965_v5  ;;  %v973_v13 = vld [vmem:[%s1297_s1 + $0x58] sm:$0xff]   ;;  %v977_v17 = vld [vmem:[%s1297_s1 + $0x60] sm:$0xff]   ;;  %v981_v21 = vld [vmem:[%s1297_s1 + $0x68] sm:$0xff]  }
   0x6   :  { %895 = vmatprep.subr.bf16.mxu1 %v966_v6  ;;  %v974_v14 = vld [vmem:[%s1297_s1 + $0xd8] sm:$0xff]   ;;  %v978_v18 = vld [vmem:[%s1297_s1 + $0xe0] sm:$0xff]   ;;  %v982_v22 = vld [vmem:[%s1297_s1 + $0xe8] sm:$0xff]  }
   0x7   :  { %v975_v15 = vld [vmem:[%s1297_s1 + $0x18] sm:$0xff]   ;;  %v979_v19 = vld [vmem:[%s1297_s1 + $0x20] sm:$0xff]   ;;  %v983_v23 = vld [vmem:[%s1297_s1 + $0x28] sm:$0xff]  }
   0x8   :  { %874 = vmatpush3.bf16.msra.mxu0 %v967_v7  ;;  %v976_v16 = vld [vmem:[%s1297_s1 + $0x98] sm:$0xff]   ;;  %v980_v20 = vld [vmem:[%s1297_s1 + $0xa0] sm:$0xff]   ;;  %v984_v24 = vld [vmem:[%s1297_s1 + $0xa8] sm:$0xff]  }
   0x9   :  { %896 = vmatpush3.bf16.msra.mxu1 %v968_v8  ;;  %875 = vmatprep.subr.bf16.mxu0 %v969_v9  ;;  %v985_v25 = vld [vmem:[%s1297_s1 + $0x70] sm:$0xff]   ;;  %v989_v29 = vld [vmem:[%s1297_s1 + $0x78] sm:$0xff]   ;;  %v18_v33 = vld [vmem:[%s1298_s0] sm:$0xff] }
   0xa   :  { %897 = vmatprep.subr.bf16.mxu1 %v970_v10  ;;  %v986_v26 = vld [vmem:[%s1297_s1 + $0xf0] sm:$0xff]   ;;  %v990_v30 = vld [vmem:[%s1297_s1 + $0xf8] sm:$0xff]   ;;  %v22_v34 = vld [vmem:[%s1298_s0 + $0x20] sm:$0xff] }
   0xb   :  { %v987_v27 = vld [vmem:[%s1297_s1 + $0x30] sm:$0xff]   ;;  %v991_v31 = vld [vmem:[%s1297_s1 + $0x38] sm:$0xff]   ;;  %v19_v35 = vld [vmem:[%s1298_s0 + $0x8] sm:$0xff]  ;;  %v799_v36 = vcombine.low %v18_v33, %v22_v34  ;;  %v800_v37 = vcombine.high %v18_v33, %v22_v34 }
   0xc   :  { %876 = vmatpush3.bf16.msra.mxu0 %v971_v11  ;;  %v988_v28 = vld [vmem:[%s1297_s1 + $0xb0] sm:$0xff]   ;;  %v992_v32 = vld [vmem:[%s1297_s1 + $0xb8] sm:$0xff]   ;;  %v23_v38 = vld [vmem:[%s1298_s0 + $0x28] sm:$0xff] }
   0xd   :  { %898 = vmatpush3.bf16.msra.mxu1 %v972_v12  ;;  %877 = vmatprep.subr.bf16.mxu0 %v973_v13  ;;  %v801_v39 = vcombine.low %v19_v35, %v23_v38  ;;  %v802_v40 = vcombine.high %v19_v35, %v23_v38  ;;  %v993_v41 = vld [vmem:[%s1297_s1 + $0x140] sm:$0xff]   ;;  %v997_v45 = vld [vmem:[%s1297_s1 + $0x148] sm:$0xff]   ;;  %v1001_v49 = vld [vmem:[%s1297_s1 + $0x150] sm:$0xff]   ;;  %v765_v38 = vlaneseq }
   0xe   :  { %899 = vmatprep.subr.bf16.mxu1 %v974_v14  ;;  %617 = vmatprep.mubr.bf16.mxu0 %v800_v37  ;;  %v994_v42 = vld [vmem:[%s1297_s1 + $0x1c0] sm:$0xff]   ;;  %v998_v46 = vld [vmem:[%s1297_s1 + $0x1c8] sm:$0xff]   ;;  %v1002_v50 = vld [vmem:[%s1297_s1 + $0x1d0] sm:$0xff]  }
   0xf   :  { %658 = vmatprep.mubr.bf16.mxu1 %v802_v40  ;;  %v995_v43 = vld [vmem:[%s1297_s1 + $0x100] sm:$0xff]   ;;  %v999_v47 = vld [vmem:[%s1297_s1 + $0x108] sm:$0xff]   ;;  %v1003_v51 = vld [vmem:[%s1297_s1 + $0x110] sm:$0xff]  }
  0x10   :  { %878 = vmatpush3.bf16.msra.mxu0 %v975_v15  ;;  %v996_v44 = vld [vmem:[%s1297_s1 + $0x180] sm:$0xff]   ;;  %v1000_v48 = vld [vmem:[%s1297_s1 + $0x188] sm:$0xff]   ;;  %v1004_v52 = vld [vmem:[%s1297_s1 + $0x190] sm:$0xff]  }
  0x11   :  { %900 = vmatpush3.bf16.msra.mxu1 %v976_v16  ;;  %879 = vmatprep.subr.bf16.mxu0 %v977_v17  ;;  %v1005_v53 = vld [vmem:[%s1297_s1 + $0x158] sm:$0xff]   ;;  %v1009_v57 = vld [vmem:[%s1297_s1 + $0x160] sm:$0xff]   ;;  %v1013_v61 = vld [vmem:[%s1297_s1 + $0x168] sm:$0xff]  }
  0x12   :  { %901 = vmatprep.subr.bf16.mxu1 %v978_v18  ;;  %v1006_v54 = vld [vmem:[%s1297_s1 + $0x1d8] sm:$0xff]   ;;  %v1010_v58 = vld [vmem:[%s1297_s1 + $0x1e0] sm:$0xff]   ;;  %v1014_v62 = vld [vmem:[%s1297_s1 + $0x1e8] sm:$0xff]  }
  0x13   :  { %v1007_v55 = vld [vmem:[%s1297_s1 + $0x118] sm:$0xff]   ;;  %v1011_v59 = vld [vmem:[%s1297_s1 + $0x120] sm:$0xff]   ;;  %v1015_v63 = vld [vmem:[%s1297_s1 + $0x128] sm:$0xff]  }
  0x14   :  { %880 = vmatpush3.bf16.msra.mxu0 %v979_v19  ;;  %v1008_v56 = vld [vmem:[%s1297_s1 + $0x198] sm:$0xff]   ;;  %v1012_v60 = vld [vmem:[%s1297_s1 + $0x1a0] sm:$0xff]   ;;  %v1016_v0 = vld [vmem:[%s1297_s1 + $0x1a8] sm:$0xff]  }
  0x15   :  { %902 = vmatpush3.bf16.msra.mxu1 %v980_v20  ;;  %881 = vmatprep.subr.bf16.mxu0 %v981_v21  ;;  %v1017_v2 = vld [vmem:[%s1297_s1 + $0x170] sm:$0xff]   ;;  %v1021_v6 = vld [vmem:[%s1297_s1 + $0x178] sm:$0xff]   ;;  %v749_v16 = vld [vmem:[%s1299_s3] sm:$0xff] }
  0x16   :  { %903 = vmatprep.subr.bf16.mxu1 %v982_v22  ;;  %v1018_v3 = vld [vmem:[%s1297_s1 + $0x1f0] sm:$0xff]   ;;  %v1022_v7 = vld [vmem:[%s1297_s1 + $0x1f8] sm:$0xff]   ;;  %vm751_vm0 = vcmp.gt.f32.partialorder %v749_v16, 0.5  ;;  %v750_v19 = vld [vmem:[%s1299_s3 + $0x8] sm:$0xff] }
  0x17   :  { %v1019_v4 = vld [vmem:[%s1297_s1 + $0x130] sm:$0xff]   ;;  %v1023_v8 = vld [vmem:[%s1297_s1 + $0x138] sm:$0xff]   ;;  %v753_v20 = vsel %vm751_vm0, 1, %v1033_v1  ;;  %vm752_vm1 = vcmp.gt.f32.partialorder %v750_v19, 0.5 }
  0x18   :  { %882 = vmatpush3.bf16.msra.mxu0 %v983_v23  ;;  %v1020_v5 = vld [vmem:[%s1297_s1 + $0x1b0] sm:$0xff]   ;;  %v1024_v9 = vld [vmem:[%s1297_s1 + $0x1b8] sm:$0xff]   ;;  %756 = vperm.xlu0 %960, %v753_v20   ;;  %v754_v21 = vsel %vm752_vm1, 1, %v1033_v1 }
  0x19   :  { %904 = vmatpush3.bf16.msra.mxu1 %v984_v24  ;;  %883 = vmatprep.subr.bf16.mxu0 %v985_v25  ;;  %v20_v10 = vld [vmem:[%s1298_s0 + $0x10] sm:$0xff]  ;;  %v21_v14 = vld [vmem:[%s1298_s0 + $0x18] sm:$0xff]  ;;  %v798_v24 = vld [vmem:[%s1300_s2] ss:$0 sm:$0xff] }
  0x1a   :  { %905 = vmatprep.subr.bf16.mxu1 %v986_v26  ;;  %v24_v11 = vld [vmem:[%s1298_s0 + $0x30] sm:$0xff]  ;;  %v25_v15 = vld [vmem:[%s1298_s0 + $0x38] sm:$0xff] }
  0x1b   :  { %v803_v12 = vcombine.low %v20_v10, %v24_v11  ;;  %v804_v13 = vcombine.high %v20_v10, %v24_v11  ;;  %v805_v17 = vcombine.low %v21_v14, %v25_v15  ;;  %v806_v18 = vcombine.high %v21_v14, %v25_v15 }
  0x1c   :  { %884 = vmatpush3.bf16.msra.mxu0 %v987_v27  ;;  %759 = vperm.xlu0 %960, %v754_v21  }
  0x1d   :  { %906 = vmatpush3.bf16.msra.mxu1 %v988_v28  ;;  %885 = vmatprep.subr.bf16.mxu0 %v989_v29 }
  0x1e   :  { %907 = vmatprep.subr.bf16.mxu1 %v990_v30 }
  0x20   :  { %886 = vmatpush3.bf16.msra.mxu0 %v991_v31 }
  0x21   :  { %908 = vmatpush3.bf16.msra.mxu1 %v992_v32  ;;  %915 = vmatprep.subr.bf16.mxu0 %v993_v41 }
  0x22   :  { %937 = vmatprep.subr.bf16.mxu1 %v994_v42 }
  0x23   :  { %618 = vmatmul.mubr.bf16.vlgmr.msra.gmra.mrb[0].mxu0 %v799_v36 }
  0x24   :  { %659 = vmatmul.mubr.bf16.vlgmr.msra.gmra.mrb[0].mxu1 %v801_v39  ;;  %916 = vmatpush3.bf16.msra.mxu0 %v995_v43 }
  0x25   :  { %938 = vmatpush3.bf16.msra.mxu1 %v996_v44  ;;  %917 = vmatprep.subr.bf16.mxu0 %v997_v45 }
  0x26   :  { %939 = vmatprep.subr.bf16.mxu1 %v998_v46  ;;  %699 = vmatprep.mubr.bf16.mxu0 %v804_v13  ;;  %v766_v46 = vand.u32 127, %v765_v38 }
  0x27   :  { %740 = vmatprep.mubr.bf16.mxu1 %v806_v18 }
  0x28   :  { %918 = vmatpush3.bf16.msra.mxu0 %v999_v47  ;;  %vm767_vm3 = vcmp.lt.s32.totalorder %v766_v46, 10 }
  0x29   :  { %940 = vmatpush3.bf16.msra.mxu1 %v1000_v48  ;;  %919 = vmatprep.subr.bf16.mxu0 %v1001_v49 }
  0x2a   :  { %941 = vmatprep.subr.bf16.mxu1 %v1002_v50 }
  0x2c   :  { %920 = vmatpush3.bf16.msra.mxu0 %v1003_v51 }
  0x2d   :  { %942 = vmatpush3.bf16.msra.mxu1 %v1004_v52  ;;  %921 = vmatprep.subr.bf16.mxu0 %v1005_v53 }
  0x2e   :  { %943 = vmatprep.subr.bf16.mxu1 %v1006_v54 }
  0x30   :  { %922 = vmatpush3.bf16.msra.mxu0 %v1007_v55 }
  0x31   :  { %944 = vmatpush3.bf16.msra.mxu1 %v1008_v56  ;;  %923 = vmatprep.subr.bf16.mxu0 %v1009_v57 }
  0x32   :  { %945 = vmatprep.subr.bf16.mxu1 %v1010_v58 }
  0x34   :  { %924 = vmatpush3.bf16.msra.mxu0 %v1011_v59 }
  0x35   :  { %946 = vmatpush3.bf16.msra.mxu1 %v1012_v60  ;;  %925 = vmatprep.subr.bf16.mxu0 %v1013_v61 }
  0x36   :  { %947 = vmatprep.subr.bf16.mxu1 %v1014_v62 }
  0x38   :  { %926 = vmatpush3.bf16.msra.mxu0 %v1015_v63 }
  0x39   :  { %948 = vmatpush3.bf16.msra.mxu1 %v1016_v0  ;;  %927 = vmatprep.subr.bf16.mxu0 %v1017_v2 }
  0x3a   :  { %949 = vmatprep.subr.bf16.mxu1 %v1018_v3 }
  0x3c   :  { %928 = vmatpush3.bf16.msra.mxu0 %v1019_v4 }
  0x3d   :  { %950 = vmatpush3.bf16.msra.mxu1 %v1020_v5  ;;  %929 = vmatprep.subr.bf16.mxu0 %v1021_v6 }
  0x3e   :  { %951 = vmatprep.subr.bf16.mxu1 %v1022_v7 }
  0x40   :  { %930 = vmatpush3.bf16.msra.mxu0 %v1023_v8 }
  0x41   :  { %952 = vmatpush3.bf16.msra.mxu1 %v1024_v9 }
  0x43   :  { %700 = vmatmul.mubr.bf16.vlgmr.msra.gmra.mrb[4].mxu0 %v803_v12 }
  0x44   :  { %741 = vmatmul.mubr.bf16.vlgmr.msra.gmra.mrb[4].mxu1 %v805_v17 }
  0x97   :  { %v757_v40 = vpop.permute.xlu0 %756 }
  0x98   :  { %vm761_vm2 = vcmp.eq.s32.totalorder %v757_v40, 1 }
  0x9b   :  { %v760_v56 = vpop.permute.xlu0 %759 }
  0x9c   :  { %vm762_vm4 = vcmp.eq.s32.totalorder %v760_v56, 1 }
  0xf6   :  { %v887_v22 = vpop.f32.mrb[0].mxu0 }
  0xf7   :  { %v909_v23 = vpop.f32.mrb[0].mxu1  ;;  %v888_v25 = vpop.f32.mrb[1].mxu0 }
  0xf8   :  { %v889_v26 = vadd.f32 %v888_v25, %v887_v22  ;;  %v910_v27 = vpop.f32.mrb[1].mxu1  ;;  %v890_v28 = vpop.f32.mrb[2].mxu0 }
  0xf9   :  { %v911_v29 = vadd.f32 %v910_v27, %v909_v23  ;;  %v912_v30 = vpop.f32.mrb[2].mxu1  ;;  %v891_v31 = vpop.f32.mrb[3].mxu0 }
  0xfa   :  { %v620_v32 = vadd.f32 %v889_v26, %v798_v24  ;;  %v892_v33 = vadd.f32 %v891_v31, %v890_v28  ;;  %v913_v34 = vpop.f32.mrb[3].mxu1 }
  0xfb   :  { %v914_v35 = vadd.f32 %v913_v34, %v912_v30 }
  0xfc   :  { %v661_v36 = vadd.f32 %v911_v29, %v620_v32  ;;  %v623_v1 = vadd.f32 %v892_v33, %v798_v24 }
  0xfe   :  { %v664_v37 = vadd.f32 %v914_v35, %v623_v1 }
 0x116   :  { %v931_v39 = vpop.f32.mrb[4].mxu0 }
 0x117   :  { %v953_v41 = vpop.f32.mrb[4].mxu1  ;;  %v932_v42 = vpop.f32.mrb[5].mxu0 }
 0x118   :  { %v933_v43 = vadd.f32 %v932_v42, %v931_v39  ;;  %v954_v44 = vpop.f32.mrb[5].mxu1  ;;  %v934_v45 = vpop.f32.mrb[6].mxu0 }
 0x119   :  { %v955_v47 = vadd.f32 %v954_v44, %v953_v41  ;;  %v956_v48 = vpop.f32.mrb[6].mxu1  ;;  %v935_v49 = vpop.f32.mrb[7].mxu0 }
 0x11a   :  { %v702_v50 = vadd.f32 %v933_v43, %v661_v36  ;;  %v936_v51 = vadd.f32 %v935_v49, %v934_v45  ;;  %v957_v52 = vpop.f32.mrb[7].mxu1 }
 0x11b   :  { %v958_v53 = vadd.f32 %v957_v52, %v956_v48 }
 0x11c   :  { %v743_v54 = vadd.f32 %v955_v47, %v702_v50  ;;  %v705_v55 = vadd.f32 %v936_v51, %v664_v37 }
 0x11e   :  { %v746_v57 = vadd.f32 %v958_v53, %v705_v55  ;;  %v763_v58 = vsel %vm761_vm2, %v743_v54, 0.0 }
 0x11f   :  { %v768_v59 = vsel %vm767_vm3, %v763_v58, -inf }
 0x120   :  { %770 = vmax.xlane.f32.xlu1 %v768_v59  ;;  %v764_v60 = vsel %vm762_vm4, %v746_v57, 0.0 }
 0x121   :  { %v769_v61 = vsel %vm767_vm3, %v764_v60, -inf }
 0x124   :  { %772 = vmax.xlane.f32.xlu1 %v769_v61 }
 0x1ad   :  { %v771_v62 = vpop.xlane.xlu1 %770 }
 0x1ae   :  { %v774_v63 = vsub.f32 %v768_v59, %v771_v62 }
 0x1b0   :  { %v776_v0 = vmul.f32 1.442695, %v774_v63 }
 0x1b1   :  { %v773_v2 = vpop.xlane.xlu1 %772 }
 0x1b2   :  { %1025 = vpow2.f32 %v776_v0  ;;  %v775_v3 = vsub.f32 %v769_v61, %v773_v2 }
 0x1b4   :  { %v778_v4 = vmul.f32 1.442695, %v775_v3 }
 0x1b6   :  { %1027 = vpow2.f32 %v778_v4 }
 0x1bc   :  { %v1026_v5 = vpop.eup %1025 }
 0x1bd   :  { %780 = vadd.xlane.f32.xlu0 %v1026_v5 }
 0x1c0   :  { %v1028_v6 = vpop.eup %1027 }
 0x1c1   :  { %782 = vadd.xlane.f32.xlu1 %v1028_v6 }
 0x24a   :  { %v781_v7 = vpop.xlane.xlu0 %780 }
 0x24b   :  { %1029 = vlog2.f32 %v781_v7 }
 0x24e   :  { %v783_v8 = vpop.xlane.xlu1 %782 }
 0x24f   :  { %1031 = vlog2.f32 %v783_v8 }
 0x255   :  { %v1030_v9 = vpop.eup %1029 }
 0x256   :  { %v785_v10 = vmul.f32 0.6931472, %v1030_v9 }
 0x258   :  { %v788_v11 = vsub.f32 %v774_v63, %v785_v10 }
 0x259   :  { %v1032_v12 = vpop.eup %1031 }
 0x25a   :  { %v790_v13 = vsel %vm767_vm3, %v788_v11, 0.0  ;;  %v787_v14 = vmul.f32 0.6931472, %v1032_v12 }
 0x25b   :  { %792 = vst [vmem:[%s1301_s4] sm:$0xff] %v790_v13 }
 0x25c   :  { %v789_v15 = vsub.f32 %v775_v3, %v787_v14 }
 0x25e   :  { %v791_v16 = vsel %vm767_vm3, %v789_v15, 0.0 }
 0x25f   :  { %793 = vst [vmem:[%s1301_s4 + $0x8] sm:$0xff] %v791_v16 }

</bundles_post_ra>
